<compile_context>
chip_gen: v7x
topology: tpu7x:2x2x1
jax: 0.10.0
libtpu: 0.0.40
codegen_flags: <defaults>
</compile_context>

<pallas_src>
import jax
import jax.numpy as jnp
from jax.experimental import pallas as pl
from jax.experimental.pallas import tpu as pltpu

# ---- model constants implied by the PyTorch module --------------------------
OUT_CH = 10          # conv output channels
KSIZE = 3            # conv kernel size
H = W = 28           # spatial size hard-coded by the Linear layer
WPAD = W + 2         # 30: zero-padded width used for the in-kernel layout
SEG = 1024           # 30*30 = 900 padded up to a multiple of 128 lanes
POOL = 2
PH = PW = H // POOL  # 14
NB = 8               # batch elements per grid step (keeps NB*C a multiple of 8)

# lane offsets of the 9 conv taps in the flattened 30-wide layout (kh*30 + kw)
TAP_SHIFTS = tuple(kh * WPAD + kw for kh in range(KSIZE) for kw in range(KSIZE))


def cnn_kernel(x_ref, wconv_ref, cbias_ref, wlin_ref, mask_ref, rowp_ref,
               colp_ref, lbias_ref, out_ref):
    # x_ref    : (NB*C, SEG)             zero-padded 30x30 images, (batch, ch) on sublanes
    # wconv_ref: (NB*OUT_CH, 9*NB*C)     block-diagonal-over-batch conv weight
    # cbias_ref: (NB*OUT_CH, 1)          conv bias (tiled over the batch rows)
    # wlin_ref : (SEG, OUT_CH*K)         linear weight with pool compaction folded in
    # mask_ref : (NB*OUT_CH, OUT_CH*K)   selects the o == o' diagonal blocks
    # rowp_ref : (NB, NB*OUT_CH)         0/1 sum-over-channels matrix
    # colp_ref : (OUT_CH*K, K)           0/1 fold of the channel blocks onto K classes
    # lbias_ref: (1, K)                  linear bias
    # out_ref  : (NB, K)                 logits for this batch block
    x = x_ref[...]

    # --- 9 conv taps via lane rotations (XLU).  Valid output positions only read
    #     within their own row's first 900 lanes, so wraparound / junk only lands
    #     on positions that are ignored downstream.
    taps = []
    for s in TAP_SHIFTS:
        taps.append(x if s == 0 else pltpu.roll(x, shift=SEG - s, axis=1))
    xt = jnp.concatenate(taps, axis=0)                       # (9*NB*C, SEG)

    # --- convolution as a single fused matmul, then bias + ReLU.
    acc = jnp.dot(wconv_ref[...], xt, preferred_element_type=jnp.float32)
    # NOTE: the bias is broadcast onto padded / junk lanes too and survives ReLU;
    # those positions are cancelled by the zero rows of wlin below.
    acc = jnp.maximum(acc + cbias_ref[...], 0.0)             # (NB*OUT_CH, SEG)

    # --- 2x2 max-pool: window max at position q is max{q, q+1, q+30, q+31}.
    #     Only even (row, col) positions are kept by wlin, so junk at other
    #     positions / wraparound is harmless.
    m1 = jnp.maximum(acc, pltpu.roll(acc, shift=SEG - 1, axis=1))
    m2 = jnp.maximum(m1, pltpu.roll(m1, shift=SEG - WPAD, axis=1))

    # --- linear head: one wide contraction over the SEG positions, then two tiny
    #     0/1 matmuls pick the matching-channel diagonal blocks and sum them.
    g = jnp.dot(m2, wlin_ref[...], preferred_element_type=jnp.float32)
    g = g * mask_ref[...]                                    # (NB*OUT_CH, OUT_CH*K)
    out1 = jnp.dot(rowp_ref[...], g, preferred_element_type=jnp.float32)
    out_ref[...] = (jnp.dot(out1, colp_ref[...],
                            preferred_element_type=jnp.float32)
                    + lbias_ref[...])


def cnn_forward_pallas(x, conv_w, conv_b, lin_w, lin_b):
    N, C, h, w = x.shape
    assert (h, w) == (H, W), "Linear layer hard-codes 28x28 inputs"
    K = lin_w.shape[0]
    n_pad = ((N + NB - 1) // NB) * NB

    # -- glue: zero-pad batch + spatial, flatten to (n_pad*C, SEG) -------------
    xp = jnp.pad(x.astype(jnp.float32),
                 ((0, n_pad - N), (0, 0), (1, 1), (1, 1)))    # (n_pad, C, 30, 30)
    xp = xp.reshape(n_pad, C, WPAD * WPAD)
    xp = jnp.pad(xp, ((0, 0), (0, 0), (0, SEG - WPAD * WPAD)))
    xflat = xp.reshape(n_pad * C, SEG)

    # -- glue: conv weight, block-diagonal over the NB batch rows --------------
    wt = conv_w.astype(jnp.float32).reshape(OUT_CH, C, KSIZE * KSIZE)  # [o, c, t]
    wconv = jnp.einsum('oct,bB->botBc', wt, jnp.eye(NB, dtype=jnp.float32))
    wconv = wconv.reshape(NB * OUT_CH, KSIZE * KSIZE * NB * C)
    cbias = jnp.tile(conv_b.astype(jnp.float32), NB).reshape(NB * OUT_CH, 1)

    # -- glue: fold 2x2-pool compaction + channel-major flatten into lin weight
    wl4 = lin_w.astype(jnp.float32).reshape(K, OUT_CH, PH, PW)         # [k, o, i, j]
    w30 = jnp.zeros((OUT_CH, WPAD, WPAD, K), jnp.float32)
    w30 = w30.at[:, 0:2 * PH:2, 0:2 * PW:2, :].set(jnp.transpose(wl4, (1, 2, 3, 0)))
    w30 = w30.reshape(OUT_CH, WPAD * WPAD, K)
    w30 = jnp.pad(w30, ((0, 0), (0, SEG - WPAD * WPAD), (0, 0)))
    wlin = jnp.transpose(w30, (1, 0, 2)).reshape(SEG, OUT_CH * K)      # [q, o*K+k]

    # -- glue: tiny 0/1 matrices for the channel-diagonal reduction ------------
    mask = jnp.tile(jnp.repeat(jnp.eye(OUT_CH, dtype=jnp.float32), K, axis=1),
                    (NB, 1))                                           # (NB*OUT_CH, OUT_CH*K)
    rowp = jnp.repeat(jnp.eye(NB, dtype=jnp.float32), OUT_CH, axis=1)  # (NB, NB*OUT_CH)
    colp = jnp.tile(jnp.eye(K, dtype=jnp.float32), (OUT_CH, 1))        # (OUT_CH*K, K)
    lbias = lin_b.astype(jnp.float32).reshape(1, K)

    grid_spec = pltpu.PrefetchScalarGridSpec(
        num_scalar_prefetch=0,
        grid=(n_pad // NB,),
        in_specs=[
            pl.BlockSpec((NB * C, SEG), lambda n: (n, 0)),
            pl.BlockSpec((NB * OUT_CH, KSIZE * KSIZE * NB * C), lambda n: (0, 0)),
            pl.BlockSpec((NB * OUT_CH, 1), lambda n: (0, 0)),
            pl.BlockSpec((SEG, OUT_CH * K), lambda n: (0, 0)),
            pl.BlockSpec((NB * OUT_CH, OUT_CH * K), lambda n: (0, 0)),
            pl.BlockSpec((NB, NB * OUT_CH), lambda n: (0, 0)),
            pl.BlockSpec((OUT_CH * K, K), lambda n: (0, 0)),
            pl.BlockSpec((1, K), lambda n: (0, 0)),
        ],
        out_specs=pl.BlockSpec((NB, K), lambda n: (n, 0)),
    )
    out = pl.pallas_call(
        cnn_kernel,
        out_shape=jax.ShapeDtypeStruct((n_pad, K), jnp.float32),
        grid_spec=grid_spec,
        compiler_params=pltpu.CompilerParams(
            dimension_semantics=("parallel",)),
    )(xflat, wconv, cbias, wlin, mask, rowp, colp, lbias)
    return out[:N]


def cnn_forward_reference(x, conv_w, conv_b, lin_w, lin_b):
    """Pure-JAX reference matching the PyTorch forward pass."""
    y = jax.lax.conv_general_dilated(
        x, conv_w, window_strides=(1, 1), padding=((1, 1), (1, 1)),
        dimension_numbers=("NCHW", "OIHW", "NCHW"),
        precision=jax.lax.Precision.HIGHEST)
    y = jnp.maximum(y + conv_b[None, :, None, None], 0.0)
    n = x.shape[0]
    y = y.reshape(n, OUT_CH, PH, POOL, PW, POOL).max(axis=(3, 5))
    flat = y.reshape(n, -1)
    return jnp.matmul(flat, lin_w.T,
                      precision=jax.lax.Precision.HIGHEST) + lin_b[None, :]


def init_params(key, in_channels, n_classes):
    k1, k2, k3, k4 = jax.random.split(key, 4)
    conv_w = 0.1 * jax.random.normal(
        k1, (OUT_CH, in_channels, KSIZE, KSIZE), jnp.float32)
    conv_b = 0.1 * jax.random.normal(k2, (OUT_CH,), jnp.float32)
    lin_dim = OUT_CH * PH * PW                       # 10 * 14 * 14 = 1960
    lin_w = 0.05 * jax.random.normal(k3, (n_classes, lin_dim), jnp.float32)
    lin_b = 0.05 * jax.random.normal(k4, (n_classes,), jnp.float32)
    return conv_w, conv_b, lin_w, lin_b


if __name__ == "__main__":
    N, C, N_CLASSES = 2, 3, 10
    key = jax.random.PRNGKey(0)
    kx, kp = jax.random.split(key)
    x = jax.random.normal(kx, (N, C, H, W), jnp.float32)
    conv_w, conv_b, lin_w, lin_b = init_params(kp, C, N_CLASSES)

    out = jax.jit(cnn_forward_pallas)(x, conv_w, conv_b, lin_w, lin_b)
    out = jax.block_until_ready(out)
    assert out.shape == (N, N_CLASSES)

    ref = cnn_forward_reference(x, conv_w, conv_b, lin_w, lin_b)
    if not jnp.allclose(out, ref, rtol=2e-2, atol=2e-2):
        raise AssertionError(
            f"Pallas output mismatch vs reference:\n{out}\n{ref}")
    print("KERNEL_OK")
</pallas_src>

<mosaic_0001>
module attributes {stable_mosaic.version = 11 : i64} {
  func.func @cnn_kernel(%arg0: i32, %arg1: memref<24x1024xf32, #tpu.memory_space<vmem>>, %arg2: memref<80x216xf32, #tpu.memory_space<vmem>>, %arg3: memref<80x1xf32, #tpu.memory_space<vmem>>, %arg4: memref<1024x100xf32, #tpu.memory_space<vmem>>, %arg5: memref<80x100xf32, #tpu.memory_space<vmem>>, %arg6: memref<8x80xf32, #tpu.memory_space<vmem>>, %arg7: memref<100x10xf32, #tpu.memory_space<vmem>>, %arg8: memref<1x10xf32, #tpu.memory_space<vmem>>, %arg9: memref<8x10xf32, #tpu.memory_space<vmem>>) attributes {dimension_semantics = [#tpu.dimension_semantics<parallel>], iteration_bounds = array<i64: 1>, scalar_prefetch = 0 : i64, scratch_operands = 0 : i64, tpu.core_type = #tpu.core_type<tc>, window_params = [{transform_indices = @transform_0, window_bounds = array<i64: 24, 1024>}, {pipeline_mode = #tpu.pipeline_mode<synchronous>, transform_indices = @transform_1, window_bounds = array<i64: 80, 216>}, {pipeline_mode = #tpu.pipeline_mode<synchronous>, transform_indices = @transform_2, window_bounds = array<i64: 80, 1>}, {pipeline_mode = #tpu.pipeline_mode<synchronous>, transform_indices = @transform_3, window_bounds = array<i64: 1024, 100>}, {pipeline_mode = #tpu.pipeline_mode<synchronous>, transform_indices = @transform_4, window_bounds = array<i64: 80, 100>}, {pipeline_mode = #tpu.pipeline_mode<synchronous>, transform_indices = @transform_5, window_bounds = array<i64: 8, 80>}, {pipeline_mode = #tpu.pipeline_mode<synchronous>, transform_indices = @transform_6, window_bounds = array<i64: 100, 10>}, {pipeline_mode = #tpu.pipeline_mode<synchronous>, transform_indices = @transform_7, window_bounds = array<i64: 1, 10>}, {transform_indices = @transform_8, window_bounds = array<i64: 8, 10>}]} {
    %c0 = arith.constant 0 : index
    %c0_0 = arith.constant 0 : index
    %0 = vector.load %arg1[%c0, %c0_0] : memref<24x1024xf32, #tpu.memory_space<vmem>>, vector<24x1024xf32>
    %c1023_i32 = arith.constant 1023 : i32
    %1 = tpu.dynamic_rotate %0 by %c1023_i32 dim 1 : vector<24x1024xf32>, i32 -> vector<24x1024xf32>
    %c1022_i32 = arith.constant 1022 : i32
    %2 = tpu.dynamic_rotate %0 by %c1022_i32 dim 1 : vector<24x1024xf32>, i32 -> vector<24x1024xf32>
    %c994_i32 = arith.constant 994 : i32
    %3 = tpu.dynamic_rotate %0 by %c994_i32 dim 1 : vector<24x1024xf32>, i32 -> vector<24x1024xf32>
    %c993_i32 = arith.constant 993 : i32
    %4 = tpu.dynamic_rotate %0 by %c993_i32 dim 1 : vector<24x1024xf32>, i32 -> vector<24x1024xf32>
    %c992_i32 = arith.constant 992 : i32
    %5 = tpu.dynamic_rotate %0 by %c992_i32 dim 1 : vector<24x1024xf32>, i32 -> vector<24x1024xf32>
    %c964_i32 = arith.constant 964 : i32
    %6 = tpu.dynamic_rotate %0 by %c964_i32 dim 1 : vector<24x1024xf32>, i32 -> vector<24x1024xf32>
    %c963_i32 = arith.constant 963 : i32
    %7 = tpu.dynamic_rotate %0 by %c963_i32 dim 1 : vector<24x1024xf32>, i32 -> vector<24x1024xf32>
    %c962_i32 = arith.constant 962 : i32
    %8 = tpu.dynamic_rotate %0 by %c962_i32 dim 1 : vector<24x1024xf32>, i32 -> vector<24x1024xf32>
    %9 = tpu.concatenate %0, %1, %2, %3, %4, %5, %6, %7, %8 in 0 : vector<24x1024xf32>, vector<24x1024xf32>, vector<24x1024xf32>, vector<24x1024xf32>, vector<24x1024xf32>, vector<24x1024xf32>, vector<24x1024xf32>, vector<24x1024xf32>, vector<24x1024xf32> -> vector<216x1024xf32>
    %c0_1 = arith.constant 0 : index
    %c0_2 = arith.constant 0 : index
    %10 = vector.load %arg2[%c0_1, %c0_2] : memref<80x216xf32, #tpu.memory_space<vmem>>, vector<80x216xf32>
    %cst = arith.constant dense<0.000000e+00> : vector<80x1024xf32>
    %11 = tpu.matmul %10, %9, %cst {dimension_numbers = #tpu.dot_dimension_numbers<[1], [0], [0], [1], [0, 0, 1, 1], [], []>} : vector<80x216xf32>, vector<216x1024xf32>, vector<80x1024xf32> -> vector<80x1024xf32>
    %c0_3 = arith.constant 0 : index
    %c0_4 = arith.constant 0 : index
    %12 = vector.load %arg3[%c0_3, %c0_4] : memref<80x1xf32, #tpu.memory_space<vmem>>, vector<80x1xf32>
    %13 = vector.broadcast %12 : vector<80x1xf32> to vector<80x1024xf32>
    %14 = arith.addf %11, %13 : vector<80x1024xf32>
    %cst_5 = arith.constant 0.000000e+00 : f32
    %15 = vector.broadcast %cst_5 : f32 to vector<80x1024xf32>
    %16 = arith.maximumf %14, %15 : vector<80x1024xf32>
    %c1023_i32_6 = arith.constant 1023 : i32
    %17 = tpu.dynamic_rotate %16 by %c1023_i32_6 dim 1 : vector<80x1024xf32>, i32 -> vector<80x1024xf32>
    %18 = arith.maximumf %16, %17 : vector<80x1024xf32>
    %c994_i32_7 = arith.constant 994 : i32
    %19 = tpu.dynamic_rotate %18 by %c994_i32_7 dim 1 : vector<80x1024xf32>, i32 -> vector<80x1024xf32>
    %20 = arith.maximumf %18, %19 : vector<80x1024xf32>
    %c0_8 = arith.constant 0 : index
    %c0_9 = arith.constant 0 : index
    %21 = vector.load %arg4[%c0_8, %c0_9] : memref<1024x100xf32, #tpu.memory_space<vmem>>, vector<1024x100xf32>
    %cst_10 = arith.constant dense<0.000000e+00> : vector<80x100xf32>
    %22 = tpu.matmul %20, %21, %cst_10 {dimension_numbers = #tpu.dot_dimension_numbers<[1], [0], [0], [1], [0, 0, 1, 1], [], []>} : vector<80x1024xf32>, vector<1024x100xf32>, vector<80x100xf32> -> vector<80x100xf32>
    %c0_11 = arith.constant 0 : index
    %c0_12 = arith.constant 0 : index
    %23 = vector.load %arg5[%c0_11, %c0_12] : memref<80x100xf32, #tpu.memory_space<vmem>>, vector<80x100xf32>
    %24 = arith.mulf %22, %23 : vector<80x100xf32>
    %c0_13 = arith.constant 0 : index
    %c0_14 = arith.constant 0 : index
    %25 = vector.load %arg6[%c0_13, %c0_14] : memref<8x80xf32, #tpu.memory_space<vmem>>, vector<8x80xf32>
    %cst_15 = arith.constant dense<0.000000e+00> : vector<8x100xf32>
    %26 = tpu.matmul %25, %24, %cst_15 {dimension_numbers = #tpu.dot_dimension_numbers<[1], [0], [0], [1], [0, 0, 1, 1], [], []>} : vector<8x80xf32>, vector<80x100xf32>, vector<8x100xf32> -> vector<8x100xf32>
    %c0_16 = arith.constant 0 : index
    %c0_17 = arith.constant 0 : index
    %27 = vector.load %arg7[%c0_16, %c0_17] : memref<100x10xf32, #tpu.memory_space<vmem>>, vector<100x10xf32>
    %cst_18 = arith.constant dense<0.000000e+00> : vector<8x10xf32>
    %28 = tpu.matmul %26, %27, %cst_18 {dimension_numbers = #tpu.dot_dimension_numbers<[1], [0], [0], [1], [0, 0, 1, 1], [], []>} : vector<8x100xf32>, vector<100x10xf32>, vector<8x10xf32> -> vector<8x10xf32>
    %c0_19 = arith.constant 0 : index
    %c0_20 = arith.constant 0 : index
    %29 = vector.load %arg8[%c0_19, %c0_20] : memref<1x10xf32, #tpu.memory_space<vmem>>, vector<1x10xf32>
    %30 = vector.broadcast %29 : vector<1x10xf32> to vector<8x10xf32>
    %31 = arith.addf %28, %30 : vector<8x10xf32>
    %c0_21 = arith.constant 0 : index
    %c0_22 = arith.constant 0 : index
    %32 = vector.load %arg9[%c0_21, %c0_22] : memref<8x10xf32, #tpu.memory_space<vmem>>, vector<8x10xf32>
    tpu.vector_store %arg9[%c0_21, %c0_22], %31 {strides = array<i32>} : memref<8x10xf32, #tpu.memory_space<vmem>>, vector<8x10xf32>,
    return
  }
  func.func @transform_0(%arg0: i32) -> (i32, i32) {
    %c0_i32 = arith.constant 0 : i32
    %c0_i32_0 = arith.constant 0 : i32
    return %arg0, %c0_i32 : i32, i32
  }
  func.func @transform_1(%arg0: i32) -> (i32, i32) {
    %c0_i32 = arith.constant 0 : i32
    %c0_i32_0 = arith.constant 0 : i32
    %c0_i32_1 = arith.constant 0 : i32
    return %c0_i32, %c0_i32_0 : i32, i32
  }
  func.func @transform_2(%arg0: i32) -> (i32, i32) {
    %c0_i32 = arith.constant 0 : i32
    %c0_i32_0 = arith.constant 0 : i32
    %c0_i32_1 = arith.constant 0 : i32
    return %c0_i32, %c0_i32_0 : i32, i32
  }
  func.func @transform_3(%arg0: i32) -> (i32, i32) {
    %c0_i32 = arith.constant 0 : i32
    %c0_i32_0 = arith.constant 0 : i32
    %c0_i32_1 = arith.constant 0 : i32
    return %c0_i32, %c0_i32_0 : i32, i32
  }
  func.func @transform_4(%arg0: i32) -> (i32, i32) {
    %c0_i32 = arith.constant 0 : i32
    %c0_i32_0 = arith.constant 0 : i32
    %c0_i32_1 = arith.constant 0 : i32
    return %c0_i32, %c0_i32_0 : i32, i32
  }
  func.func @transform_5(%arg0: i32) -> (i32, i32) {
    %c0_i32 = arith.constant 0 : i32
    %c0_i32_0 = arith.constant 0 : i32
    %c0_i32_1 = arith.constant 0 : i32
    return %c0_i32, %c0_i32_0 : i32, i32
  }
  func.func @transform_6(%arg0: i32) -> (i32, i32) {
    %c0_i32 = arith.constant 0 : i32
    %c0_i32_0 = arith.constant 0 : i32
    %c0_i32_1 = arith.constant 0 : i32
    return %c0_i32, %c0_i32_0 : i32, i32
  }
  func.func @transform_7(%arg0: i32) -> (i32, i32) {
    %c0_i32 = arith.constant 0 : i32
    %c0_i32_0 = arith.constant 0 : i32
    %c0_i32_1 = arith.constant 0 : i32
    return %c0_i32, %c0_i32_0 : i32, i32
  }
  func.func @transform_8(%arg0: i32) -> (i32, i32) {
    %c0_i32 = arith.constant 0 : i32
    %c0_i32_0 = arith.constant 0 : i32
    return %arg0, %c0_i32 : i32, i32
  }
}

</mosaic_0001>

<bundles_post_ra>
// kernel: tile.22
= control target key start
LH: loop header
LB: loop body
LE: loop exit
PB: predicated region body
PF: predicated region fallthrough
CT: control target
= control target key end

     0   :  { %vm3_vm0 = vcmask 818176   ;;  %s232_s0 = inlined_call_operand.vmem [shape: f32[8,10,100], index: 0, kind: input, shape index: {}]   ;;  %s233_s1 = inlined_call_operand.vmem [shape: f32[80,100], index: 1, kind: output, shape index: {}]  }
   0x1   :  { %v2_v0 = vld [vmem:[%s232_s0] sm:$0xff]   ;;  %v80_v1 = vld [vmem:[%s232_s0 + $0x8] sm:$0x3]   ;;  %v82_v2 = vld [vmem:[%s232_s0 + $0x10] sm:$0xff]  }
   0x2   :  { %4 = vst.msk [vmem:[%s233_s1] sm:$0xff] %vm3_vm0, %v2_v0   ;;  %81 = vst.msk [vmem:[%s233_s1 + $0x8] sm:$0x3] %vm3_vm0, %v80_v1   ;;  %v84_v3 = vld [vmem:[%s232_s0 + $0x18] sm:$0x3]   ;;  %v86_v4 = vld [vmem:[%s232_s0 + $0x20] sm:$0xff]  }
   0x3   :  { %83 = vst.msk [vmem:[%s233_s1 + $0xa] sm:$0xff] %vm3_vm0, %v82_v2   ;;  %v88_v5 = vld [vmem:[%s232_s0 + $0x28] sm:$0x3]   ;;  %85 = vst.msk [vmem:[%s233_s1 + $0x12] sm:$0x3] %vm3_vm0, %v84_v3   ;;  %v90_v6 = vld [vmem:[%s232_s0 + $0x30] sm:$0xff]  }
   0x4   :  { %87 = vst.msk [vmem:[%s233_s1 + $0x14] sm:$0xff] %vm3_vm0, %v86_v4   ;;  %89 = vst.msk [vmem:[%s233_s1 + $0x1c] sm:$0x3] %vm3_vm0, %v88_v5   ;;  %v92_v7 = vld [vmem:[%s232_s0 + $0x38] sm:$0x3]   ;;  %v94_v8 = vld [vmem:[%s232_s0 + $0x40] sm:$0xff]  }
   0x5   :  { %91 = vst.msk [vmem:[%s233_s1 + $0x1e] sm:$0xff] %vm3_vm0, %v90_v6   ;;  %93 = vst.msk [vmem:[%s233_s1 + $0x26] sm:$0x3] %vm3_vm0, %v92_v7   ;;  %v96_v9 = vld [vmem:[%s232_s0 + $0x48] sm:$0x3]   ;;  %v98_v10 = vld [vmem:[%s232_s0 + $0x50] sm:$0xff]  }
   0x6   :  { %95 = vst.msk [vmem:[%s233_s1 + $0x28] sm:$0xff] %vm3_vm0, %v94_v8   ;;  %v100_v11 = vld [vmem:[%s232_s0 + $0x58] sm:$0x3]   ;;  %97 = vst.msk [vmem:[%s233_s1 + $0x30] sm:$0x3] %vm3_vm0, %v96_v9   ;;  %v102_v12 = vld [vmem:[%s232_s0 + $0x60] sm:$0xff]  }
   0x7   :  { %99 = vst.msk [vmem:[%s233_s1 + $0x32] sm:$0xff] %vm3_vm0, %v98_v10   ;;  %101 = vst.msk [vmem:[%s233_s1 + $0x3a] sm:$0x3] %vm3_vm0, %v100_v11   ;;  %v104_v13 = vld [vmem:[%s232_s0 + $0x68] sm:$0x3]   ;;  %v106_v14 = vld [vmem:[%s232_s0 + $0x70] sm:$0xff]  }
   0x8   :  { %103 = vst.msk [vmem:[%s233_s1 + $0x3c] sm:$0xff] %vm3_vm0, %v102_v12   ;;  %105 = vst.msk [vmem:[%s233_s1 + $0x44] sm:$0x3] %vm3_vm0, %v104_v13   ;;  %v108_v15 = vld [vmem:[%s232_s0 + $0x78] sm:$0x3]  }
   0x9   :  { %107 = vst.msk [vmem:[%s233_s1 + $0x46] sm:$0xff] %vm3_vm0, %v106_v14   ;;  %109 = vst.msk [vmem:[%s233_s1 + $0x4e] sm:$0x3] %vm3_vm0, %v108_v15  }

// kernel: tile.27
= control target key start
LH: loop header
LB: loop body
LE: loop exit
PB: predicated region body
PF: predicated region fallthrough
CT: control target
= control target key end

     0   :  { %s77_s6 = smov 3  ;;  %s47_s9 = smov 3  ;;  %vm6_vm0 = vcmask 1043458   ;;  %vm10_vm1 = vcmask 1045508   ;;  %vm14_vm2 = vcmask 1047558   ;;  %vm16_vm3 = vcmask 80896   ;;  %s624_s0 = inlined_call_operand.vmem [shape: f32[10,10,10], index: 0, kind: input, shape index: {}]   ;;  %s625_s1 = inlined_call_operand.vmem [shape: f32[100,10], index: 1, kind: output, shape index: {}]  }
   0x1   :  { %v306_v0 = vld [vmem:[%s624_s0 + $0x88] ss:$16 sm:%s77_s6]   ;;  %s359_s10 = smov 80   ;;  %v300_v1 = vld [vmem:[%s624_s0 + $0x89] ss:$16 sm:%s47_s9]   ;;  %s55_s13 = smov 3 }
   0x2   :  { %79 = vrot.lane.b32.xlu1 %v306_v0, %s359_s10  ;;  %s58_s14 = smov 12  ;;  %s360_s15 = smov 90   ;;  %v302_v2 = vld [vmem:[%s624_s0 + $0x8] ss:$16 sm:%s55_s13]   ;;  %vm44_vm4 = vcmask 818896   ;;  %vm74_vm5 = vcmask 736896  }
   0x3   :  { %49 = vrot.lane.b32.xlu0 %v300_v1, %s360_s15  ;;  %s63_s18 = smov 48  ;;  %s68_s19 = smov 192  ;;  %v303_v3 = vld [vmem:[%s624_s0 + $0x8] ss:$16 sm:%s58_s14]   ;;  %vm104_vm6 = vcmask 654896   ;;  %vm134_vm7 = vcmask 572896  }
   0x4   :  { %v304_v4 = vld [vmem:[%s624_s0 + $0x8] ss:$16 sm:%s63_s18]   ;;  %s25_s24 = smov 3  ;;  %s28_s25 = smov 12  ;;  %v61_v5 = vsel %vm6_vm0, %v303_v3, %v302_v2  ;;  %vm164_vm8 = vcmask 490896   ;;  %vm194_vm9 = vcmask 408896  }
   0x5   :  { %v305_v6 = vld [vmem:[%s624_s0 + $0x8] ss:$16 sm:%s68_s19]   ;;  %v296_v7 = vld [vmem:[%s624_s0 + $0x9] ss:$16 sm:%s25_s24]   ;;  %s33_s30 = smov 48  ;;  %s38_s2 = smov 192  ;;  %v66_v8 = vsel %vm10_vm1, %v304_v4, %v61_v5 }
   0x6   :  { %v297_v9 = vld [vmem:[%s624_s0 + $0x9] ss:$16 sm:%s28_s25]   ;;  %s107_s7 = smov 3  ;;  %v71_v11 = vsel %vm14_vm2, %v305_v6, %v66_v8  ;;  %s85_s13 = smov 3  ;;  %vm224_vm10 = vcmask 326896   ;;  %vm254_vm11 = vcmask 244896  }
   0x7   :  { %v298_v10 = vld [vmem:[%s624_s0 + $0x9] ss:$16 sm:%s33_s30]   ;;  %v31_v12 = vsel %vm6_vm0, %v297_v9, %v296_v7  ;;  %v312_v14 = vld [vmem:[%s624_s0 + $0x87] ss:$16 sm:%s107_s7]   ;;  %s88_s14 = smov 12  ;;  %s93_s17 = smov 48 }
   0x8   :  { %v299_v13 = vld [vmem:[%s624_s0 + $0x9] ss:$16 sm:%s38_s2]   ;;  %72 = vrot.lane.b32.xlu1 %v71_v11, %s359_s10  ;;  %v36_v15 = vsel %vm10_vm1, %v298_v10, %v31_v12  ;;  %s98_s18 = smov 192  ;;  %s137_s23 = smov 3  ;;  %vm284_vm12 = vcmask 162896  }
   0x9   :  { %v308_v16 = vld [vmem:[%s624_s0 + $0x7] ss:$16 sm:%s85_s13]   ;;  %v41_v17 = vsel %vm14_vm2, %v299_v13, %v36_v15  ;;  %s115_s25 = smov 3  ;;  %s118_s26 = smov 12  ;;  %v318_v23 = vld [vmem:[%s624_s0 + $0x86] ss:$16 sm:%s137_s23]  }
   0xa   :  { %v309_v18 = vld [vmem:[%s624_s0 + $0x7] ss:$16 sm:%s88_s14]   ;;  %42 = vrot.lane.b32.xlu0 %v41_v17, %s360_s15  ;;  %s123_s2 = smov 48  ;;  %s128_s3 = smov 192 }
   0xb   :  { %v310_v19 = vld [vmem:[%s624_s0 + $0x7] ss:$16 sm:%s93_s17]   ;;  %v91_v20 = vsel %vm6_vm0, %v309_v18, %v308_v16  ;;  %v314_v24 = vld [vmem:[%s624_s0 + $0x6] ss:$16 sm:%s115_s25]   ;;  %s361_s4 = smov 70   ;;  %s167_s7 = smov 3 }
   0xc   :  { %v311_v21 = vld [vmem:[%s624_s0 + $0x7] ss:$16 sm:%s98_s18]   ;;  %v96_v22 = vsel %vm10_vm1, %v310_v19, %v91_v20  ;;  %109 = vrot.lane.b32.xlu1 %v312_v14, %s361_s4  ;;  %s145_s13 = smov 3  ;;  %s148_s14 = smov 12 }
   0xd   :  { %v101_v25 = vsel %vm14_vm2, %v311_v21, %v96_v22  ;;  %v315_v26 = vld [vmem:[%s624_s0 + $0x6] ss:$16 sm:%s118_s26]   ;;  %s153_s10 = smov 48  ;;  %s158_s16 = smov 192  ;;  %v320_v32 = vld [vmem:[%s624_s0 + $0x5] ss:$16 sm:%s145_s13]  }
   0xe   :  { %v121_v27 = vsel %vm6_vm0, %v315_v26, %v314_v24  ;;  %v316_v28 = vld [vmem:[%s624_s0 + $0x6] ss:$16 sm:%s123_s2]   ;;  %102 = vrot.lane.b32.xlu0 %v101_v25, %s361_s4  ;;  %s362_s21 = smov 60   ;;  %s175_s15 = smov 3 }
   0xf   :  { %v317_v29 = vld [vmem:[%s624_s0 + $0x6] ss:$16 sm:%s128_s3]   ;;  %v126_v30 = vsel %vm10_vm1, %v316_v28, %v121_v27  ;;  %v321_v33 = vld [vmem:[%s624_s0 + $0x5] ss:$16 sm:%s148_s14]   ;;  %s178_s24 = smov 12  ;;  %s183_s29 = smov 48 }
  0x10   :  { %v131_v31 = vsel %vm14_vm2, %v317_v29, %v126_v30  ;;  %139 = vrot.lane.b32.xlu1 %v318_v23, %s362_s21  ;;  %v151_v34 = vsel %vm6_vm0, %v321_v33, %v320_v32  ;;  %v322_v35 = vld [vmem:[%s624_s0 + $0x5] ss:$16 sm:%s153_s10]   ;;  %s188_s30 = smov 192  ;;  %s197_s2 = smov 3 }
  0x11   :  { %v324_v36 = vld [vmem:[%s624_s0 + $0x85] ss:$16 sm:%s167_s7]   ;;  %v156_v37 = vsel %vm10_vm1, %v322_v35, %v151_v34  ;;  %v326_v39 = vld [vmem:[%s624_s0 + $0x4] ss:$16 sm:%s175_s15]   ;;  %s205_s9 = smov 3  ;;  %s208_s11 = smov 12 }
  0x12   :  { %v323_v38 = vld [vmem:[%s624_s0 + $0x5] ss:$16 sm:%s158_s16]   ;;  %132 = vrot.lane.b32.xlu0 %v131_v31, %s362_s21  ;;  %s363_s12 = smov 50   ;;  %s227_s10 = smov 3 }
  0x13   :  { %v161_v40 = vsel %vm14_vm2, %v323_v38, %v156_v37  ;;  %v327_v41 = vld [vmem:[%s624_s0 + $0x4] ss:$16 sm:%s178_s24]   ;;  %s213_s16 = smov 48  ;;  %v332_v47 = vld [vmem:[%s624_s0 + $0x3] ss:$16 sm:%s205_s9]   ;;  %s218_s21 = smov 192 }
  0x14   :  { %v328_v42 = vld [vmem:[%s624_s0 + $0x4] ss:$16 sm:%s183_s29]   ;;  %169 = vrot.lane.b32.xlu1 %v324_v36, %s363_s12  ;;  %v181_v43 = vsel %vm6_vm0, %v327_v41, %v326_v39  ;;  %s235_s15 = smov 3  ;;  %s238_s24 = smov 12 }
  0x15   :  { %v329_v44 = vld [vmem:[%s624_s0 + $0x4] ss:$16 sm:%s188_s30]   ;;  %v186_v46 = vsel %vm10_vm1, %v328_v42, %v181_v43  ;;  %v333_v48 = vld [vmem:[%s624_s0 + $0x3] ss:$16 sm:%s208_s11]   ;;  %s243_s29 = smov 48  ;;  %s364_s30 = smov 40  }
  0x16   :  { %v330_v45 = vld [vmem:[%s624_s0 + $0x84] ss:$16 sm:%s197_s2]   ;;  %162 = vrot.lane.b32.xlu0 %v161_v40, %s363_s12  ;;  %v191_v49 = vsel %vm14_vm2, %v329_v44, %v186_v46  ;;  %v211_v51 = vsel %vm6_vm0, %v333_v48, %v332_v47  ;;  %s257_s4 = smov 3  ;;  %s248_s5 = smov 192 }
  0x17   :  { %v336_v50 = vld [vmem:[%s624_s0 + $0x83] ss:$16 sm:%s227_s10]   ;;  %v338_v55 = vld [vmem:[%s624_s0 + $0x2] ss:$16 sm:%s235_s15]   ;;  %s265_s11 = smov 3  ;;  %s268_s14 = smov 12 }
  0x18   :  { %v334_v52 = vld [vmem:[%s624_s0 + $0x3] ss:$16 sm:%s213_s16]   ;;  %199 = vrot.lane.b32.xlu1 %v330_v45, %s364_s30  ;;  %s273_s10 = smov 48  ;;  %s287_s20 = smov 3 }
  0x19   :  { %v216_v53 = vsel %vm10_vm1, %v334_v52, %v211_v51  ;;  %v335_v54 = vld [vmem:[%s624_s0 + $0x3] ss:$16 sm:%s218_s21]   ;;  %v339_v56 = vld [vmem:[%s624_s0 + $0x2] ss:$16 sm:%s238_s24]   ;;  %s278_s21 = smov 192  ;;  %s365_s22 = smov 30  }
  0x1a   :  { %192 = vrot.lane.b32.xlu0 %v191_v49, %s364_s30  ;;  %v241_v57 = vsel %vm6_vm0, %v339_v56, %v338_v55  ;;  %v340_v58 = vld [vmem:[%s624_s0 + $0x2] ss:$16 sm:%s243_s29]   ;;  %v221_v59 = vsel %vm14_vm2, %v335_v54, %v216_v53  ;;  %s19_s24 = smov 3  ;;  %s2_s25 = smov 3 }
  0x1b   :  { %v342_v60 = vld [vmem:[%s624_s0 + $0x82] ss:$16 sm:%s257_s4]   ;;  %v246_v62 = vsel %vm10_vm1, %v340_v58, %v241_v57  ;;  %v344_v63 = vld [vmem:[%s624_s0 + $0x1] ss:$16 sm:%s265_s11]   ;;  %s4_s30 = smov 12  ;;  %s8_s4 = smov 48 }
  0x1c   :  { %v341_v61 = vld [vmem:[%s624_s0 + $0x2] ss:$16 sm:%s248_s5]   ;;  %229 = vrot.lane.b32.xlu1 %v336_v50, %s365_s22  ;;  %s12_s5 = smov 192  ;;  %s366_s13 = smov 20  }
  0x1d   :  { %v345_v0 = vld [vmem:[%s624_s0 + $0x1] ss:$16 sm:%s268_s14]   ;;  %v251_v4 = vsel %vm14_vm2, %v341_v61, %v246_v62  ;;  %v294_v6 = vld [vmem:[%s624_s0 + $0x80] ss:$16 sm:%s19_s24]  }
  0x1e   :  { %v346_v1 = vld [vmem:[%s624_s0 + $0x1] ss:$16 sm:%s273_s10]   ;;  %222 = vrot.lane.b32.xlu0 %v221_v59, %s365_s22  ;;  %v271_v2 = vsel %vm6_vm0, %v345_v0, %v344_v63  ;;  %295 = vst.msk [vmem:[%s625_s1 + $0x8] sm:$0x3] %vm16_vm3, %v294_v6  }
  0x1f   :  { %v347_v3 = vld [vmem:[%s624_s0 + $0x1] ss:$16 sm:%s278_s21]   ;;  %v3_v7 = vld [vmem:[%s624_s0] ss:$16 sm:%s2_s25]   ;;  %v276_v8 = vsel %vm10_vm1, %v346_v1, %v271_v2 }
  0x20   :  { %v348_v5 = vld [vmem:[%s624_s0 + $0x81] ss:$16 sm:%s287_s20]   ;;  %259 = vrot.lane.b32.xlu1 %v342_v60, %s366_s13  ;;  %v281_v14 = vsel %vm14_vm2, %v347_v3, %v276_v8 }
  0x21   :  { %v5_v9 = vld [vmem:[%s624_s0] ss:$16 sm:%s4_s30]  }
  0x22   :  { %v7_v10 = vsel %vm6_vm0, %v5_v9, %v3_v7  ;;  %v9_v11 = vld [vmem:[%s624_s0] ss:$16 sm:%s8_s4]   ;;  %252 = vrot.lane.b32.xlu0 %v251_v4, %s366_s13 }
  0x23   :  { %v13_v12 = vld [vmem:[%s624_s0] ss:$16 sm:%s12_s5]   ;;  %v11_v13 = vsel %vm10_vm1, %v9_v11, %v7_v10  ;;  %s367_s0 = smov 10  }
  0x24   :  { %v15_v15 = vsel %vm14_vm2, %v13_v12, %v11_v13  ;;  %289 = vrot.lane.b32.xlu1 %v348_v5, %s367_s0 }
  0x25   :  { %17 = vst.msk [vmem:[%s625_s1] sm:$0xff] %vm16_vm3, %v15_v15  }
  0x26   :  { %282 = vrot.lane.b32.xlu0 %v281_v14, %s367_s0 }
  0x74   :  { %v80_v16 = vpop.permute.xlu1 %79  }
  0x75   :  { %v50_v17 = vpop.permute.xlu0 %49  }
  0x76   :  { %301 = vst.msk [vmem:[%s625_s1 + $0x8] sm:$0x3] %vm44_vm4, %v50_v17  }
  0x77   :  { %307 = vst.msk [vmem:[%s625_s1 + $0x8] sm:$0x3] %vm74_vm5, %v80_v16  }
  0x7a   :  { %v73_v18 = vpop.permute.xlu1 %72  }
  0x7c   :  { %v43_v19 = vpop.permute.xlu0 %42  }
  0x7d   :  { %45 = vst.msk [vmem:[%s625_s1] sm:$0xff] %vm44_vm4, %v43_v19  }
  0x7e   :  { %75 = vst.msk [vmem:[%s625_s1] sm:$0xff] %vm74_vm5, %v73_v18   ;;  %v110_v20 = vpop.permute.xlu1 %109  }
  0x7f   :  { %313 = vst.msk [vmem:[%s625_s1 + $0x8] sm:$0x3] %vm104_vm6, %v110_v20  }
  0x80   :  { %v103_v21 = vpop.permute.xlu0 %102  }
  0x81   :  { %105 = vst.msk [vmem:[%s625_s1] sm:$0xff] %vm104_vm6, %v103_v21  }
  0x82   :  { %v140_v22 = vpop.permute.xlu1 %139  }
  0x83   :  { %319 = vst.msk [vmem:[%s625_s1 + $0x8] sm:$0x3] %vm134_vm7, %v140_v22  }
  0x84   :  { %v133_v23 = vpop.permute.xlu0 %132  }
  0x85   :  { %135 = vst.msk [vmem:[%s625_s1] sm:$0xff] %vm134_vm7, %v133_v23  }
  0x86   :  { %v170_v24 = vpop.permute.xlu1 %169  }
  0x87   :  { %325 = vst.msk [vmem:[%s625_s1 + $0x8] sm:$0x3] %vm164_vm8, %v170_v24  }
  0x88   :  { %v163_v25 = vpop.permute.xlu0 %162  }
  0x89   :  { %165 = vst.msk [vmem:[%s625_s1] sm:$0xff] %vm164_vm8, %v163_v25  }
  0x8a   :  { %v200_v26 = vpop.permute.xlu1 %199  }
  0x8b   :  { %331 = vst.msk [vmem:[%s625_s1 + $0x8] sm:$0x3] %vm194_vm9, %v200_v26  }
  0x8c   :  { %v193_v27 = vpop.permute.xlu0 %192  }
  0x8d   :  { %195 = vst.msk [vmem:[%s625_s1] sm:$0xff] %vm194_vm9, %v193_v27  }
  0x8e   :  { %v230_v28 = vpop.permute.xlu1 %229  }
  0x8f   :  { %337 = vst.msk [vmem:[%s625_s1 + $0x8] sm:$0x3] %vm224_vm10, %v230_v28  }
  0x90   :  { %v223_v29 = vpop.permute.xlu0 %222  }
  0x91   :  { %225 = vst.msk [vmem:[%s625_s1] sm:$0xff] %vm224_vm10, %v223_v29  }
  0x92   :  { %v260_v30 = vpop.permute.xlu1 %259  }
  0x93   :  { %343 = vst.msk [vmem:[%s625_s1 + $0x8] sm:$0x3] %vm254_vm11, %v260_v30  }
  0x94   :  { %v253_v31 = vpop.permute.xlu0 %252  }
  0x95   :  { %255 = vst.msk [vmem:[%s625_s1] sm:$0xff] %vm254_vm11, %v253_v31  }
  0x96   :  { %v290_v32 = vpop.permute.xlu1 %289  }
  0x97   :  { %349 = vst.msk [vmem:[%s625_s1 + $0x8] sm:$0x3] %vm284_vm12, %v290_v32  }
  0x98   :  { %v283_v33 = vpop.permute.xlu0 %282  }
  0x99   :  { %285 = vst.msk [vmem:[%s625_s1] sm:$0xff] %vm284_vm12, %v283_v33  }

// kernel: tile.17
= control target key start
LH: loop header
LB: loop body
LE: loop exit
PB: predicated region body
PF: predicated region fallthrough
CT: control target
= control target key end

     0   :  { %s22_s0 = inlined_call_operand.vmem [shape: f32[10], index: 0, kind: input, shape index: {}]   ;;  %s23_s1 = inlined_call_operand.vmem [shape: f32[8,10], index: 1, kind: output, shape index: {}]  }
   0x1   :  { %v4_v0 = vld [vmem:[%s22_s0] ss:$0 sm:$0xff] }
   0x2   :  { %5 = vst [vmem:[%s23_s1] sm:$0xff] %v4_v0 }

// kernel: tile.0
= control target key start
LH: loop header
LB: loop body
LE: loop exit
PB: predicated region body
PF: predicated region fallthrough
CT: control target
= control target key end

     0   :  { %s140_s10 = smov 127   ;;  %vm3_vm0 = vcmask 7168   ;;  %s141_s11 = smov 125   ;;  %s295_s0 = inlined_call_operand.vmem [shape: f32[8,10], index: 0, kind: input, shape index: {}]   ;;  %s296_s1 = inlined_call_operand.vmem [shape: f32[80,1], index: 1, kind: output, shape index: {}]  }
   0x1   :  { %v5_v0 = vld.sshfl [vmem:[%s295_s0] sm:$0xff pattern:$0x36251470]   ;;  %s143_s18 = smov 124   ;;  %s144_s19 = smov 123  }
   0x2   :  { %v29_v1 = vld.sshfl [vmem:[%s295_s0] sm:$0xff pattern:$0x62514703]   ;;  %6 = vrot.lane.b32.xlu0 %v5_v0, %s140_s10  ;;  %s145_s20 = smov 122   ;;  %s146_s21 = smov 121  }
   0x3   :  { %30 = vrot.lane.b32.xlu1 %v29_v1, %s141_s11  ;;  %v2_v2 = vld [vmem:[%s295_s0] sm:$0xff]   ;;  %s147_s22 = smov 120   ;;  %s148_s23 = smov 119  }
   0x4   :  { %4 = vst.msk [vmem:[%s296_s1] ss:$10 sm:$0xff] %vm3_vm0, %v2_v2   ;;  %v41_v3 = vld.sshfl [vmem:[%s295_s0] sm:$0xff pattern:$0x25147036]   ;;  %s142_s0 = smov 126  }
   0x6   :  { %18 = vrot.lane.b32.xlu0 %v29_v1, %s142_s0 }
   0x7   :  { %42 = vrot.lane.b32.xlu1 %v41_v3, %s143_s18 }
   0xa   :  { %52 = vrot.lane.b32.xlu0 %v41_v3, %s144_s19 }
   0xb   :  { %62 = vrot.lane.b32.xlu1 %v41_v3, %s145_s20 }
   0xe   :  { %72 = vrot.lane.b32.xlu0 %v41_v3, %s146_s21 }
   0xf   :  { %82 = vrot.lane.b32.xlu1 %v41_v3, %s147_s22 }
  0x12   :  { %92 = vrot.lane.b32.xlu0 %v41_v3, %s148_s23 }
  0x74   :  { %v7_v4 = vpop.permute.xlu0 %6  }
  0x75   :  { %v31_v5 = vpop.permute.xlu1 %30   ;;  %101 = vst.msk [vmem:[%s296_s1 + $0x1] ss:$70 sm:$0x3] %vm3_vm0, %v7_v4   ;;  %102 = vst.msk [vmem:[%s296_s1 + $0x65] ss:$-30 sm:$0xc] %vm3_vm0, %v7_v4  }
  0x76   :  { %103 = vst.msk [vmem:[%s296_s1 + $0xab] ss:$-30 sm:$0x30] %vm3_vm0, %v7_v4   ;;  %104 = vst.msk [vmem:[%s296_s1 + $0xf1] ss:$-30 sm:$0xc0] %vm3_vm0, %v7_v4  }
  0x77   :  { %109 = vst.msk [vmem:[%s296_s1 + $0x21] ss:$-30 sm:$0x3] %vm3_vm0, %v31_v5   ;;  %110 = vst.msk [vmem:[%s296_s1 + $0x85] ss:$-30 sm:$0x1c] %vm3_vm0, %v31_v5  }
  0x78   :  { %111 = vst.msk [vmem:[%s296_s1 + $0xcb] ss:$-30 sm:$0x60] %vm3_vm0, %v31_v5   ;;  %112 = vst.msk [vmem:[%s296_s1 + $0x38] sm:$0x80] %vm3_vm0, %v31_v5   ;;  %v19_v6 = vpop.permute.xlu0 %18  }
  0x79   :  { %v43_v7 = vpop.permute.xlu1 %42   ;;  %105 = vst.msk [vmem:[%s296_s1 + $0x20] ss:$-30 sm:$0x3] %vm3_vm0, %v19_v6   ;;  %106 = vst.msk [vmem:[%s296_s1 + $0x84] ss:$-30 sm:$0x1c] %vm3_vm0, %v19_v6  }
  0x7a   :  { %107 = vst.msk [vmem:[%s296_s1 + $0xca] ss:$-30 sm:$0x60] %vm3_vm0, %v19_v6   ;;  %108 = vst.msk [vmem:[%s296_s1 + $0x37] sm:$0x80] %vm3_vm0, %v19_v6  }
  0x7b   :  { %113 = vst.msk [vmem:[%s296_s1 + $0x40] ss:$-30 sm:$0x7] %vm3_vm0, %v43_v7   ;;  %114 = vst.msk [vmem:[%s296_s1 + $0xa4] ss:$-30 sm:$0x38] %vm3_vm0, %v43_v7  }
  0x7c   :  { %115 = vst.msk [vmem:[%s296_s1 + $0xea] ss:$-30 sm:$0xc0] %vm3_vm0, %v43_v7   ;;  %v53_v8 = vpop.permute.xlu0 %52  }
  0x7d   :  { %v63_v9 = vpop.permute.xlu1 %62   ;;  %116 = vst.msk [vmem:[%s296_s1 + $0x41] ss:$-30 sm:$0x7] %vm3_vm0, %v53_v8   ;;  %117 = vst.msk [vmem:[%s296_s1 + $0xa5] ss:$-30 sm:$0x38] %vm3_vm0, %v53_v8  }
  0x7e   :  { %118 = vst.msk [vmem:[%s296_s1 + $0xeb] ss:$-30 sm:$0xc0] %vm3_vm0, %v53_v8   ;;  %119 = vst.msk [vmem:[%s296_s1 + $0x42] ss:$-30 sm:$0x7] %vm3_vm0, %v63_v9  }
  0x7f   :  { %120 = vst.msk [vmem:[%s296_s1 + $0xa6] ss:$-30 sm:$0x38] %vm3_vm0, %v63_v9   ;;  %121 = vst.msk [vmem:[%s296_s1 + $0xec] ss:$-30 sm:$0xc0] %vm3_vm0, %v63_v9  }
  0x80   :  { %v73_v10 = vpop.permute.xlu0 %72  }
  0x81   :  { %v83_v11 = vpop.permute.xlu1 %82   ;;  %122 = vst.msk [vmem:[%s296_s1 + $0x43] ss:$-30 sm:$0x7] %vm3_vm0, %v73_v10   ;;  %123 = vst.msk [vmem:[%s296_s1 + $0xa7] ss:$-30 sm:$0x38] %vm3_vm0, %v73_v10  }
  0x82   :  { %124 = vst.msk [vmem:[%s296_s1 + $0xed] ss:$-30 sm:$0xc0] %vm3_vm0, %v73_v10   ;;  %125 = vst.msk [vmem:[%s296_s1 + $0x44] ss:$-30 sm:$0x7] %vm3_vm0, %v83_v11  }
  0x83   :  { %126 = vst.msk [vmem:[%s296_s1 + $0xa8] ss:$-30 sm:$0x38] %vm3_vm0, %v83_v11   ;;  %127 = vst.msk [vmem:[%s296_s1 + $0xee] ss:$-30 sm:$0xc0] %vm3_vm0, %v83_v11  }
  0x84   :  { %v93_v12 = vpop.permute.xlu0 %92  }
  0x85   :  { %128 = vst.msk [vmem:[%s296_s1 + $0x45] ss:$-30 sm:$0x7] %vm3_vm0, %v93_v12   ;;  %129 = vst.msk [vmem:[%s296_s1 + $0xa9] ss:$-30 sm:$0x38] %vm3_vm0, %v93_v12  }
  0x86   :  { %130 = vst.msk [vmem:[%s296_s1 + $0xef] ss:$-30 sm:$0xc0] %vm3_vm0, %v93_v12  }

// kernel: cnn_forward_pallas.1
= control target key start
LH: loop header
LB: loop body
LE: loop exit
PB: predicated region body
PF: predicated region fallthrough
CT: control target
= control target key end

     0   :  { %s4335_s21 = smov 127   ;;  %s4336_s26 = smov 126   ;;  %vm719_vm0 = vcmask 719872   ;;  %v101_v44 = vlaneseq  ;;  %vm4345_vm9 = vmmov 0   ;;  %vm2677_vm10 = vcmask 1043456   ;;  %s8615_s0 = inlined_call_operand.vmem [shape: f32[24,1024], index: 0, kind: input, shape index: {}]   ;;  %s8616_s1 = inlined_call_operand.vmem [shape: f32[80,216], index: 1, kind: input, shape index: {}]   ;;  %s8617_s2 = inlined_call_operand.vmem [shape: f32[80,1], index: 2, kind: input, shape index: {}]   ;;  %s8618_s3 = inlined_call_operand.vmem [shape: f32[1024,100], index: 3, kind: input, shape index: {}]   ;;  %s8619_s6 = inlined_call_operand.vmem [shape: f32[100,10], index: 6, kind: input, shape index: {}]   ;;  %s8620_s4 = inlined_call_operand.vmem [shape: f32[80,100], index: 4, kind: input, shape index: {}]   ;;  %s8621_s5 = inlined_call_operand.vmem [shape: f32[8,80], index: 5, kind: input, shape index: {}]   ;;  %s8622_s7 = inlined_call_operand.vmem [shape: f32[1,10], index: 7, kind: input, shape index: {}]   ;;  %s8623_s8 = inlined_call_operand.vmem [shape: f32[8,10], index: 8, kind: output, shape index: {}]  }
   0x1   :  { %v39_v0 = vld [vmem:[%s8615_s0 + $0x50] sm:$0xff]  ;;  %v4398_v1 = vld [vmem:[%s8615_s0 + $0x88] sm:$0xff]  ;;  %v37_v5 = vld [vmem:[%s8615_s0 + $0x40] sm:$0xff]  ;;  %s4337_s27 = smov 98   ;;  %s4338_s30 = smov 97   ;;  %vm2579_vm11 = vcmask 654336  }
   0x2   :  { %v30_v2 = vld [vmem:[%s8615_s0 + $0x8] sm:$0xff]  ;;  %v4404_v3 = vpack.i.bf16 %v39_v0, %v4398_v1  ;;  %v31_v4 = vld [vmem:[%s8615_s0 + $0x10] sm:$0xff]  ;;  %v29_v8 = vld [vmem:[%s8615_s0] sm:$0xff]  ;;  %s4339_s9 = smov 96   ;;  %s4340_s10 = smov 68   ;;  %v4628_v46 = vand.u32 127, %v101_v44 }
   0x3   :  { %v4415_v6 = vld [vmem:[%s8615_s0 + $0x90] sm:$0xff]  ;;  %v3507_v7 = vpack.i.bf16 %v31_v4, %v30_v2  ;;  %v38_v9 = vld [vmem:[%s8615_s0 + $0x48] sm:$0xff]  ;;  %v4432_v12 = vld [vmem:[%s8615_s0 + $0x18] sm:$0xff]  ;;  %v3702_v16 = vpack.i.bf16 %v39_v0, %v31_v4  ;;  %v3542_v17 = vpack.i.bf16 %v37_v5, %v29_v8  ;;  %v3128_v19 = vpack.c.bf16 %v37_v5, %v29_v8  ;;  %s4341_s11 = smov 67   ;;  %s4342_s23 = smov 66  }
   0x4   :  { %3518 = vrot.lane.b32.xlu1 %v4404_v3, %s4335_s21  ;;  %v4426_v10 = vpack.i.bf16 %v37_v5, %v4415_v6  ;;  %v3512_v11 = vpack.i.bf16 %v38_v9, %v29_v8  ;;  %v4437_v13 = vld [vmem:[%s8615_s0 + $0x80] sm:$0xff]  ;;  %v4441_v14 = vpack.i.bf16 %v38_v9, %v30_v2  ;;  %v3126_v18 = vpack.c.bf16 %v38_v9, %v30_v2  ;;  %v4460_v21 = vld [vmem:[%s8615_s0 + $0x58] sm:$0xff]  ;;  %v4508_v27 = vld [vmem:[%s8615_s0 + $0x28] sm:$0xff] }
   0x5   :  { %3508 = vrot.lane.b32.xlu0 %v3507_v7, %s4335_s21  ;;  %v3527_v15 = vpack.i.bf16 %v4432_v12, %v4437_v13  ;;  %v3547_v20 = vpack.i.bf16 %v4415_v6, %v4398_v1  ;;  %v3852_v22 = vpack.i.bf16 %v4460_v21, %v4432_v12  ;;  %v3178_v23 = vpack.c.bf16 %v4460_v21, %v4432_v12  ;;  %v4493_v25 = vld [vmem:[%s8615_s0 + $0x20] sm:$0xff]  ;;  %v4523_v30 = vld [vmem:[%s8615_s0 + $0x98] sm:$0xff]  ;;  %v640_v35 = vld [vmem:[%s8616_s1 + $0x8] sm:$0xff] }
   0x6   :  { %3127 = vmatprep.subr.bf16.mxu0 %v3126_v18  ;;  %v3180_v24 = vpack.c.bf16 %v39_v0, %v31_v4  ;;  %v4499_v26 = vpack.i.bf16 %v4460_v21, %v4493_v25  ;;  %v4513_v28 = vld [vmem:[%s8615_s0 + $0xa0] sm:$0xff]  ;;  %v4543_v33 = vpack.i.bf16 %v4493_v25, %v4460_v21  ;;  %2757 = vmatprep.mubr.msk.f32.mxu0 %vm719_vm0, %v640_v35  ;;  %v4570_v36 = vld [vmem:[%s8615_s0 + $0x30] sm:$0xff]  ;;  %v4575_v37 = vld [vmem:[%s8615_s0 + $0x68] sm:$0xff]  ;;  %vm103_vm1 = vcmp.lt.s32.totalorder %v4628_v46, 127 }
   0x7   :  { %3129 = vmatpush1.bf16.msra.mxu0 %v3128_v19  ;;  %3179 = vmatprep.subr.bf16.mxu1 %v3178_v23  ;;  %v4518_v29 = vld [vmem:[%s8615_s0 + $0x60] sm:$0xff]  ;;  %v4528_v31 = vpack.i.bf16 %v4508_v27, %v4513_v28  ;;  %v4583_v38 = vpack.i.bf16 %v4575_v37, %v4570_v36  ;;  %v4588_v39 = vld [vmem:[%s8615_s0 + $0x70] sm:$0xff]  ;;  %v4593_v40 = vld [vmem:[%s8615_s0 + $0xa8] sm:$0xff]  ;;  %v4616_v43 = vpack.i.bf16 %v4570_v36, %v4575_v37  ;;  %vm176_vm2 = vcmp.lt.s32.totalorder %v4628_v46, 126 }
   0x8   :  { %3523 = vrot.lane.b32.xlu1 %v4426_v10, %s4335_s21  ;;  %3181 = vmatpush1.bf16.msra.mxu1 %v3180_v24  ;;  %v4534_v32 = vpack.i.bf16 %v4518_v29, %v4523_v30  ;;  %v4552_v34 = vpack.i.bf16 %v4523_v30, %v4518_v29  ;;  %v4599_v41 = vpack.i.bf16 %v4588_v39, %v4593_v40  ;;  %v4610_v42 = vld [vmem:[%s8615_s0 + $0xb0] sm:$0xff]  ;;  %vm249_vm3 = vcmp.lt.s32.totalorder %v4628_v46, 98 }
   0x9   :  { %3513 = vrot.lane.b32.xlu0 %v3512_v11, %s4335_s21  ;;  %2767 = vmatprep.mubr.msk.f32.mxu1 %vm719_vm0, %v640_v35  ;;  %v4626_v45 = vpack.i.bf16 %v4593_v40, %v4588_v39  ;;  %vm322_vm4 = vcmp.lt.s32.totalorder %v4628_v46, 97  ;;  %vm395_vm5 = vcmp.lt.s32.totalorder %v4628_v46, 96  ;;  %vm468_vm6 = vcmp.lt.s32.totalorder %v4628_v46, 68 }
   0xa   :  { %vm541_vm7 = vcmp.lt.s32.totalorder %v4628_v46, 67  ;;  %vm614_vm8 = vcmp.lt.s32.totalorder %v4628_v46, 66  ;;  %v2653_v46 = vld [vmem:[%s8619_s6] sm:$0xff]  ;;  %vm2673_vm12 = vcmask 818176   ;;  %vm2751_vm13 = vcmask 80896  }
   0xc   :  { %3533 = vrot.lane.b32.xlu1 %v4441_v14, %s4336_s26 }
   0xd   :  { %3528 = vrot.lane.b32.xlu0 %v3527_v15, %s4335_s21 }
  0x10   :  { %3543 = vrot.lane.b32.xlu1 %v3542_v17, %s4336_s26 }
  0x11   :  { %3538 = vrot.lane.b32.xlu0 %v3702_v16, %s4336_s26 }
  0x14   :  { %3553 = vrot.lane.b32.xlu1 %v3507_v7, %s4337_s27 }
  0x15   :  { %3548 = vrot.lane.b32.xlu0 %v3547_v20, %s4336_s26 }
  0x18   :  { %3563 = vrot.lane.b32.xlu1 %v3512_v11, %s4337_s27 }
  0x19   :  { %3558 = vrot.lane.b32.xlu0 %v3527_v15, %s4336_s26 }
  0x1c   :  { %3573 = vrot.lane.b32.xlu1 %v4426_v10, %s4337_s27 }
  0x1d   :  { %3568 = vrot.lane.b32.xlu0 %v4404_v3, %s4337_s27 }
  0x20   :  { %3583 = vrot.lane.b32.xlu1 %v4441_v14, %s4338_s30 }
  0x21   :  { %3578 = vrot.lane.b32.xlu0 %v3527_v15, %s4337_s27 }
  0x24   :  { %3593 = vrot.lane.b32.xlu1 %v3542_v17, %s4338_s30 }
  0x25   :  { %3588 = vrot.lane.b32.xlu0 %v3702_v16, %s4338_s30 }
  0x28   :  { %3603 = vrot.lane.b32.xlu1 %v3507_v7, %s4339_s9 }
  0x29   :  { %3598 = vrot.lane.b32.xlu0 %v3547_v20, %s4338_s30 }
  0x2c   :  { %3613 = vrot.lane.b32.xlu1 %v3512_v11, %s4339_s9 }
  0x2d   :  { %3608 = vrot.lane.b32.xlu0 %v3527_v15, %s4338_s30 }
  0x30   :  { %3623 = vrot.lane.b32.xlu1 %v4426_v10, %s4339_s9 }
  0x31   :  { %3618 = vrot.lane.b32.xlu0 %v4404_v3, %s4339_s9 }
  0x34   :  { %3633 = vrot.lane.b32.xlu1 %v4441_v14, %s4340_s10 }
  0x35   :  { %3628 = vrot.lane.b32.xlu0 %v3527_v15, %s4339_s9 }
  0x38   :  { %3643 = vrot.lane.b32.xlu1 %v3542_v17, %s4340_s10 }
  0x39   :  { %3638 = vrot.lane.b32.xlu0 %v3702_v16, %s4340_s10 }
  0x3c   :  { %3653 = vrot.lane.b32.xlu1 %v3507_v7, %s4341_s11 }
  0x3d   :  { %3648 = vrot.lane.b32.xlu0 %v3547_v20, %s4340_s10 }
  0x40   :  { %3663 = vrot.lane.b32.xlu1 %v3512_v11, %s4341_s11 }
  0x41   :  { %3658 = vrot.lane.b32.xlu0 %v3527_v15, %s4340_s10 }
  0x44   :  { %3673 = vrot.lane.b32.xlu1 %v4404_v3, %s4341_s11 }
  0x45   :  { %3668 = vrot.lane.b32.xlu0 %v4499_v26, %s4335_s21 }
  0x48   :  { %3683 = vrot.lane.b32.xlu1 %v3527_v15, %s4341_s11 }
  0x49   :  { %3678 = vrot.lane.b32.xlu0 %v4426_v10, %s4341_s11 }
  0x4c   :  { %3693 = vrot.lane.b32.xlu1 %v4528_v31, %s4335_s21 }
  0x4d   :  { %3688 = vrot.lane.b32.xlu0 %v4534_v32, %s4335_s21 }
  0x50   :  { %3703 = vrot.lane.b32.xlu1 %v3702_v16, %s4342_s23 }
  0x51   :  { %3698 = vrot.lane.b32.xlu0 %v4441_v14, %s4342_s23 }
  0x54   :  { %3713 = vrot.lane.b32.xlu1 %v4543_v33, %s4336_s26 }
  0x55   :  { %3708 = vrot.lane.b32.xlu0 %v3542_v17, %s4342_s23 }
  0x58   :  { %3723 = vrot.lane.b32.xlu1 %v4528_v31, %s4336_s26 }
  0x59   :  { %3718 = vrot.lane.b32.xlu0 %v4552_v34, %s4336_s26 }
  0x5c   :  { %576 = vrot.lane.b32.xlu1 %v4398_v1, %s4342_s23 }
  0x5d   :  { %3728 = vrot.lane.b32.xlu0 %v4499_v26, %s4337_s27 }
  0x60   :  { %570 = vrot.lane.b32.xlu1 %v4437_v13, %s4342_s23 }
  0x61   :  { %582 = vrot.lane.b32.xlu0 %v4415_v6, %s4342_s23 }
  0x64   :  { %3738 = vrot.lane.b32.xlu1 %v4534_v32, %s4337_s27 }
  0x65   :  { %3733 = vrot.lane.b32.xlu0 %v4583_v38, %s4335_s21 }
  0x68   :  { %3748 = vrot.lane.b32.xlu1 %v4599_v41, %s4335_s21 }
  0x69   :  { %3743 = vrot.lane.b32.xlu0 %v4528_v31, %s4337_s27 }
  0x6c   :  { %3753 = vrot.lane.b32.xlu1 %v4543_v33, %s4338_s30 }
  0x6d   :  { %93 = vrot.lane.b32.xlu0 %v4610_v42, %s4335_s21 }
  0x70   :  { %3763 = vrot.lane.b32.xlu1 %v4616_v43, %s4336_s26 }
  0x71   :  { %3758 = vrot.lane.b32.xlu0 %v4552_v34, %s4338_s30 }
  0x74   :  { %3773 = vrot.lane.b32.xlu1 %v4528_v31, %s4338_s30 }
  0x75   :  { %3768 = vrot.lane.b32.xlu0 %v4626_v45, %s4336_s26 }
  0x76   :  { %v4634_v47 = vpop.permute.xlu1 %3518 }
  0x77   :  { %v4636_v48 = vpop.permute.xlu0 %3508  ;;  %v3520_v51 = vunpack.i.l.bf16 %v4634_v47  ;;  %v3521_v52 = vunpack.i.h.bf16 %v4634_v47 }
  0x78   :  { %v3511_v49 = vunpack.i.h.bf16 %v4636_v48  ;;  %v3510_v50 = vunpack.i.l.bf16 %v4636_v48  ;;  %168 = vrot.lane.b32.xlu1 %v4610_v42, %s4336_s26 }
  0x79   :  { %3778 = vrot.lane.b32.xlu0 %v4499_v26, %s4339_s9 }
  0x7a   :  { %v4647_v53 = vpop.permute.xlu1 %3523  ;;  %v119_v54 = vsel %vm103_vm1, %v3510_v50, %v3511_v49 }
  0x7b   :  { %v3525_v55 = vunpack.i.l.bf16 %v4647_v53  ;;  %v4654_v56 = vpop.permute.xlu0 %3513  ;;  %v3130_v57 = vpack.c.bf16 %v119_v54, %v4398_v1  ;;  %v8635_v61 = vunpack.i.h.bf16 %v4647_v53 }
  0x7c   :  { %v3516_v58 = vunpack.i.h.bf16 %v4654_v56  ;;  %v8636_v59 = vunpack.i.l.bf16 %v4654_v56  ;;  %3788 = vrot.lane.b32.xlu1 %v4534_v32, %s4339_s9 }
  0x7d   :  { %3783 = vrot.lane.b32.xlu0 %v4583_v38, %s4337_s27  ;;  %3131 = vmatprep.subr.bf16.mxu0 %v3130_v57  ;;  %v121_v60 = vsel %vm103_vm1, %v3520_v51, %v3525_v55 }
  0x7e   :  { %v3534_v62 = vpop.permute.xlu1 %3533  ;;  %v122_v63 = vsel %vm103_vm1, %v8636_v59, %v3510_v50  ;;  %v120_v0 = vsel %vm103_vm1, %v3516_v58, %v3521_v52  ;;  %v123_v9 = vsel %vm103_vm1, %v8635_v61, %v3516_v58 }
  0x7f   :  { %v4676_v1 = vpop.permute.xlu0 %3528  ;;  %v3132_v2 = vpack.c.bf16 %v122_v63, %v4437_v13  ;;  %v3134_v3 = vpack.c.bf16 %v121_v60, %v120_v0  ;;  %v3536_v5 = vunpack.i.h.bf16 %v3534_v62  ;;  %v3535_v7 = vunpack.i.l.bf16 %v3534_v62 }
  0x80   :  { %v8634_v4 = vunpack.i.l.bf16 %v4676_v1  ;;  %3798 = vrot.lane.b32.xlu1 %v4599_v41, %s4337_s27 }
  0x81   :  { %3793 = vrot.lane.b32.xlu0 %v4528_v31, %s4339_s9  ;;  %3133 = vmatpush1.bf16.msra.mxu0 %v3132_v2 }
  0x82   :  { %3135 = vmatprep.subr.bf16.mxu0 %v3134_v3  ;;  %v4684_v8 = vpop.permute.xlu1 %3543  ;;  %v124_v10 = vsel %vm103_vm1, %v8634_v4, %v3520_v51 }
  0x83   :  { %v8630_v11 = vunpack.i.h.bf16 %v4684_v8  ;;  %v8631_v13 = vunpack.i.l.bf16 %v4684_v8  ;;  %v4697_v14 = vpop.permute.xlu0 %3538  ;;  %v3136_v15 = vpack.c.bf16 %v124_v10, %v123_v9 }
  0x84   :  { %v3541_v16 = vunpack.i.h.bf16 %v4697_v14  ;;  %v8663_v17 = vunpack.i.l.bf16 %v4697_v14  ;;  %3803 = vrot.lane.b32.xlu1 %v4543_v33, %s4340_s10 }
  0x85   :  { %241 = vrot.lane.b32.xlu0 %v4610_v42, %s4337_s27  ;;  %3137 = vmatpush1.bf16.msra.mxu0 %v3136_v15  ;;  %v195_v18 = vsel %vm176_vm2, %v8631_v13, %v3535_v7  ;;  %v196_v19 = vsel %vm176_vm2, %v8630_v11, %v3536_v5 }
  0x86   :  { %v4713_v20 = vpop.permute.xlu1 %3553  ;;  %v192_v23 = vsel %vm176_vm2, %v3535_v7, %v8663_v17  ;;  %v193_v24 = vsel %vm176_vm2, %v3536_v5, %v3541_v16  ;;  %v3140_v33 = vpack.c.bf16 %v196_v19, %v195_v18 }
  0x87   :  { %v8657_v35 = vunpack.i.h.bf16 %v4713_v20  ;;  %v3555_v44 = vunpack.i.l.bf16 %v4713_v20  ;;  %v4726_v50 = vpop.permute.xlu0 %3548  ;;  %v3138_v51 = vpack.c.bf16 %v193_v24, %v192_v23 }
  0x88   :  { %v8658_v54 = vunpack.i.h.bf16 %v4726_v50  ;;  %v3550_v57 = vunpack.i.l.bf16 %v4726_v50  ;;  %3813 = vrot.lane.b32.xlu1 %v4616_v43, %s4338_s30 }
  0x89   :  { %3808 = vrot.lane.b32.xlu0 %v4552_v34, %s4340_s10  ;;  %3139 = vmatprep.subr.bf16.mxu0 %v3138_v51  ;;  %v265_v58 = vsel %vm249_vm3, %v3555_v44, %v8657_v35 }
  0x8a   :  { %3141 = vmatpush1.bf16.msra.mxu0 %v3140_v33  ;;  %v4738_v60 = vpop.permute.xlu1 %3563  ;;  %v194_v62 = vsel %vm176_vm2, %v3550_v57, %v8658_v54 }
  0x8b   :  { %v8629_v63 = vunpack.i.l.bf16 %v4738_v60  ;;  %v4745_v0 = vpop.permute.xlu0 %3558  ;;  %v3142_v2 = vpack.c.bf16 %v265_v58, %v194_v62  ;;  %v3566_v5 = vunpack.i.h.bf16 %v4738_v60 }
  0x8c   :  { %v8624_v34 = vunpack.i.l.bf16 %v4745_v0  ;;  %3823 = vrot.lane.b32.xlu1 %v4528_v31, %s4340_s10 }
  0x8d   :  { %3818 = vrot.lane.b32.xlu0 %v4626_v45, %s4338_s30  ;;  %3143 = vmatprep.subr.bf16.mxu0 %v3142_v2  ;;  %v268_v3 = vsel %vm249_vm3, %v8629_v63, %v3555_v44 }
  0x8e   :  { %v4757_v7 = vpop.permute.xlu1 %3573  ;;  %v197_v9 = vsel %vm176_vm2, %v8624_v34, %v3550_v57 }
  0x8f   :  { %8903 = vst [vmem:[#allocation2_spill] sm:$0xff] %v4757_v7  ;;  %v8648_v10 = vunpack.i.l.bf16 %v4757_v7  ;;  %v4764_v15 = vpop.permute.xlu0 %3568  ;;  %v3144_v18 = vpack.c.bf16 %v268_v3, %v197_v9  ;;  %v8628_v24 = vunpack.i.h.bf16 %v4757_v7 }
  0x90   :  { %v8647_v19 = vunpack.i.h.bf16 %v4764_v15  ;;  %v3570_v23 = vunpack.i.l.bf16 %v4764_v15  ;;  %314 = vrot.lane.b32.xlu1 %v4610_v42, %s4338_s30 }
  0x91   :  { %3828 = vrot.lane.b32.xlu0 %v4499_v26, %s4341_s11  ;;  %3145 = vmatpush1.bf16.msra.mxu0 %v3144_v18  ;;  %v269_v9 = vsel %vm249_vm3, %v8628_v24, %v3566_v5 }
  0x92   :  { %v3584_v33 = vpop.permute.xlu1 %3583  ;;  %v266_v44 = vsel %vm249_vm3, %v3566_v5, %v8647_v19  ;;  %v267_v51 = vsel %vm249_vm3, %v3570_v23, %v8648_v10 }
  0x93   :  { %v4781_v57 = vpop.permute.xlu0 %3578  ;;  %v3146_v58 = vpack.c.bf16 %v267_v51, %v266_v44  ;;  %v3586_v26 = vunpack.i.h.bf16 %v3584_v33  ;;  %v3585_v2 = vunpack.i.l.bf16 %v3584_v33 }
  0x94   :  { %8904 = vst [vmem:[#allocation3_spill] sm:$0xff] %v4781_v57  ;;  %v8626_v62 = vunpack.i.l.bf16 %v4781_v57  ;;  %3838 = vrot.lane.b32.xlu1 %v4534_v32, %s4341_s11 }
  0x95   :  { %3833 = vrot.lane.b32.xlu0 %v4583_v38, %s4339_s9  ;;  %3147 = vmatprep.subr.bf16.mxu0 %v3146_v58 }
  0x96   :  { %v4788_v3 = vpop.permute.xlu1 %3593  ;;  %v270_v18 = vsel %vm249_vm3, %v8626_v62, %v3570_v23 }
  0x97   :  { %8905 = vst [vmem:[#allocation4_spill] sm:$0xff] %v4788_v3  ;;  %v8627_v32 = vunpack.i.h.bf16 %v4788_v3  ;;  %v8625_v33 = vunpack.i.l.bf16 %v4788_v3  ;;  %v4801_v44 = vpop.permute.xlu0 %3588  ;;  %v3148_v51 = vpack.c.bf16 %v270_v18, %v269_v9 }
  0x98   :  { %v8642_v58 = vunpack.i.h.bf16 %v4801_v44  ;;  %v8641_v34 = vunpack.i.l.bf16 %v4801_v44  ;;  %3848 = vrot.lane.b32.xlu1 %v4599_v41, %s4339_s9 }
  0x99   :  { %3843 = vrot.lane.b32.xlu0 %v4528_v31, %s4341_s11  ;;  %3149 = vmatpush1.bf16.msra.mxu0 %v3148_v51  ;;  %v341_v5 = vsel %vm322_vm4, %v8625_v33, %v3585_v2  ;;  %v342_v23 = vsel %vm322_vm4, %v8627_v32, %v3586_v26 }
  0x9a   :  { %v4817_v9 = vpop.permute.xlu1 %3603  ;;  %v338_v18 = vsel %vm322_vm4, %v3585_v2, %v8641_v34  ;;  %v339_v31 = vsel %vm322_vm4, %v3586_v26, %v8642_v58  ;;  %v3152_v51 = vpack.c.bf16 %v342_v23, %v341_v5  ;;  %v3857_v26 = vpack.i.bf16 %v4518_v29, %v4493_v25 }
  0x9b   :  { %v8637_v33 = vunpack.i.h.bf16 %v4817_v9  ;;  %v3605_v62 = vunpack.i.l.bf16 %v4817_v9  ;;  %v4830_v32 = vpop.permute.xlu0 %3598  ;;  %v3150_v24 = vpack.c.bf16 %v339_v31, %v338_v18 }
  0x9c   :  { %v8640_v63 = vunpack.i.h.bf16 %v4830_v32  ;;  %v3600_v11 = vunpack.i.l.bf16 %v4830_v32  ;;  %3853 = vrot.lane.b32.xlu1 %v3852_v22, %s4342_s23 }
  0x9d   :  { %387 = vrot.lane.b32.xlu0 %v4610_v42, %s4339_s9  ;;  %3151 = vmatprep.subr.bf16.mxu0 %v3150_v24  ;;  %v411_v2 = vsel %vm395_vm5, %v3605_v62, %v8637_v33 }
  0x9e   :  { %3153 = vmatpush1.bf16.msra.mxu0 %v3152_v51  ;;  %v4846_v5 = vpop.permute.xlu1 %3613  ;;  %v340_v12 = vsel %vm322_vm4, %v3600_v11, %v8640_v63 }
  0x9f   :  { %8906 = vst [vmem:[#allocation5_spill] sm:$0xff] %v4846_v5  ;;  %v8633_v21 = vunpack.i.l.bf16 %v4846_v5  ;;  %v4853_v22 = vpop.permute.xlu0 %3608  ;;  %v3154_v24 = vpack.c.bf16 %v411_v2, %v340_v12  ;;  %v3616_v31 = vunpack.i.h.bf16 %v4846_v5 }
  0xa0   :  { %8907 = vst [vmem:[#allocation6_spill] sm:$0xff] %v4853_v22  ;;  %v8632_v23 = vunpack.i.l.bf16 %v4853_v22  ;;  %3863 = vrot.lane.b32.xlu1 %v4616_v43, %s4340_s10 }
  0xa1   :  { %3858 = vrot.lane.b32.xlu0 %v3857_v26, %s4342_s23  ;;  %3155 = vmatprep.subr.bf16.mxu0 %v3154_v24  ;;  %v414_v18 = vsel %vm395_vm5, %v8633_v21, %v3605_v62  ;;  %v4887_v62 = vld [vmem:[%s8615_s0 + $0x78] sm:$0xff] }
  0xa2   :  { %v4864_v51 = vpop.permute.xlu1 %3623  ;;  %v343_v2 = vsel %vm322_vm4, %v8632_v23, %v3600_v11  ;;  %v4882_v11 = vld [vmem:[%s8615_s0 + $0x38] sm:$0xff] }
  0xa3   :  { %8908 = vst [vmem:[#allocation7_spill] sm:$0xff] %v4864_v51  ;;  %v8639_v12 = vunpack.i.l.bf16 %v4864_v51  ;;  %v4871_v43 = vpop.permute.xlu0 %3618  ;;  %v3156_v26 = vpack.c.bf16 %v414_v18, %v343_v2  ;;  %v8646_v18 = vunpack.i.h.bf16 %v4864_v51  ;;  %v4905_v61 = vpack.i.bf16 %v4887_v62, %v4882_v11 }
  0xa4   :  { %v8638_v24 = vunpack.i.h.bf16 %v4871_v43  ;;  %v3620_v13 = vunpack.i.l.bf16 %v4871_v43  ;;  %588 = vrot.lane.b32.xlu1 %v4523_v30, %s4342_s23 }
  0xa5   :  { %3868 = vrot.lane.b32.xlu0 %v4626_v45, %s4340_s10  ;;  %3157 = vmatpush1.bf16.msra.mxu0 %v3156_v26 }
  0xa6   :  { %v3634_v2 = vpop.permute.xlu1 %3633  ;;  %v412_v23 = vsel %vm395_vm5, %v3616_v31, %v8638_v24  ;;  %v413_v45 = vsel %vm395_vm5, %v3620_v13, %v8639_v12 }
  0xa7   :  { %v4898_v26 = vpop.permute.xlu0 %3628  ;;  %v3158_v21 = vpack.c.bf16 %v413_v45, %v412_v23  ;;  %v3636_v59 = vunpack.i.h.bf16 %v3634_v2  ;;  %v3635_v33 = vunpack.i.l.bf16 %v3634_v2  ;;  %v415_v23 = vsel %vm395_vm5, %v8646_v18, %v3616_v31 }
  0xa8   :  { %8909 = vst [vmem:[#allocation8_spill] sm:$0xff] %v4898_v26  ;;  %v8644_v4 = vunpack.i.l.bf16 %v4898_v26  ;;  %460 = vrot.lane.b32.xlu1 %v4610_v42, %s4340_s10 }
  0xa9   :  { %594 = vrot.lane.b32.xlu0 %v4513_v28, %s4342_s23  ;;  %3159 = vmatprep.subr.bf16.mxu0 %v3158_v21 }
  0xaa   :  { %v4909_v24 = vpop.permute.xlu1 %3643  ;;  %v416_v45 = vsel %vm395_vm5, %v8644_v4, %v3620_v13 }
  0xab   :  { %8910 = vst [vmem:[#allocation9_spill] sm:$0xff] %v4909_v24  ;;  %v8645_v2 = vunpack.i.h.bf16 %v4909_v24  ;;  %v8643_v12 = vunpack.i.l.bf16 %v4909_v24  ;;  %v4922_v63 = vpop.permute.xlu0 %3638  ;;  %v3160_v21 = vpack.c.bf16 %v416_v45, %v415_v23 }
  0xac   :  { %v8652_v34 = vunpack.i.h.bf16 %v4922_v63  ;;  %v8650_v58 = vunpack.i.l.bf16 %v4922_v63  ;;  %3878 = vrot.lane.b32.xlu1 %v4905_v61, %s4335_s21 }
  0xad   :  { %3873 = vrot.lane.b32.xlu0 %v4583_v38, %s4341_s11  ;;  %3161 = vmatpush1.bf16.msra.mxu0 %v3160_v21  ;;  %v487_v13 = vsel %vm468_vm6, %v8643_v12, %v3635_v33  ;;  %v488_v31 = vsel %vm468_vm6, %v8645_v2, %v3636_v59 }
  0xae   :  { %v4938_v23 = vpop.permute.xlu1 %3653  ;;  %v484_v45 = vsel %vm468_vm6, %v3635_v33, %v8650_v58  ;;  %v485_v38 = vsel %vm468_vm6, %v3636_v59, %v8652_v34  ;;  %v3164_v21 = vpack.c.bf16 %v488_v31, %v487_v13  ;;  %v3887_v59 = vpack.i.bf16 %v4575_v37, %v4508_v27  ;;  %v4970_v31 = vld [vmem:[%s8615_s0 + $0xb8] sm:$0xff] }
  0xaf   :  { %v8649_v12 = vunpack.i.h.bf16 %v4938_v23  ;;  %v3655_v4 = vunpack.i.l.bf16 %v4938_v23  ;;  %v4951_v2 = vpop.permute.xlu0 %3648  ;;  %v3162_v18 = vpack.c.bf16 %v485_v38, %v484_v45  ;;  %v3892_v58 = vpack.i.bf16 %v4588_v39, %v4570_v36 }
  0xb0   :  { %v8651_v19 = vunpack.i.h.bf16 %v4951_v2  ;;  %v3650_v10 = vunpack.i.l.bf16 %v4951_v2  ;;  %533 = vrot.lane.b32.xlu1 %v4610_v42, %s4341_s11 }
  0xb1   :  { %3883 = vrot.lane.b32.xlu0 %v4599_v41, %s4341_s11  ;;  %3163 = vmatprep.subr.bf16.mxu0 %v3162_v18  ;;  %v557_v33 = vsel %vm541_vm7, %v3655_v4, %v8649_v12 }
  0xb2   :  { %3165 = vmatpush1.bf16.msra.mxu0 %v3164_v21  ;;  %v4965_v13 = vpop.permute.xlu1 %3663  ;;  %v486_v45 = vsel %vm468_vm6, %v3650_v10, %v8651_v19  ;;  %v3531_v21 = vunpack.i.h.bf16 %v4676_v1 }
  0xb3   :  { %8911 = vst [vmem:[#allocation10_spill] sm:$0xff] %v4965_v13  ;;  %v8654_v41 = vunpack.i.l.bf16 %v4965_v13  ;;  %v4977_v18 = vpop.permute.xlu0 %3658  ;;  %v3166_v38 = vpack.c.bf16 %v557_v33, %v486_v45 }
  0xb4   :  { %8912 = vst [vmem:[#allocation11_spill] sm:$0xff] %v4977_v18  ;;  %v8653_v12 = vunpack.i.l.bf16 %v4977_v18  ;;  %3888 = vrot.lane.b32.xlu1 %v3887_v59, %s4342_s23  ;;  %v116_v39 = vsel %vm103_vm1, %v3511_v49, %v3531_v21 }
  0xb5   :  { %99 = vrot.lane.b32.xlu0 %v4970_v31, %s4335_s21  ;;  %3167 = vmatprep.subr.bf16.mxu0 %v3166_v38  ;;  %v560_v19 = vsel %vm541_vm7, %v8654_v41, %v3655_v4  ;;  %v3666_v4 = vunpack.i.h.bf16 %v4965_v13  ;;  %v3184_v41 = vpack.c.bf16 %v116_v39, %v4415_v6 }
  0xb6   :  { %v4990_v34 = vpop.permute.xlu1 %3673  ;;  %v489_v59 = vsel %vm468_vm6, %v8653_v12, %v3650_v10 }
  0xb7   :  { %v4996_v33 = vpop.permute.xlu0 %3668  ;;  %v3168_v45 = vpack.c.bf16 %v560_v19, %v489_v59  ;;  %v3675_v36 = vunpack.i.l.bf16 %v4990_v34  ;;  %v8659_v10 = vunpack.i.h.bf16 %v4990_v34 }
  0xb8   :  { %v8655_v38 = vunpack.i.l.bf16 %v4996_v33  ;;  %3898 = vrot.lane.b32.xlu1 %v4905_v61, %s4336_s26 }
  0xb9   :  { %3893 = vrot.lane.b32.xlu0 %v3892_v58, %s4342_s23  ;;  %3169 = vmatpush1.bf16.msra.mxu0 %v3168_v45 }
  0xba   :  { %v5009_v19 = vpop.permute.xlu1 %3683  ;;  %v113_v59 = vsel %vm103_vm1, %v3531_v21, %v8655_v38  ;;  %v558_v38 = vsel %vm541_vm7, %v3666_v4, %v8659_v10 }
  0xbb   :  { %8913 = vst [vmem:[#allocation12_spill] sm:$0xff] %v5009_v19  ;;  %v8656_v12 = vunpack.i.l.bf16 %v5009_v19  ;;  %v5016_v58 = vpop.permute.xlu0 %3678  ;;  %v3182_v48 = vpack.c.bf16 %v113_v59, %v4523_v30  ;;  %v3671_v30 = vunpack.i.h.bf16 %v4996_v33 }
  0xbc   :  { %v8660_v45 = vunpack.i.h.bf16 %v5016_v58  ;;  %v8661_v49 = vunpack.i.l.bf16 %v5016_v58  ;;  %243 = vrot.lane.b32.xlu1 %v4882_v11, %s4337_s27 }
  0xbd   :  { %174 = vrot.lane.b32.xlu0 %v4970_v31, %s4336_s26  ;;  %3183 = vmatprep.subr.bf16.mxu1 %v3182_v48  ;;  %v562_v21 = vsel %vm541_vm7, %v8656_v12, %v3675_v36 }
  0xbe   :  { %3185 = vmatpush1.bf16.msra.mxu1 %v3184_v41  ;;  %v5031_v59 = vpop.permute.xlu1 %3693  ;;  %v559_v6 = vsel %vm541_vm7, %v3675_v36, %v8661_v49  ;;  %v561_v39 = vsel %vm541_vm7, %v8660_v45, %v3666_v4  ;;  %v5056_v36 = vpack.i.bf16 %v4970_v31, %v4887_v62 }
  0xbf   :  { %v8668_v48 = vunpack.i.l.bf16 %v5031_v59  ;;  %v5046_v41 = vpop.permute.xlu0 %3688  ;;  %v3170_v12 = vpack.c.bf16 %v559_v6, %v558_v38  ;;  %v3172_v35 = vpack.c.bf16 %v562_v21, %v561_v39 }
  0xc0   :  { %v8662_v54 = vunpack.i.h.bf16 %v5046_v41  ;;  %v3690_v10 = vunpack.i.l.bf16 %v5046_v41  ;;  %606 = vrot.lane.b32.xlu1 %v4610_v42, %s4342_s23 }
  0xc1   :  { %600 = vrot.lane.b32.xlu0 %v4593_v40, %s4342_s23  ;;  %3171 = vmatprep.subr.bf16.mxu0 %v3170_v12  ;;  %v117_v12 = vsel %vm103_vm1, %v3521_v52, %v3671_v30 }
  0xc2   :  { %3173 = vmatpush1.bf16.msra.mxu0 %v3172_v35  ;;  %v5059_v38 = vpop.permute.xlu1 %3703  ;;  %v114_v4 = vsel %vm103_vm1, %v3671_v30, %v8662_v54  ;;  %v115_v42 = vsel %vm103_vm1, %v3690_v10, %v8668_v48  ;;  %v118_v35 = vsel %vm103_vm1, %v3525_v55, %v3690_v10 }
  0xc3   :  { %v8664_v21 = vunpack.i.h.bf16 %v5059_v38  ;;  %v8667_v6 = vunpack.i.l.bf16 %v5059_v38  ;;  %v3699_v39 = vpop.permute.xlu0 %3698  ;;  %v3186_v45 = vpack.c.bf16 %v115_v42, %v114_v4  ;;  %v3188_v49 = vpack.c.bf16 %v118_v35, %v117_v12 }
  0xc4   :  { %v3701_v54 = vunpack.i.h.bf16 %v3699_v39  ;;  %v3700_v17 = vunpack.i.l.bf16 %v3699_v39  ;;  %3908 = vrot.lane.b32.xlu1 %v4905_v61, %s4338_s30 }
  0xc5   :  { %3903 = vrot.lane.b32.xlu0 %v5056_v36, %s4337_s27  ;;  %3187 = vmatprep.subr.bf16.mxu1 %v3186_v45 }
  0xc6   :  { %3189 = vmatpush1.bf16.msra.mxu1 %v3188_v49  ;;  %v5083_v47 = vpop.permute.xlu1 %3713  ;;  %v630_v52 = vsel %vm614_vm8, %v3700_v17, %v8667_v6  ;;  %v631_v55 = vsel %vm614_vm8, %v3701_v54, %v8664_v21 }
  0xc7   :  { %v5093_v10 = vpop.permute.xlu0 %3708  ;;  %v3174_v30 = vpack.c.bf16 %v631_v55, %v630_v52  ;;  %v3715_v49 = vunpack.i.l.bf16 %v5083_v47  ;;  %v8671_v42 = vunpack.i.h.bf16 %v5083_v47  ;;  %v3561_v52 = vunpack.i.h.bf16 %v4745_v0 }
  0xc8   :  { %8914 = vst [vmem:[#allocation13_spill] sm:$0xff] %v5093_v10  ;;  %v8665_v4 = vunpack.i.h.bf16 %v5093_v10  ;;  %v8666_v45 = vunpack.i.l.bf16 %v5093_v10  ;;  %389 = vrot.lane.b32.xlu1 %v4882_v11, %s4339_s9 }
  0xc9   :  { %320 = vrot.lane.b32.xlu0 %v4970_v31, %s4338_s30  ;;  %3175 = vmatprep.subr.bf16.mxu0 %v3174_v30 }
  0xca   :  { %v5103_v12 = vpop.permute.xlu1 %3723  ;;  %v633_v35 = vsel %vm614_vm8, %v8666_v45, %v3700_v17  ;;  %v634_v39 = vsel %vm614_vm8, %v8665_v4, %v3701_v54  ;;  %v190_v17 = vsel %vm176_vm2, %v3541_v16, %v3715_v49  ;;  %v8915_v16 = vunpack.i.l.bf16 %v4697_v14 }
  0xcb   :  { %v5114_v55 = vpop.permute.xlu0 %3718  ;;  %v3176_v21 = vpack.c.bf16 %v634_v39, %v633_v35  ;;  %v186_v35 = vsel %vm176_vm2, %v3561_v52, %v8671_v42  ;;  %v3581_v54 = vunpack.i.h.bf16 %v4781_v57  ;;  %v8917_v14 = vunpack.i.l.bf16 %v5103_v12 }
  0xcc   :  { %v8674_v30 = vunpack.i.l.bf16 %v5114_v55  ;;  %3918 = vrot.lane.b32.xlu1 %v4905_v61, %s4340_s10  ;;  %v3721_v4 = vunpack.i.h.bf16 %v5114_v55  ;;  %v189_v48 = vsel %vm176_vm2, %v8915_v16, %v3561_v52  ;;  %v3230_v16 = vpack.c.bf16 %v4575_v37, %v4508_v27  ;;  %v5183_v27 = vld [vmem:[%s8616_s1] sm:$0xff] }
  0xcd   :  { %3913 = vrot.lane.b32.xlu0 %v5056_v36, %s4339_s9  ;;  %3177 = vmatpush1.bf16.msra.mxu0 %v3176_v21  ;;  %v3192_v42 = vpack.c.bf16 %v190_v17, %v189_v48  ;;  %v3232_v37 = vpack.c.bf16 %v4518_v29, %v4493_v25  ;;  %v8928_v3 = vunpack.i.l.bf16 %v5114_v55  ;;  %v8931_v55 = vunpack.i.h.bf16 %v5083_v47 }
  0xce   :  { %v577_v45 = vpop.permute.xlu1 %576  ;;  %v187_v21 = vsel %vm176_vm2, %v3715_v49, %v8674_v30  ;;  %v188_v52 = vsel %vm176_vm2, %v3721_v4, %v8917_v14  ;;  %v8919_v14 = vunpack.i.h.bf16 %v4713_v20  ;;  %v8933_v47 = vunpack.i.h.bf16 %v4830_v32  ;;  %v5400_v32 = vld [vmem:[%s8616_s1 + $0x60] sm:$0xff] }
  0xcf   :  { %v5135_v39 = vpop.permute.xlu0 %3728  ;;  %v3190_v6 = vpack.c.bf16 %v187_v21, %v186_v35  ;;  %v8918_v21 = vunpack.i.h.bf16 %v4726_v50  ;;  %8935 = vst [vmem:[#allocation17_spill] sm:$0xff] %v5400_v32 }
  0xd0   :  { %v8673_v10 = vunpack.i.l.bf16 %v5135_v39  ;;  %535 = vrot.lane.b32.xlu1 %v4882_v11, %s4341_s11 }
  0xd1   :  { %466 = vrot.lane.b32.xlu0 %v4970_v31, %s4340_s10  ;;  %3191 = vmatprep.subr.bf16.mxu1 %v3190_v6  ;;  %v191_v48 = vsel %vm176_vm2, %v8918_v21, %v3721_v4  ;;  %v262_v4 = vsel %vm249_vm3, %v8919_v14, %v3581_v54  ;;  %v5208_v21 = vld [vmem:[%s8616_s1 + $0x10] sm:$0xff] }
  0xd2   :  { %3193 = vmatpush1.bf16.msra.mxu1 %v3192_v42  ;;  %v5147_v49 = vpop.permute.xlu1 %570  ;;  %v259_v35 = vsel %vm249_vm3, %v3581_v54, %v8673_v10  ;;  %v8920_v54 = vunpack.i.l.bf16 %v4996_v33 }
  0xd3   :  { %8916 = vst [vmem:[#allocation14_spill] sm:$0xff] %v5147_v49  ;;  %v5161_v17 = vpop.permute.xlu0 %582  ;;  %v3194_v6 = vpack.c.bf16 %v259_v35, %v188_v52  ;;  %v635_v42 = vsel %vm614_vm8, %v5147_v49, %v577_v45  ;;  %v3696_v52 = vunpack.i.h.bf16 %v5031_v59  ;;  %v3196_v35 = vpack.c.bf16 %v262_v4, %v191_v48 }
  0xd4   :  { %3928 = vrot.lane.b32.xlu1 %v4905_v61, %s4342_s23  ;;  %v632_v50 = vsel %vm614_vm8, %v577_v45, %v5161_v17 }
  0xd5   :  { %3923 = vrot.lane.b32.xlu0 %v5056_v36, %s4341_s11  ;;  %802 = vmatprep.subr.mxu0 %v632_v50  ;;  %v5194_v36 = vld [vmem:[%s8616_s1 + $0x18] sm:$0xff]  ;;  %v110_v25 = vsel %vm103_vm1, %v8920_v54, %v3696_v52 }
  0xd6   :  { %3195 = vmatprep.subr.bf16.mxu1 %v3194_v6  ;;  %803 = vmatpush1.msra.mxu0 %v635_v42  ;;  %v5187_v61 = vpop.permute.xlu1 %3738  ;;  %v5222_v42 = vld [vmem:[%s8616_s1 + $0x28] sm:$0xff] }
  0xd7   :  { %3197 = vmatpush1.bf16.msra.mxu1 %v3196_v35  ;;  %v5189_v20 = vpop.permute.xlu0 %3733  ;;  %3231 = vmatprep.subr.bf16.mxu0 %v3230_v16  ;;  %v3740_v29 = vunpack.i.l.bf16 %v5187_v61  ;;  %v8675_v48 = vunpack.i.h.bf16 %v5187_v61  ;;  %v3731_v16 = vunpack.i.h.bf16 %v5135_v39 }
  0xd8   :  { %v8672_v45 = vunpack.i.l.bf16 %v5189_v20  ;;  %815 = vmatmul.mubr.f32.vlgmr.msra.gmra.mrb[0].mxu0 %v5183_v27  ;;  %v3736_v54 = vunpack.i.h.bf16 %v5189_v20 }
  0xd9   :  { %612 = vrot.lane.b32.xlu0 %v4970_v31, %s4342_s23  ;;  %3233 = vmatpush1.bf16.msra.mxu0 %v3232_v37  ;;  %v3236_v37 = vpack.c.bf16 %v110_v25, %v4513_v28  ;;  %v260_v25 = vsel %vm249_vm3, %v3731_v16, %v8675_v48  ;;  %v8923_v48 = vunpack.i.h.bf16 %v4764_v15 }
  0xda   :  { %v5211_v6 = vpop.permute.xlu1 %3748  ;;  %v107_v33 = vsel %vm103_vm1, %v3696_v52, %v8672_v45  ;;  %2758 = vmatprep.mubr.msk.f32.mxu0 %vm719_vm0, %v5194_v36  ;;  %v8921_v45 = vunpack.i.l.bf16 %v4757_v7 }
  0xdb   :  { %v3750_v50 = vunpack.i.l.bf16 %v5211_v6  ;;  %v5226_v14 = vpop.permute.xlu0 %3743  ;;  %v3234_v4 = vpack.c.bf16 %v107_v33, %v4593_v40  ;;  %v5243_v40 = vld [vmem:[%s8616_s1 + $0x20] sm:$0xff]  ;;  %v5258_v33 = vld [vmem:[%s8616_s1 + $0x38] sm:$0xff]  ;;  %v263_v49 = vsel %vm249_vm3, %v8923_v48, %v3731_v16  ;;  %v8924_v13 = vunpack.i.h.bf16 %v5211_v6 }
  0xdc   :  { %v8677_v52 = vunpack.i.l.bf16 %v5226_v14  ;;  %821 = vmatmul.mubr.f32.gmra.mrb[2].mxu0 %v5208_v21  ;;  %v264_v10 = vsel %vm249_vm3, %v8921_v45, %v3740_v29  ;;  %v3611_v16 = vunpack.i.h.bf16 %v4853_v22 }
  0xdd   :  { %3235 = vmatprep.subr.bf16.mxu0 %v3234_v4  ;;  %2759 = vmatprep.mubr.msk.f32.mxu0 %vm719_vm0, %v5222_v42  ;;  %v8922_v4 = vunpack.i.l.bf16 %v5031_v59  ;;  %v108_v59 = vsel %vm103_vm1, %v3736_v54, %v8924_v13 }
  0xde   :  { %3237 = vmatpush1.bf16.msra.mxu0 %v3236_v37  ;;  %v5245_v28 = vpop.permute.xlu1 %3753  ;;  %v261_v45 = vsel %vm249_vm3, %v3740_v29, %v8677_v52  ;;  %v3200_v52 = vpack.c.bf16 %v264_v10, %v263_v49 }
  0xdf   :  { %v112_v37 = vsel %vm103_vm1, %v8922_v4, %v3750_v50  ;;  %v5264_v30 = vpop.permute.xlu0 %93  ;;  %v3198_v35 = vpack.c.bf16 %v261_v45, %v260_v25  ;;  %v8925_v4 = vunpack.i.h.bf16 %v5046_v41  ;;  %v3755_v25 = vunpack.i.l.bf16 %v5245_v28  ;;  %v5291_v41 = vld [vmem:[%s8616_s1 + $0x30] sm:$0xff] }
  0xe0   :  { %v109_v29 = vsel %vm103_vm1, %v3750_v50, %v5264_v30  ;;  %827 = vmatmul.mubr.f32.gmra.mrb[4].mxu0 %v5243_v40  ;;  %v8681_v10 = vunpack.i.h.bf16 %v5245_v28  ;;  %v8926_v45 = vunpack.i.h.bf16 %v4801_v44 }
  0xe1   :  { %v111_v15 = vsel %vm103_vm1, %v8925_v4, %v3736_v54  ;;  %3199 = vmatprep.subr.bf16.mxu1 %v3198_v35  ;;  %v3238_v48 = vpack.c.bf16 %v109_v29, %v108_v59  ;;  %2760 = vmatprep.mubr.msk.f32.mxu0 %vm719_vm0, %v5258_v33  ;;  %v5299_v35 = vld [vmem:[%s8616_s1 + $0x48] sm:$0xff]  ;;  %v4343_v29 = vmov 0  }
  0xe2   :  { %3201 = vmatpush1.bf16.msra.mxu1 %v3200_v52  ;;  %v5286_v49 = vpop.permute.xlu1 %3763  ;;  %v3240_v13 = vpack.c.bf16 %v112_v37, %v111_v15  ;;  %v336_v37 = vsel %vm322_vm4, %v8926_v45, %v3755_v25  ;;  %3932 = vset.pattern.permute.xlu1 %v4343_v29  ;;  %v332_v15 = vsel %vm322_vm4, %v3611_v16, %v8681_v10  ;;  %v3726_v45 = vunpack.i.h.bf16 %v5103_v12 }
  0xe3   :  { %v5294_v50 = vpop.permute.xlu0 %3758  ;;  %3239 = vmatprep.subr.bf16.mxu0 %v3238_v48  ;;  %v3765_v54 = vunpack.i.l.bf16 %v5286_v49  ;;  %3933 = vset.pattern.permute.xlu0 %v4343_v29  ;;  %v8927_v10 = vunpack.i.l.bf16 %v4801_v44  ;;  %v659_v29 = vld [vmem:[%s8617_s2] sm:$0xff] }
  0xe4   :  { %v8683_v52 = vunpack.i.l.bf16 %v5294_v50  ;;  %3241 = vmatpush1.bf16.msra.mxu0 %v3240_v13  ;;  %v5324_v13 = vld [vmem:[%s8616_s1 + $0x40] sm:$0xff]  ;;  %671 = vperm.xlu1 %3932, %v659_v29  }
  0xe5   :  { %833 = vmatmul.mubr.f32.gmra.mrb[6].mxu0 %v5291_v41  ;;  %v335_v22 = vsel %vm322_vm4, %v8927_v10, %v3611_v16  ;;  %v184_v44 = vsel %vm176_vm2, %v8928_v3, %v3765_v54 }
  0xe6   :  { %v5309_v4 = vpop.permute.xlu1 %3773  ;;  %v333_v48 = vsel %vm322_vm4, %v3755_v25, %v8683_v52  ;;  %2761 = vmatprep.mubr.msk.f32.mxu0 %vm719_vm0, %v5299_v35  ;;  %v5336_v25 = vld [vmem:[%s8616_s1 + $0x58] sm:$0xff]  ;;  %v3204_v5 = vpack.c.bf16 %v336_v37, %v335_v22  ;;  %v8929_v22 = vunpack.i.h.bf16 %v5286_v49 }
  0xe7   :  { %v5327_v59 = vpop.permute.xlu0 %3768  ;;  %v3202_v24 = vpack.c.bf16 %v333_v48, %v332_v15  ;;  %v3761_v15 = vunpack.i.h.bf16 %v5294_v50  ;;  %v183_v48 = vsel %vm176_vm2, %v8931_v55, %v3726_v45 }
  0xe8   :  { %v8687_v52 = vunpack.i.l.bf16 %v5327_v59  ;;  %v180_v37 = vsel %vm176_vm2, %v3726_v45, %v8929_v22  ;;  %v3244_v57 = vpack.c.bf16 %v184_v44, %v183_v48  ;;  %v3771_v7 = vunpack.i.h.bf16 %v5327_v59 }
  0xe9   :  { %3203 = vmatprep.subr.bf16.mxu1 %v3202_v24  ;;  %839 = vmatmul.mubr.f32.gmra.mrb[8].mxu0 %v5324_v13  ;;  %v5364_v24 = vld [vmem:[%s8616_s1 + $0x50] sm:$0xff]  ;;  %v337_v45 = vsel %vm322_vm4, %v8933_v47, %v3761_v15  ;;  %v5412_v47 = vld [vmem:[%s8616_s1 + $0x78] sm:$0xff] }
  0xea   :  { %3205 = vmatpush1.bf16.msra.mxu1 %v3204_v5  ;;  %v5349_v16 = vpop.permute.xlu1 %168  ;;  %v181_v3 = vsel %vm176_vm2, %v3765_v54, %v8687_v52  ;;  %2762 = vmatprep.mubr.msk.f32.mxu0 %vm719_vm0, %v5336_v25  ;;  %8930 = vst [vmem:[#allocation15_spill] sm:$0xff] %v5364_v24  ;;  %v3631_v5 = vunpack.i.h.bf16 %v4898_v26  ;;  %v5376_v54 = vld [vmem:[%s8616_s1 + $0x68] sm:$0xff]  ;;  %8937 = vst [vmem:[#allocation18_spill] sm:$0xff] %v5412_v47 }
  0xeb   :  { %v5371_v22 = vpop.permute.xlu0 %3778  ;;  %v3242_v10 = vpack.c.bf16 %v181_v3, %v180_v37  ;;  %8932 = vst [vmem:[#allocation16_spill] sm:$0xff] %v5376_v54  ;;  %v8934_v3 = vunpack.i.l.bf16 %v5309_v4 }
  0xec   :  { %v8690_v52 = vunpack.i.l.bf16 %v5371_v22 }
  0xed   :  { %3243 = vmatprep.subr.bf16.mxu0 %v3242_v10  ;;  %845 = vmatmul.mubr.f32.gmra.mrb[10].mxu0 %v5364_v24  ;;  %v334_v29 = vsel %vm322_vm4, %v3761_v15, %v8934_v3  ;;  %v8936_v15 = vunpack.i.h.bf16 %v4817_v9  ;;  %v661_v3 = vld [vmem:[%s8617_s2 + $0x10] sm:$0xff] }
  0xee   :  { %3245 = vmatpush1.bf16.msra.mxu0 %v3244_v57  ;;  %v5385_v37 = vpop.permute.xlu1 %3788  ;;  %v405_v44 = vsel %vm395_vm5, %v3631_v5, %v8690_v52  ;;  %2763 = vmatprep.mubr.msk.f32.mxu0 %vm719_vm0, %v5376_v54  ;;  %v3746_v57 = vunpack.i.h.bf16 %v5226_v14 }
  0xef   :  { %v5403_v10 = vpop.permute.xlu0 %3783  ;;  %v3206_v55 = vpack.c.bf16 %v405_v44, %v334_v29  ;;  %v408_v48 = vsel %vm395_vm5, %v8936_v15, %v3631_v5  ;;  %681 = vperm.xlu1 %3932, %v661_v3   ;;  %v8938_v29 = vunpack.i.l.bf16 %v5103_v12  ;;  %v3790_v5 = vunpack.i.l.bf16 %v5385_v37  ;;  %v5452_v15 = vld [vmem:[%s8616_s1 + $0x88] sm:$0xff] }
  0xf0   :  { %v3208_v26 = vpack.c.bf16 %v408_v48, %v337_v45  ;;  %v182_v44 = vsel %vm176_vm2, %v3771_v7, %v5349_v16  ;;  %v8939_v45 = vunpack.i.l.bf16 %v5403_v10  ;;  %v3781_v48 = vunpack.i.h.bf16 %v5371_v22  ;;  %8942 = vst [vmem:[#allocation20_spill] sm:$0xff] %v5452_v15 }
  0xf1   :  { %v185_v9 = vsel %vm176_vm2, %v8938_v29, %v3771_v7  ;;  %3207 = vmatprep.subr.bf16.mxu1 %v3206_v55  ;;  %851 = vmatmul.mubr.f32.gmra.mrb[12].mxu0 %v5400_v32  ;;  %v5439_v55 = vld [vmem:[%s8616_s1 + $0x70] sm:$0xff]  ;;  %v8941_v7 = vunpack.i.l.bf16 %v5135_v39  ;;  %v3786_v32 = vunpack.i.h.bf16 %v5403_v10  ;;  %v8944_v24 = vunpack.i.h.bf16 %v5385_v37 }
  0xf2   :  { %3209 = vmatpush1.bf16.msra.mxu1 %v3208_v26  ;;  %v5428_v52 = vpop.permute.xlu1 %3798  ;;  %v253_v12 = vsel %vm249_vm3, %v3746_v57, %v8939_v45  ;;  %2764 = vmatprep.mubr.msk.f32.mxu0 %vm719_vm0, %v5412_v47  ;;  %8940 = vst [vmem:[#allocation19_spill] sm:$0xff] %v5439_v55  ;;  %v662_v47 = vld [vmem:[%s8617_s2 + $0x18] sm:$0xff] }
  0xf3   :  { %v256_v26 = vsel %vm249_vm3, %v8941_v7, %v3746_v57  ;;  %v3800_v3 = vunpack.i.l.bf16 %v5428_v52  ;;  %v5447_v29 = vpop.permute.xlu0 %3793  ;;  %v3246_v45 = vpack.c.bf16 %v253_v12, %v182_v44  ;;  %686 = vperm.xlu1 %3932, %v662_v47   ;;  %v8943_v44 = vunpack.i.l.bf16 %v4864_v51 }
  0xf4   :  { %v8700_v57 = vunpack.i.l.bf16 %v5447_v29  ;;  %v3248_v7 = vpack.c.bf16 %v256_v26, %v185_v9  ;;  %v406_v39 = vsel %vm395_vm5, %v3781_v48, %v8944_v24  ;;  %v5480_v9 = vld [vmem:[%s8616_s1 + $0x80] sm:$0xff]  ;;  %v8945_v26 = vunpack.i.l.bf16 %v5226_v14  ;;  %v660_v14 = vld [vmem:[%s8617_s2 + $0x8] sm:$0xff] }
  0xf5   :  { %3247 = vmatprep.subr.bf16.mxu0 %v3246_v45  ;;  %v410_v12 = vsel %vm395_vm5, %v8943_v44, %v3790_v5  ;;  %857 = vmatmul.mubr.f32.gmra.mrb[14].mxu0 %v5439_v55  ;;  %v8946_v44 = vunpack.i.h.bf16 %v4871_v43 }
  0xf6   :  { %3249 = vmatpush1.bf16.msra.mxu0 %v3248_v7  ;;  %v5465_v54 = vpop.permute.xlu1 %3803  ;;  %v407_v47 = vsel %vm395_vm5, %v3790_v5, %v8700_v57  ;;  %2765 = vmatprep.mubr.msk.f32.mxu0 %vm719_vm0, %v5452_v15  ;;  %v258_v45 = vsel %vm249_vm3, %v8945_v26, %v3800_v3  ;;  %v5495_v57 = vld [vmem:[%s8616_s1 + $0x98] sm:$0xff]  ;;  %v664_v26 = vld [vmem:[%s8617_s2 + $0x28] sm:$0xff] }
  0xf7   :  { %v5486_v7 = vpop.permute.xlu0 %241  ;;  %v3210_v24 = vpack.c.bf16 %v407_v47, %v406_v39  ;;  %v409_v5 = vsel %vm395_vm5, %v8946_v44, %v3781_v48  ;;  %8947 = vst [vmem:[#allocation21_spill] sm:$0xff] %v5495_v57  ;;  %v8948_v48 = vunpack.i.h.bf16 %v5428_v52  ;;  %676 = vperm.xlu0 %3933, %v660_v14   ;;  %696 = vperm.xlu1 %3932, %v664_v26   ;;  %v8949_v44 = vunpack.i.h.bf16 %v5187_v61  ;;  %v5524_v61 = vld [vmem:[%s8616_s1 + $0x90] sm:$0xff]  ;;  %v666_v14 = vld [vmem:[%s8617_s2 + $0x38] sm:$0xff] }
  0xf8   :  { %v255_v43 = vsel %vm249_vm3, %v3800_v3, %v5486_v7  ;;  %v3212_v39 = vpack.c.bf16 %v410_v12, %v409_v5  ;;  %v3805_v15 = vunpack.i.l.bf16 %v5465_v54  ;;  %v8706_v3 = vunpack.i.h.bf16 %v5465_v54  ;;  %8950 = vst [vmem:[#allocation22_spill] sm:$0xff] %v5524_v61 }
  0xf9   :  { %v254_v47 = vsel %vm249_vm3, %v3786_v32, %v8948_v48  ;;  %v257_v51 = vsel %vm249_vm3, %v8949_v44, %v3786_v32  ;;  %3211 = vmatprep.subr.bf16.mxu1 %v3210_v24  ;;  %863 = vmatmul.mubr.f32.gmra.mrb[16].mxu0 %v5480_v9  ;;  %v3661_v32 = vunpack.i.h.bf16 %v4977_v18 }
  0xfa   :  { %v3250_v55 = vpack.c.bf16 %v255_v43, %v254_v47  ;;  %3213 = vmatpush1.bf16.msra.mxu1 %v3212_v39  ;;  %v5517_v12 = vpop.permute.xlu1 %3813  ;;  %v3252_v5 = vpack.c.bf16 %v258_v45, %v257_v51  ;;  %2766 = vmatprep.mubr.msk.f32.mxu0 %vm719_vm0, %v5495_v57  ;;  %v663_v51 = vld [vmem:[%s8617_s2 + $0x20] sm:$0xff]  ;;  %v8951_v43 = vunpack.i.h.bf16 %v4922_v63 }
  0xfb   :  { %v5527_v24 = vpop.permute.xlu0 %3808  ;;  %706 = vperm.xlu1 %3932, %v666_v14   ;;  %v3815_v26 = vunpack.i.l.bf16 %v5517_v12  ;;  %691 = vperm.xlu0 %3933, %v663_v51   ;;  %v478_v47 = vsel %vm468_vm6, %v3661_v32, %v8706_v3  ;;  %v3776_v14 = vunpack.i.h.bf16 %v5309_v4  ;;  %v8953_v3 = vunpack.i.l.bf16 %v4922_v63 }
  0xfc   :  { %3251 = vmatprep.subr.bf16.mxu0 %v3250_v55  ;;  %v8707_v45 = vunpack.i.l.bf16 %v5527_v24  ;;  %v482_v39 = vsel %vm468_vm6, %v8951_v43, %v3805_v15 }
  0xfd   :  { %3253 = vmatpush1.bf16.msra.mxu0 %v3252_v5  ;;  %v5556_v5 = vld [vmem:[%s8616_s1 + $0x8] sm:$0xff]  ;;  %v481_v55 = vsel %vm468_vm6, %v8953_v3, %v3661_v32 }
  0xfe   :  { %869 = vmatmul.mubr.f32.gmra.mrb[18].mxu0 %v5524_v61  ;;  %v5543_v48 = vpop.permute.xlu1 %3823  ;;  %v479_v44 = vsel %vm468_vm6, %v3805_v15, %v8707_v45  ;;  %8952 = vst [vmem:[#allocation23_spill] sm:$0xff] %v5556_v5  ;;  %v668_v15 = vld [vmem:[%s8617_s2 + $0x48] sm:$0xff]  ;;  %v665_v45 = vld [vmem:[%s8617_s2 + $0x30] sm:$0xff]  ;;  %v8954_v61 = vunpack.i.l.bf16 %v5294_v50 }
  0xff   :  { %2777 = vmatprep.mubr.msk.f32.mxu0 %vm719_vm0, %v5556_v5  ;;  %v5561_v51 = vpop.permute.xlu0 %3818  ;;  %v3214_v43 = vpack.c.bf16 %v479_v44, %v478_v47  ;;  %v3216_v5 = vpack.c.bf16 %v482_v39, %v481_v55  ;;  %716 = vperm.xlu1 %3932, %v668_v15   ;;  %v3811_v47 = vunpack.i.h.bf16 %v5527_v24  ;;  %v8955_v44 = vunpack.i.h.bf16 %v5517_v12  ;;  %v667_v15 = vld [vmem:[%s8617_s2 + $0x40] sm:$0xff] }
 0x100   :  { %v8714_v18 = vunpack.i.l.bf16 %v5561_v51  ;;  %v330_v63 = vsel %vm322_vm4, %v8954_v61, %v3815_v26  ;;  %701 = vperm.xlu0 %3933, %v665_v45   ;;  %v3686_v61 = vunpack.i.h.bf16 %v5009_v19  ;;  %v8956_v55 = vunpack.i.h.bf16 %v5245_v28 }
 0x101   :  { %3215 = vmatprep.subr.bf16.mxu1 %v3214_v43  ;;  %v326_v39 = vsel %vm322_vm4, %v3776_v14, %v8955_v44  ;;  %v3821_v57 = vunpack.i.h.bf16 %v5561_v51 }
 0x102   :  { %3217 = vmatpush1.bf16.msra.mxu1 %v3216_v5  ;;  %v5580_v32 = vpop.permute.xlu1 %314  ;;  %v327_v50 = vsel %vm322_vm4, %v3815_v26, %v8714_v18  ;;  %v329_v45 = vsel %vm322_vm4, %v8956_v55, %v3776_v14  ;;  %v8957_v26 = vunpack.i.h.bf16 %v4951_v2  ;;  %v3796_v55 = vunpack.i.h.bf16 %v5447_v29 }
 0x103   :  { %v5595_v5 = vpop.permute.xlu0 %3828  ;;  %v3254_v43 = vpack.c.bf16 %v327_v50, %v326_v39  ;;  %v3256_v3 = vpack.c.bf16 %v330_v63, %v329_v45  ;;  %v8958_v39 = vunpack.i.l.bf16 %v5543_v48 }
 0x104   :  { %v8715_v44 = vunpack.i.l.bf16 %v5595_v5  ;;  %v483_v28 = vsel %vm468_vm6, %v8957_v26, %v3811_v47  ;;  %711 = vperm.xlu0 %3933, %v667_v15  }
 0x105   :  { %3255 = vmatprep.subr.bf16.mxu0 %v3254_v43  ;;  %v480_v50 = vsel %vm468_vm6, %v3811_v47, %v8958_v39  ;;  %v8959_v43 = vunpack.i.h.bf16 %v4938_v23  ;;  %v8960_v47 = vunpack.i.l.bf16 %v5309_v4 }
 0x106   :  { %3257 = vmatpush1.bf16.msra.mxu0 %v3256_v3  ;;  %v5606_v14 = vpop.permute.xlu1 %3838  ;;  %v551_v63 = vsel %vm541_vm7, %v3686_v61, %v8715_v44 }
 0x107   :  { %v5617_v2 = vpop.permute.xlu0 %3833  ;;  %v3218_v45 = vpack.c.bf16 %v551_v63, %v480_v50  ;;  %v554_v3 = vsel %vm541_vm7, %v8959_v43, %v3686_v61  ;;  %v331_v39 = vsel %vm322_vm4, %v8960_v47, %v3821_v57  ;;  %v3840_v18 = vunpack.i.l.bf16 %v5606_v14 }
 0x108   :  { %v8716_v15 = vunpack.i.l.bf16 %v5617_v2  ;;  %v3220_v26 = vpack.c.bf16 %v554_v3, %v483_v28  ;;  %v328_v50 = vsel %vm322_vm4, %v3821_v57, %v5580_v32  ;;  %v8961_v61 = vunpack.i.l.bf16 %v5371_v22 }
 0x109   :  { %3219 = vmatprep.subr.bf16.mxu1 %v3218_v45  ;;  %v3831_v45 = vunpack.i.h.bf16 %v5595_v5  ;;  %v3836_v23 = vunpack.i.h.bf16 %v5617_v2  ;;  %v8962_v22 = vunpack.i.l.bf16 %v5016_v58 }
 0x10a   :  { %3221 = vmatpush1.bf16.msra.mxu1 %v3220_v26  ;;  %v5633_v63 = vpop.permute.xlu1 %3848  ;;  %v399_v4 = vsel %vm395_vm5, %v3796_v55, %v8716_v15  ;;  %v402_v28 = vsel %vm395_vm5, %v8961_v61, %v3796_v55  ;;  %v8963_v15 = vunpack.i.h.bf16 %v5606_v14 }
 0x10b   :  { %v3850_v43 = vunpack.i.l.bf16 %v5633_v63  ;;  %v5645_v57 = vpop.permute.xlu0 %3843  ;;  %v3258_v3 = vpack.c.bf16 %v399_v4, %v328_v50  ;;  %v3260_v44 = vpack.c.bf16 %v402_v28, %v331_v39  ;;  %v556_v55 = vsel %vm541_vm7, %v8962_v22, %v3840_v18 }
 0x10c   :  { %v8718_v47 = vunpack.i.l.bf16 %v5645_v57  ;;  %v552_v50 = vsel %vm541_vm7, %v3831_v45, %v8963_v15  ;;  %v8964_v4 = vunpack.i.l.bf16 %v5447_v29 }
 0x10d   :  { %3259 = vmatprep.subr.bf16.mxu0 %v3258_v3 }
 0x10e   :  { %3261 = vmatpush1.bf16.msra.mxu0 %v3260_v44  ;;  %v3854_v61 = vpop.permute.xlu1 %3853  ;;  %v553_v39 = vsel %vm541_vm7, %v3840_v18, %v8718_v47  ;;  %v404_v28 = vsel %vm395_vm5, %v8964_v4, %v3850_v43  ;;  %v8965_v44 = vunpack.i.h.bf16 %v4990_v34  ;;  %v8966_v18 = vunpack.i.h.bf16 %v5633_v63 }
 0x10f   :  { %v5666_v3 = vpop.permute.xlu0 %387  ;;  %v3222_v22 = vpack.c.bf16 %v553_v39, %v552_v50  ;;  %v8967_v4 = vunpack.i.h.bf16 %v5385_v37  ;;  %v3856_v39 = vunpack.i.h.bf16 %v3854_v61  ;;  %v3855_v34 = vunpack.i.l.bf16 %v3854_v61 }
 0x110   :  { %v555_v26 = vsel %vm541_vm7, %v8965_v44, %v3831_v45  ;;  %v401_v15 = vsel %vm395_vm5, %v3850_v43, %v5666_v3  ;;  %v400_v29 = vsel %vm395_vm5, %v3836_v23, %v8966_v18 }
 0x111   :  { %v3224_v19 = vpack.c.bf16 %v556_v55, %v555_v26  ;;  %v403_v50 = vsel %vm395_vm5, %v8967_v4, %v3836_v23  ;;  %3223 = vmatprep.subr.bf16.mxu1 %v3222_v22  ;;  %v3262_v47 = vpack.c.bf16 %v401_v15, %v400_v29  ;;  %v8968_v23 = vunpack.i.l.bf16 %v5059_v38 }
 0x112   :  { %v5683_v45 = vpop.permute.xlu1 %3863  ;;  %v3264_v44 = vpack.c.bf16 %v404_v28, %v403_v50  ;;  %v3826_v29 = vunpack.i.h.bf16 %v5543_v48 }
 0x113   :  { %3225 = vmatpush1.bf16.msra.mxu1 %v3224_v19  ;;  %v5685_v43 = vpop.permute.xlu0 %3858  ;;  %3263 = vmatprep.subr.bf16.mxu0 %v3262_v47  ;;  %v3865_v37 = vunpack.i.l.bf16 %v5683_v45  ;;  %v627_v61 = vsel %vm614_vm8, %v8968_v23, %v3855_v34  ;;  %v8969_v19 = vunpack.i.h.bf16 %v5059_v38  ;;  %v3866_v22 = vunpack.i.h.bf16 %v5683_v45 }
 0x114   :  { %v3861_v26 = vunpack.i.h.bf16 %v5685_v43  ;;  %v3860_v55 = vunpack.i.l.bf16 %v5685_v43  ;;  %3265 = vmatpush1.bf16.msra.mxu0 %v3264_v44  ;;  %v8970_v23 = vunpack.i.l.bf16 %v5527_v24 }
 0x115   :  { %v628_v28 = vsel %vm614_vm8, %v8969_v19, %v3856_v39 }
 0x116   :  { %v589_v47 = vpop.permute.xlu1 %588  ;;  %v624_v15 = vsel %vm614_vm8, %v3855_v34, %v3860_v55  ;;  %v625_v18 = vsel %vm614_vm8, %v3856_v39, %v3861_v26  ;;  %v3228_v44 = vpack.c.bf16 %v628_v28, %v627_v61  ;;  %v476_v19 = vsel %vm468_vm6, %v8970_v23, %v3865_v37 }
 0x117   :  { %v5708_v4 = vpop.permute.xlu0 %3868  ;;  %v3226_v38 = vpack.c.bf16 %v625_v18, %v624_v15  ;;  %v472_v39 = vsel %vm468_vm6, %v3826_v29, %v3866_v22  ;;  %v8971_v61 = vunpack.i.h.bf16 %v5465_v54  ;;  %v4331_v54 = vld [vmem:[%s8615_s0 + $0x70] sm:$0xff] }
 0x118   :  { %v3870_v50 = vunpack.i.l.bf16 %v5708_v4 }
 0x119   :  { %3227 = vmatprep.subr.bf16.mxu1 %v3226_v38  ;;  %v475_v24 = vsel %vm468_vm6, %v8971_v61, %v3826_v29  ;;  %v3282_v38 = vpack.c.bf16 %v4887_v62, %v4882_v11  ;;  %v3871_v61 = vunpack.i.h.bf16 %v5708_v4  ;;  %v629_v11 = vsel %vm614_vm8, %v5161_v17, %v589_v47 }
 0x11a   :  { %3229 = vmatpush1.bf16.msra.mxu1 %v3228_v44  ;;  %v5715_v34 = vpop.permute.xlu1 %460  ;;  %v473_v15 = vsel %vm468_vm6, %v3865_v37, %v3870_v50  ;;  %v3268_v23 = vpack.c.bf16 %v476_v19, %v475_v24  ;;  %v4330_v37 = vld [vmem:[%s8615_s0 + $0x30] sm:$0xff]  ;;  %v3846_v19 = vunpack.i.h.bf16 %v5645_v57 }
 0x11b   :  { %v5729_v28 = vpop.permute.xlu0 %594  ;;  %v3266_v18 = vpack.c.bf16 %v473_v15, %v472_v39  ;;  %v3284_v29 = vpack.c.bf16 %v4331_v54, %v4330_v37 }
 0x11c   :  { %v626_v44 = vsel %vm614_vm8, %v589_v47, %v5729_v28  ;;  %v474_v47 = vsel %vm468_vm6, %v3871_v61, %v5715_v34 }
 0x11d   :  { %927 = vmatprep.subr.mxu1 %v626_v44  ;;  %3267 = vmatprep.subr.bf16.mxu0 %v3266_v18  ;;  %v8972_v18 = vunpack.i.l.bf16 %v5543_v48  ;;  %v8973_v44 = vunpack.i.l.bf16 %v5189_v20  ;;  %v4332_v20 = vld [vmem:[%s8615_s0 + $0xb0] sm:$0xff] }
 0x11e   :  { %928 = vmatpush1.msra.mxu1 %v629_v11  ;;  %3269 = vmatpush1.bf16.msra.mxu0 %v3268_v23  ;;  %v3879_v62 = vpop.permute.xlu1 %3878  ;;  %v8974_v23 = vunpack.i.l.bf16 %v4654_v56  ;;  %v8975_v56 = vunpack.i.l.bf16 %v5595_v5  ;;  %v8976_v5 = vunpack.i.h.bf16 %v5606_v14  ;;  %v8978_v14 = vunpack.i.h.bf16 %v5211_v6 }
 0x11f   :  { %v3880_v39 = vunpack.i.l.bf16 %v3879_v62  ;;  %v5747_v15 = vpop.permute.xlu0 %3873  ;;  %940 = vmatmul.mubr.f32.vlgmr.msra.gmra.mrb[0].mxu1 %v5183_v27  ;;  %3283 = vmatprep.subr.bf16.mxu1 %v3282_v38  ;;  %v477_v17 = vsel %vm468_vm6, %v8972_v18, %v3871_v61  ;;  %v3881_v18 = vunpack.i.h.bf16 %v3879_v62  ;;  %v8980_v6 = vunpack.i.l.bf16 %v4676_v1 }
 0x120   :  { %v8719_v24 = vunpack.i.l.bf16 %v5747_v15  ;;  %2768 = vmatprep.mubr.msk.f32.mxu1 %vm719_vm0, %v5194_v36  ;;  %3285 = vmatpush1.bf16.msra.mxu1 %v3284_v29  ;;  %v3876_v54 = vunpack.i.h.bf16 %v5747_v15 }
 0x121   :  { %v104_v38 = vsel %vm103_vm1, %v8973_v44, %v3880_v39  ;;  %v125_v37 = vsel %vm103_vm1, %v3880_v39, %v8974_v23  ;;  %v548_v39 = vsel %vm541_vm7, %v8975_v56, %v3846_v19  ;;  %v8979_v56 = vunpack.i.h.bf16 %v4647_v53 }
 0x122   :  { %v5769_v48 = vpop.permute.xlu1 %533  ;;  %v545_v29 = vsel %vm541_vm7, %v3846_v19, %v8719_v24  ;;  %v3286_v61 = vpack.c.bf16 %v125_v37, %v4970_v31  ;;  %v3288_v11 = vpack.c.bf16 %v104_v38, %v4332_v20  ;;  %v3272_v38 = vpack.c.bf16 %v548_v39, %v477_v17 }
 0x123   :  { %v5783_v44 = vpop.permute.xlu0 %3883  ;;  %946 = vmatmul.mubr.f32.gmra.mrb[2].mxu1 %v5208_v21  ;;  %v3270_v23 = vpack.c.bf16 %v545_v29, %v474_v47  ;;  %v549_v62 = vsel %vm541_vm7, %v8976_v5, %v3876_v54  ;;  %v8977_v19 = vunpack.i.l.bf16 %v5645_v57  ;;  %v126_v39 = vsel %vm103_vm1, %v3881_v18, %v8979_v56 }
 0x124   :  { %v3886_v24 = vunpack.i.h.bf16 %v5783_v44  ;;  %v3885_v31 = vunpack.i.l.bf16 %v5783_v44  ;;  %3287 = vmatprep.subr.bf16.mxu1 %v3286_v61  ;;  %2769 = vmatprep.mubr.msk.f32.mxu1 %vm719_vm0, %v5222_v42  ;;  %v105_v61 = vsel %vm103_vm1, %v8978_v14, %v3881_v18 }
 0x125   :  { %3271 = vmatprep.subr.bf16.mxu0 %v3270_v23  ;;  %3289 = vmatpush1.bf16.msra.mxu1 %v3288_v11 }
 0x126   :  { %v550_v47 = vsel %vm541_vm7, %v8977_v19, %v3885_v31  ;;  %3273 = vmatpush1.bf16.msra.mxu0 %v3272_v38  ;;  %v3889_v37 = vpop.permute.xlu1 %3888  ;;  %v546_v29 = vsel %vm541_vm7, %v3876_v54, %v3886_v24  ;;  %v547_v17 = vsel %vm541_vm7, %v3885_v31, %v5769_v48 }
 0x127   :  { %v100_v57 = vpop.permute.xlu0 %99  ;;  %952 = vmatmul.mubr.f32.gmra.mrb[4].mxu1 %v5243_v40  ;;  %v3274_v20 = vpack.c.bf16 %v547_v17, %v546_v29  ;;  %v3276_v11 = vpack.c.bf16 %v550_v47, %v549_v62  ;;  %v3891_v54 = vunpack.i.h.bf16 %v3889_v37  ;;  %v3890_v23 = vunpack.i.l.bf16 %v3889_v37 }
 0x128   :  { %v106_v31 = vsel %vm103_vm1, %v5264_v30, %v100_v57  ;;  %v127_v38 = vsel %vm103_vm1, %v100_v57, %v8980_v6  ;;  %2770 = vmatprep.mubr.msk.f32.mxu1 %vm719_vm0, %v5258_v33  ;;  %v8981_v17 = vunpack.i.h.bf16 %v5286_v49  ;;  %v8984_v57 = vunpack.i.h.bf16 %v4684_v8 }
 0x129   :  { %v3292_v5 = vpack.c.bf16 %v106_v31, %v105_v61  ;;  %3275 = vmatprep.subr.bf16.mxu0 %v3274_v20  ;;  %v3290_v53 = vpack.c.bf16 %v127_v38, %v126_v39  ;;  %v621_v1 = vsel %vm614_vm8, %v3860_v55, %v3890_v23  ;;  %v622_v30 = vsel %vm614_vm8, %v3861_v26, %v3891_v54 }
 0x12a   :  { %3277 = vmatpush1.bf16.msra.mxu0 %v3276_v11  ;;  %v3899_v62 = vpop.permute.xlu1 %3898  ;;  %v8982_v55 = vunpack.i.l.bf16 %v5327_v59  ;;  %v8983_v26 = vunpack.i.l.bf16 %v4684_v8  ;;  %v8985_v31 = vunpack.i.l.bf16 %v4738_v60 }
 0x12b   :  { %v3901_v18 = vunpack.i.h.bf16 %v3899_v62  ;;  %v3900_v19 = vunpack.i.l.bf16 %v3899_v62  ;;  %v5823_v47 = vpop.permute.xlu0 %3893  ;;  %958 = vmatmul.mubr.f32.gmra.mrb[6].mxu1 %v5291_v41  ;;  %3291 = vmatprep.subr.bf16.mxu1 %v3290_v53  ;;  %v8986_v53 = vunpack.i.l.bf16 %v5403_v10  ;;  %v8987_v62 = vunpack.i.l.bf16 %v4745_v0 }
 0x12c   :  { %v3896_v37 = vunpack.i.h.bf16 %v5823_v47  ;;  %v3895_v29 = vunpack.i.l.bf16 %v5823_v47  ;;  %3293 = vmatpush1.bf16.msra.mxu1 %v3292_v5  ;;  %2771 = vmatprep.mubr.msk.f32.mxu1 %vm719_vm0, %v5299_v35  ;;  %v3280_v5 = vpack.c.bf16 %v622_v30, %v621_v1  ;;  %v8988_v30 = vld [vmem:[#allocation15_spill] sm:$0xff] }
 0x12d   :  { %v177_v14 = vsel %vm176_vm2, %v8981_v17, %v3900_v19  ;;  %v178_v43 = vsel %vm176_vm2, %v8982_v55, %v3901_v18  ;;  %v198_v61 = vsel %vm176_vm2, %v3900_v19, %v8983_v26  ;;  %v199_v20 = vsel %vm176_vm2, %v3901_v18, %v8984_v57 }
 0x12e   :  { %v244_v11 = vpop.permute.xlu1 %243  ;;  %v618_v49 = vsel %vm614_vm8, %v3890_v23, %v3895_v29  ;;  %v619_v59 = vsel %vm614_vm8, %v3891_v54, %v3896_v37  ;;  %v3294_v56 = vpack.c.bf16 %v199_v20, %v198_v61  ;;  %v3296_v39 = vpack.c.bf16 %v178_v43, %v177_v14  ;;  %v8990_v61 = vld [vmem:[#allocation17_spill] sm:$0xff] }
 0x12f   :  { %v271_v8 = vsel %vm249_vm3, %v244_v11, %v8985_v31  ;;  %v175_v6 = vpop.permute.xlu0 %174  ;;  %964 = vmatmul.mubr.f32.gmra.mrb[8].mxu1 %v5324_v13  ;;  %v3278_v38 = vpack.c.bf16 %v619_v59, %v618_v49  ;;  %v250_v23 = vsel %vm249_vm3, %v8986_v53, %v244_v11  ;;  %v8991_v11 = vld [vmem:[#allocation18_spill] sm:$0xff]  ;;  %v8992_v49 = vunpack.i.h.bf16 %v5428_v52 }
 0x130   :  { %v179_v54 = vsel %vm176_vm2, %v5349_v16, %v175_v6  ;;  %v200_v60 = vsel %vm176_vm2, %v175_v6, %v8987_v62  ;;  %3295 = vmatprep.subr.bf16.mxu1 %v3294_v56  ;;  %2772 = vmatprep.mubr.msk.f32.mxu1 %vm719_vm0, %v5336_v25  ;;  %v8989_v16 = vld [vmem:[#allocation16_spill] sm:$0xff] }
 0x131   :  { %3279 = vmatprep.subr.bf16.mxu0 %v3278_v38  ;;  %3297 = vmatpush1.bf16.msra.mxu1 %v3296_v39  ;;  %v3298_v18 = vpack.c.bf16 %v271_v8, %v200_v60  ;;  %v3300_v19 = vpack.c.bf16 %v250_v23, %v179_v54  ;;  %v8993_v39 = vld [vmem:[#allocation2_spill] sm:$0xff]  ;;  %v8995_v8 = vld [vmem:[#allocation3_spill] sm:$0xff]  ;;  %v9001_v60 = vld [vmem:[#allocation20_spill] sm:$0xff] }
 0x132   :  { %3281 = vmatpush1.bf16.msra.mxu0 %v3280_v5  ;;  %v5880_v10 = vpop.permute.xlu1 %606  ;;  %v8996_v6 = vunpack.i.l.bf16 %v8995_v8  ;;  %v8997_v5 = vld [vmem:[#allocation19_spill] sm:$0xff] }
 0x133   :  { %v601_v1 = vpop.permute.xlu0 %600  ;;  %970 = vmatmul.mubr.f32.gmra.mrb[10].mxu1 %v8988_v30  ;;  %3299 = vmatprep.subr.bf16.mxu1 %v3298_v18 }
 0x134   :  { %v620_v0 = vsel %vm614_vm8, %v601_v1, %v5880_v10  ;;  %2773 = vmatprep.mubr.msk.f32.mxu1 %vm719_vm0, %v8989_v16  ;;  %v623_v17 = vsel %vm614_vm8, %v5729_v28, %v601_v1 }
 0x135   :  { %1052 = vmatprep.subr.mxu0 %v620_v0  ;;  %3301 = vmatpush1.bf16.msra.mxu1 %v3300_v19  ;;  %v9002_v19 = vunpack.i.h.bf16 %v5517_v12  ;;  %v9003_v0 = vunpack.i.l.bf16 %v5561_v51 }
 0x136   :  { %1053 = vmatpush1.msra.mxu0 %v623_v17  ;;  %v3909_v14 = vpop.permute.xlu1 %3908 }
 0x137   :  { %v3911_v55 = vunpack.i.h.bf16 %v3909_v14  ;;  %v3910_v43 = vunpack.i.l.bf16 %v3909_v14  ;;  %v3904_v26 = vpop.permute.xlu0 %3903  ;;  %976 = vmatmul.mubr.f32.gmra.mrb[12].mxu1 %v8990_v61  ;;  %1065 = vmatmul.mubr.f32.vlgmr.msra.gmra.mrb[20].mxu0 %v5183_v27  ;;  %v8994_v27 = vunpack.i.h.bf16 %v8993_v39  ;;  %v9008_v39 = vld [vmem:[#allocation21_spill] sm:$0xff] }
 0x138   :  { %v3906_v57 = vunpack.i.h.bf16 %v3904_v26  ;;  %v3905_v20 = vunpack.i.l.bf16 %v3904_v26  ;;  %2774 = vmatprep.mubr.msk.f32.mxu1 %vm719_vm0, %v8991_v11  ;;  %2778 = vmatprep.mubr.msk.f32.mxu0 %vm719_vm0, %v5194_v36  ;;  %v9004_v26 = vld [vmem:[#allocation5_spill] sm:$0xff] }
 0x139   :  { %v323_v1 = vsel %vm322_vm4, %v9002_v19, %v3910_v43  ;;  %v324_v17 = vsel %vm322_vm4, %v9003_v0, %v3911_v55 }
 0x13a   :  { %v252_v28 = vsel %vm249_vm3, %v5486_v7, %v3906_v57  ;;  %v251_v59 = vsel %vm249_vm3, %v8992_v49, %v3905_v20  ;;  %v390_v56 = vpop.permute.xlu1 %389  ;;  %v272_v31 = vsel %vm249_vm3, %v3905_v20, %v8994_v27  ;;  %v273_v36 = vsel %vm249_vm3, %v3906_v57, %v8996_v6  ;;  %v8998_v7 = vld [vmem:[#allocation4_spill] sm:$0xff]  ;;  %v9006_v49 = vld [vmem:[#allocation6_spill] sm:$0xff] }
 0x13b   :  { %v321_v38 = vpop.permute.xlu0 %320  ;;  %982 = vmatmul.mubr.f32.gmra.mrb[14].mxu1 %v8997_v5  ;;  %1071 = vmatmul.mubr.f32.gmra.mrb[22].mxu0 %v5208_v21  ;;  %v3302_v52 = vpack.c.bf16 %v273_v36, %v272_v31  ;;  %v8999_v53 = vunpack.i.l.bf16 %v8998_v7  ;;  %v9000_v54 = vunpack.i.h.bf16 %v8998_v7  ;;  %v3304_v18 = vpack.c.bf16 %v252_v28, %v251_v59 }
 0x13c   :  { %2775 = vmatprep.mubr.msk.f32.mxu1 %vm719_vm0, %v9001_v60  ;;  %2779 = vmatprep.mubr.msk.f32.mxu0 %vm719_vm0, %v5222_v42  ;;  %v9005_v57 = vunpack.i.l.bf16 %v9004_v26  ;;  %v9007_v28 = vunpack.i.l.bf16 %v9006_v49  ;;  %v3308_v27 = vpack.c.bf16 %v324_v17, %v323_v1  ;;  %v9009_v31 = vunpack.i.l.bf16 %v5617_v2  ;;  %v9016_v26 = vld [vmem:[#allocation23_spill] sm:$0xff] }
 0x13d   :  { %v344_v23 = vsel %vm322_vm4, %v3910_v43, %v8999_v53  ;;  %v345_v62 = vsel %vm322_vm4, %v3911_v55, %v9000_v54  ;;  %3303 = vmatprep.subr.bf16.mxu1 %v3302_v52  ;;  %v325_v6 = vsel %vm322_vm4, %v5580_v32, %v321_v38  ;;  %v9010_v53 = vld [vmem:[#allocation7_spill] sm:$0xff]  ;;  %v9013_v32 = vld [vmem:[#allocation8_spill] sm:$0xff]  ;;  %v9015_v1 = vunpack.i.h.bf16 %v5633_v63 }
 0x13e   :  { %3305 = vmatpush1.bf16.msra.mxu1 %v3304_v18  ;;  %v3306_v14 = vpack.c.bf16 %v345_v62, %v344_v23  ;;  %v417_v20 = vsel %vm395_vm5, %v390_v56, %v9005_v57  ;;  %v346_v12 = vsel %vm322_vm4, %v321_v38, %v9007_v28  ;;  %v3919_v59 = vpop.permute.xlu1 %3918  ;;  %v396_v8 = vsel %vm395_vm5, %v9009_v31, %v390_v56  ;;  %v9012_v62 = vld [vmem:[#allocation22_spill] sm:$0xff]  ;;  %v9017_v57 = vld [vmem:[#allocation9_spill] sm:$0xff] }
 0x13f   :  { %v3914_v43 = vpop.permute.xlu0 %3913  ;;  %988 = vmatmul.mubr.f32.gmra.mrb[16].mxu1 %v5480_v9  ;;  %1077 = vmatmul.mubr.f32.gmra.mrb[24].mxu0 %v5243_v40  ;;  %v3921_v36 = vunpack.i.h.bf16 %v3919_v59  ;;  %v3920_v52 = vunpack.i.l.bf16 %v3919_v59  ;;  %v3310_v7 = vpack.c.bf16 %v417_v20, %v346_v12  ;;  %v9011_v23 = vunpack.i.h.bf16 %v9010_v53 }
 0x140   :  { %v3916_v51 = vunpack.i.h.bf16 %v3914_v43  ;;  %v3915_v55 = vunpack.i.l.bf16 %v3914_v43  ;;  %3307 = vmatprep.subr.bf16.mxu1 %v3306_v14  ;;  %2776 = vmatprep.mubr.msk.f32.mxu1 %vm719_vm0, %v9008_v39  ;;  %v3312_v56 = vpack.c.bf16 %v396_v8, %v325_v6  ;;  %v9014_v38 = vunpack.i.l.bf16 %v9013_v32  ;;  %v9022_v8 = vld [vmem:[#allocation11_spill] sm:$0xff] }
 0x141   :  { %2780 = vmatprep.mubr.msk.f32.mxu0 %vm719_vm0, %v5258_v33  ;;  %v9018_v20 = vunpack.i.l.bf16 %v9017_v57  ;;  %v9019_v28 = vunpack.i.h.bf16 %v9017_v57  ;;  %v469_v59 = vsel %vm468_vm6, %v3866_v22, %v3920_v52  ;;  %v470_v43 = vsel %vm468_vm6, %v3870_v50, %v3921_v36 }
 0x142   :  { %3309 = vmatpush1.bf16.msra.mxu1 %v3308_v27  ;;  %v418_v54 = vsel %vm395_vm5, %v3915_v55, %v9011_v23  ;;  %v419_v18 = vsel %vm395_vm5, %v3916_v51, %v9014_v38  ;;  %v398_v19 = vsel %vm395_vm5, %v5666_v3, %v3916_v51  ;;  %v397_v0 = vsel %vm395_vm5, %v9015_v1, %v3915_v55  ;;  %v536_v17 = vpop.permute.xlu1 %535  ;;  %v9020_v55 = vld [vmem:[#allocation10_spill] sm:$0xff] }
 0x143   :  { %v467_v2 = vpop.permute.xlu0 %466  ;;  %994 = vmatmul.mubr.f32.gmra.mrb[18].mxu1 %v9012_v62  ;;  %1083 = vmatmul.mubr.f32.gmra.mrb[26].mxu0 %v5291_v41  ;;  %v3314_v14 = vpack.c.bf16 %v419_v18, %v418_v54  ;;  %v490_v49 = vsel %vm468_vm6, %v3920_v52, %v9018_v20  ;;  %v491_v3 = vsel %vm468_vm6, %v3921_v36, %v9019_v28  ;;  %v9021_v27 = vunpack.i.l.bf16 %v9020_v55  ;;  %v9026_v18 = vld [vmem:[#allocation12_spill] sm:$0xff] }
 0x144   :  { %3311 = vmatprep.subr.bf16.mxu1 %v3310_v7  ;;  %2781 = vmatprep.mubr.msk.f32.mxu0 %vm719_vm0, %v5299_v35  ;;  %v3316_v12 = vpack.c.bf16 %v398_v19, %v397_v0  ;;  %v3318_v51 = vpack.c.bf16 %v491_v3, %v490_v49  ;;  %v9023_v6 = vunpack.i.l.bf16 %v9022_v8  ;;  %v3320_v4 = vpack.c.bf16 %v470_v43, %v469_v59  ;;  %v9028_v0 = vld [vmem:[#allocation13_spill] sm:$0xff]  ;;  %v9031_v3 = vld [vmem:[#allocation14_spill] sm:$0xff] }
 0x145   :  { %2787 = vmatprep.mubr.msk.f32.mxu1 %vm719_vm0, %v9016_v26  ;;  %v563_v31 = vsel %vm541_vm7, %v536_v17, %v9021_v27  ;;  %v9024_v50 = vunpack.i.l.bf16 %v5747_v15  ;;  %v471_v52 = vsel %vm468_vm6, %v5715_v34, %v467_v2  ;;  %v9025_v32 = vunpack.i.h.bf16 %v5016_v58 }
 0x146   :  { %3313 = vmatpush1.bf16.msra.mxu1 %v3312_v56  ;;  %v492_v7 = vsel %vm468_vm6, %v467_v2, %v9023_v6  ;;  %v3929_v22 = vpop.permute.xlu1 %3928  ;;  %v9027_v19 = vunpack.i.l.bf16 %v9026_v18  ;;  %v9030_v26 = vunpack.i.h.bf16 %v9028_v0 }
 0x147   :  { %v3924_v63 = vpop.permute.xlu0 %3923  ;;  %1089 = vmatmul.mubr.f32.gmra.mrb[28].mxu0 %v5324_v13  ;;  %3315 = vmatprep.subr.bf16.mxu1 %v3314_v14  ;;  %v542_v36 = vsel %vm541_vm7, %v9024_v50, %v536_v17  ;;  %v3322_v23 = vpack.c.bf16 %v563_v31, %v492_v7  ;;  %v3931_v54 = vunpack.i.h.bf16 %v3929_v22  ;;  %v3930_v56 = vunpack.i.l.bf16 %v3929_v22 }
 0x148   :  { %2782 = vmatprep.mubr.msk.f32.mxu0 %vm719_vm0, %v5336_v25  ;;  %v3926_v45 = vunpack.i.h.bf16 %v3924_v63  ;;  %v3925_v53 = vunpack.i.l.bf16 %v3924_v63  ;;  %v3324_v1 = vpack.c.bf16 %v542_v36, %v471_v52  ;;  %v9029_v17 = vunpack.i.l.bf16 %v9028_v0  ;;  %v4334_v63 = vld [vmem:[%s8616_s1 + $0x18] sm:$0xff] }
 0x149   :  { %v637_v57 = vsel %vm614_vm8, %v3931_v54, %v9030_v26  ;;  %v616_v44 = vsel %vm614_vm8, %v3896_v37, %v3931_v54  ;;  %v4333_v37 = vld [vmem:[%s8616_s1] sm:$0xff] }
 0x14a   :  { %3317 = vmatpush1.bf16.msra.mxu1 %v3316_v12  ;;  %v564_v38 = vsel %vm541_vm7, %v3925_v53, %v9025_v32  ;;  %v565_v15 = vsel %vm541_vm7, %v3926_v45, %v9027_v19  ;;  %v544_v34 = vsel %vm541_vm7, %v5769_v48, %v3926_v45  ;;  %v543_v58 = vsel %vm541_vm7, %v3886_v24, %v3925_v53 }
 0x14b   :  { %1095 = vmatmul.mubr.f32.gmra.mrb[30].mxu0 %v8988_v30  ;;  %3319 = vmatprep.subr.bf16.mxu1 %v3318_v51  ;;  %v3326_v2 = vpack.c.bf16 %v565_v15, %v564_v38  ;;  %v636_v14 = vsel %vm614_vm8, %v3930_v56, %v9029_v17  ;;  %v3328_v48 = vpack.c.bf16 %v544_v34, %v543_v58  ;;  %v613_v49 = vpop.permute.xlu0 %612 }
 0x14c   :  { %2783 = vmatprep.mubr.msk.f32.mxu0 %vm719_vm0, %v8989_v16  ;;  %v615_v24 = vsel %vm614_vm8, %v3895_v29, %v3930_v56  ;;  %v3330_v20 = vpack.c.bf16 %v637_v57, %v636_v14  ;;  %v638_v29 = vsel %vm614_vm8, %v613_v49, %v9031_v3  ;;  %v617_v47 = vsel %vm614_vm8, %v5880_v10, %v613_v49 }
 0x14d   :  { %v3332_v28 = vpack.c.bf16 %v616_v44, %v615_v24 }
 0x14e   :  { %3321 = vmatpush1.bf16.msra.mxu1 %v3320_v4 }
 0x14f   :  { %1101 = vmatmul.mubr.f32.gmra.mrb[32].mxu0 %v8990_v61  ;;  %3323 = vmatprep.subr.bf16.mxu1 %v3322_v23 }
 0x150   :  { %2784 = vmatprep.mubr.msk.f32.mxu0 %vm719_vm0, %v8991_v11 }
 0x152   :  { %3325 = vmatpush1.bf16.msra.mxu1 %v3324_v1 }
 0x153   :  { %1107 = vmatmul.mubr.f32.gmra.mrb[34].mxu0 %v8997_v5  ;;  %3327 = vmatprep.subr.bf16.mxu1 %v3326_v2 }
 0x154   :  { %2785 = vmatprep.mubr.msk.f32.mxu0 %vm719_vm0, %v9001_v60 }
 0x156   :  { %3329 = vmatpush1.bf16.msra.mxu1 %v3328_v48 }
 0x157   :  { %1113 = vmatmul.mubr.f32.gmra.mrb[36].mxu0 %v5480_v9  ;;  %3331 = vmatprep.subr.bf16.mxu1 %v3330_v20 }
 0x158   :  { %2786 = vmatprep.mubr.msk.f32.mxu0 %vm719_vm0, %v9008_v39 }
 0x15a   :  { %3333 = vmatpush1.bf16.msra.mxu1 %v3332_v28 }
 0x15b   :  { %1119 = vmatmul.mubr.f32.gmra.mrb[38].mxu0 %v9012_v62  ;;  %1177 = vmatprep.subr.mxu1 %v638_v29 }
 0x15e   :  { %1178 = vmatpush1.msra.mxu1 %v617_v47 }
 0x15f   :  { %1190 = vmatmul.mubr.f32.vlgmr.msra.gmra.mrb[20].mxu1 %v4333_v37 }
 0x160   :  { %2788 = vmatprep.mubr.msk.f32.mxu1 %vm719_vm0, %v4334_v63 }
 0x163   :  { %1196 = vmatmul.mubr.f32.gmra.mrb[22].mxu1 %v5208_v21  ;;  %v6114_v43 = vpop.permute.xlu1 %671 }
 0x164   :  { %2789 = vmatprep.mubr.msk.f32.mxu1 %vm719_vm0, %v5222_v42 }
 0x167   :  { %1202 = vmatmul.mubr.f32.gmra.mrb[24].mxu1 %v5243_v40 }
 0x168   :  { %2790 = vmatprep.mubr.msk.f32.mxu1 %vm719_vm0, %v5258_v33 }
 0x16b   :  { %1208 = vmatmul.mubr.f32.gmra.mrb[26].mxu1 %v5291_v41 }
 0x16c   :  { %2791 = vmatprep.mubr.msk.f32.mxu1 %vm719_vm0, %v5299_v35 }
 0x16e   :  { %v6130_v45 = vpop.permute.xlu1 %681 }
 0x16f   :  { %1214 = vmatmul.mubr.f32.gmra.mrb[28].mxu1 %v5324_v13 }
 0x170   :  { %2792 = vmatprep.mubr.msk.f32.mxu1 %vm719_vm0, %v5336_v25 }
 0x172   :  { %v6166_v2 = vpop.permute.xlu1 %686 }
 0x173   :  { %1220 = vmatmul.mubr.f32.gmra.mrb[30].mxu1 %v8988_v30 }
 0x174   :  { %2793 = vmatprep.mubr.msk.f32.mxu1 %vm719_vm0, %v8989_v16 }
 0x176   :  { %v6116_v51 = vpop.permute.xlu0 %676 }
 0x177   :  { %1226 = vmatmul.mubr.f32.gmra.mrb[32].mxu1 %v8990_v61 }
 0x178   :  { %2794 = vmatprep.mubr.msk.f32.mxu1 %vm719_vm0, %v8991_v11 }
 0x17a   :  { %v6194_v47 = vpop.permute.xlu0 %691 }
 0x17b   :  { %1232 = vmatmul.mubr.f32.gmra.mrb[34].mxu1 %v8997_v5 }
 0x17c   :  { %2795 = vmatprep.mubr.msk.f32.mxu1 %vm719_vm0, %v9001_v60 }
 0x17f   :  { %1238 = vmatmul.mubr.f32.gmra.mrb[36].mxu1 %v5480_v9 }
 0x180   :  { %2796 = vmatprep.mubr.msk.f32.mxu1 %vm719_vm0, %v9008_v39 }
 0x183   :  { %1244 = vmatmul.mubr.f32.gmra.mrb[38].mxu1 %v9012_v62 }
 0x1ab   :  { %v816_v21 = vpop.f32.mrb[0].mxu0 }
 0x1ac   :  { %v818_v42 = vpop.f32.mrb[1].mxu0  ;;  %v6122_v31 = vadd.f32 %v816_v21, %v6114_v43 }
 0x1ad   :  { %v6119_v55 = vadd.f32 %v818_v42, %v6114_v43 }
 0x1ae   :  { %v8729_v36 = vmax.f32 %v6122_v31, 0.0 }
 0x1af   :  { %v822_v40 = vpop.f32.mrb[2].mxu0  ;;  %v8747_v4 = vmax.f32 %v6119_v55, 0.0 }
 0x1b0   :  { %v824_v33 = vpop.f32.mrb[3].mxu0  ;;  %v6136_v22 = vadd.f32 %v822_v40, %v6116_v51 }
 0x1b1   :  { %v6128_v7 = vadd.f32 %v824_v33, %v6116_v51 }
 0x1b2   :  { %v8742_v34 = vmax.f32 %v6136_v22, 0.0 }
 0x1b3   :  { %v828_v41 = vpop.f32.mrb[4].mxu0  ;;  %v8728_v18 = vmax.f32 %v6128_v7, 0.0 }
 0x1b4   :  { %v830_v35 = vpop.f32.mrb[5].mxu0  ;;  %v6154_v19 = vadd.f32 %v828_v41, %v6130_v45 }
 0x1b5   :  { %v6147_v56 = vadd.f32 %v830_v35, %v6130_v45 }
 0x1b6   :  { %v8723_v44 = vmax.f32 %v6154_v19, 0.0 }
 0x1b7   :  { %v8739_v14 = vmax.f32 %v6147_v56, 0.0 }
 0x1b8   :  { %v834_v13 = vpop.f32.mrb[6].mxu0 }
 0x1b9   :  { %v836_v25 = vpop.f32.mrb[7].mxu0  ;;  %v6190_v28 = vadd.f32 %v834_v13, %v6166_v2 }
 0x1ba   :  { %v6172_v26 = vadd.f32 %v836_v25, %v6166_v2 }
 0x1bb   :  { %v8734_v13 = vmax.f32 %v6190_v28, 0.0 }
 0x1bc   :  { %v6092_v10 = vpop.f32.mrb[8].mxu0  ;;  %v8722_v63 = vmax.f32 %v6172_v26, 0.0 }
 0x1bd   :  { %v842_v30 = vpop.f32.mrb[9].mxu0  ;;  %v6219_v25 = vadd.f32 %v6092_v10, %v6194_v47 }
 0x1be   :  { %v6207_v33 = vadd.f32 %v842_v30, %v6194_v47 }
 0x1c0   :  { %v6094_v16 = vpop.f32.mrb[10].mxu0  ;;  %v8733_v10 = vmax.f32 %v6207_v33, 0.0 }
 0x1c1   :  { %v6096_v61 = vpop.f32.mrb[11].mxu0 }
 0x1c4   :  { %v6098_v9 = vpop.f32.mrb[12].mxu0 }
 0x1c5   :  { %v6100_v11 = vpop.f32.mrb[13].mxu0 }
 0x1c8   :  { %v6102_v5 = vpop.f32.mrb[14].mxu0 }
 0x1c9   :  { %v6104_v60 = vpop.f32.mrb[15].mxu0 }
 0x1cc   :  { %v6106_v39 = vpop.f32.mrb[16].mxu0 }
 0x1cd   :  { %v6108_v62 = vpop.f32.mrb[17].mxu0 }
 0x1d1   :  { %v6110_v12 = vpop.f32.mrb[18].mxu0 }
 0x1d2   :  { %v6112_v59 = vpop.f32.mrb[19].mxu0 }
 0x1f2   :  { %v941_v27 = vpop.f32.mrb[0].mxu1 }
 0x1f3   :  { %v6125_v8 = vadd.f32 %v941_v27, %v6114_v43  ;;  %v943_v6 = vpop.f32.mrb[1].mxu1 }
 0x1f4   :  { %v6133_v53 = vadd.f32 %v943_v6, %v6114_v43 }
 0x1f5   :  { %v8746_v50 = vmax.f32 %v6125_v8, 0.0 }
 0x1f6   :  { %v8725_v52 = vmax.f32 %v6133_v53, 0.0  ;;  %v947_v23 = vpop.f32.mrb[2].mxu1 }
 0x1f7   :  { %v3934_v54 = vpack.i.bf16 %v8746_v50, %v8747_v4  ;;  %v949_v32 = vpop.f32.mrb[3].mxu1  ;;  %v6150_v38 = vadd.f32 %v947_v23, %v6116_v51 }
 0x1f8   :  { %v3939_v15 = vpack.i.bf16 %v8729_v36, %v8725_v52  ;;  %v6161_v1 = vadd.f32 %v949_v32, %v6116_v51 }
 0x1f9   :  { %3935 = vrot.lane.b32.xlu0 %v3934_v54, %s4335_s21  ;;  %v8743_v58 = vmax.f32 %v6150_v38, 0.0 }
 0x1fa   :  { %v8724_v0 = vmax.f32 %v6161_v1, 0.0  ;;  %v953_v17 = vpop.f32.mrb[4].mxu1  ;;  %3940 = vrot.lane.b32.xlu1 %v3939_v15, %s4335_s21  ;;  %v6233_v15 = vpop.permute.xlu1 %696 }
 0x1fb   :  { %v6175_v57 = vadd.f32 %v953_v17, %v6130_v45  ;;  %v955_v48 = vpop.f32.mrb[5].mxu1  ;;  %v3944_v24 = vpack.i.bf16 %v8743_v58, %v8728_v18 }
 0x1fc   :  { %v3949_v20 = vpack.i.bf16 %v8742_v34, %v8724_v0  ;;  %v6187_v49 = vadd.f32 %v955_v48, %v6130_v45 }
 0x1fd   :  { %v8738_v3 = vmax.f32 %v6175_v57, 0.0 }
 0x1fe   :  { %v8721_v29 = vmax.f32 %v6187_v49, 0.0  ;;  %v959_v37 = vpop.f32.mrb[6].mxu1  ;;  %3950 = vrot.lane.b32.xlu0 %v3949_v20, %s4335_s21  ;;  %3945 = vrot.lane.b32.xlu1 %v3944_v24, %s4335_s21  ;;  %v8727_v24 = vmax.f32 %v6219_v25, 0.0  ;;  %v6245_v20 = vadd.f32 %v6096_v61, %v6233_v15 }
 0x1ff   :  { %v3954_v21 = vpack.i.bf16 %v8738_v3, %v8739_v14  ;;  %v6204_v42 = vadd.f32 %v959_v37, %v6166_v2  ;;  %v961_v40 = vpop.f32.mrb[7].mxu1 }
 0x200   :  { %v3959_v41 = vpack.i.bf16 %v8723_v44, %v8721_v29  ;;  %v6214_v35 = vadd.f32 %v961_v40, %v6166_v2 }
 0x201   :  { %v8737_v27 = vmax.f32 %v6204_v42, 0.0 }
 0x202   :  { %v8720_v6 = vmax.f32 %v6214_v35, 0.0  ;;  %v965_v30 = vpop.f32.mrb[8].mxu1  ;;  %3955 = vrot.lane.b32.xlu0 %v3954_v21, %s4335_s21  ;;  %3960 = vrot.lane.b32.xlu1 %v3959_v41, %s4335_s21  ;;  %v6253_v41 = vadd.f32 %v6094_v16, %v6233_v15  ;;  %v8730_v16 = vmax.f32 %v6245_v20, 0.0 }
 0x203   :  { %v3964_v23 = vpack.i.bf16 %v8737_v27, %v8722_v63  ;;  %v6230_v54 = vadd.f32 %v965_v30, %v6194_v47  ;;  %v967_v32 = vpop.f32.mrb[9].mxu1 }
 0x204   :  { %v3969_v17 = vpack.i.bf16 %v8734_v13, %v8720_v6  ;;  %v6240_v48 = vadd.f32 %v967_v32, %v6194_v47  ;;  %v6262_v6 = vpop.permute.xlu0 %701 }
 0x205   :  { %v8732_v37 = vmax.f32 %v6230_v54, 0.0  ;;  %v6275_v63 = vadd.f32 %v6100_v11, %v6262_v6 }
 0x206   :  { %v8726_v21 = vmax.f32 %v6240_v48, 0.0  ;;  %v971_v40 = vpop.f32.mrb[10].mxu1  ;;  %3970 = vrot.lane.b32.xlu0 %v3969_v17, %s4335_s21  ;;  %3965 = vrot.lane.b32.xlu1 %v3964_v23, %s4335_s21 }
 0x207   :  { %v3974_v30 = vpack.i.bf16 %v8732_v37, %v8733_v10  ;;  %v6260_v61 = vadd.f32 %v971_v40, %v6233_v15  ;;  %v973_v32 = vpop.f32.mrb[11].mxu1  ;;  %v8736_v40 = vmax.f32 %v6253_v41, 0.0 }
 0x208   :  { %v3979_v23 = vpack.i.bf16 %v8727_v24, %v8726_v21  ;;  %v6269_v17 = vadd.f32 %v973_v32, %v6233_v15  ;;  %v6283_v32 = vadd.f32 %v6098_v9, %v6262_v6 }
 0x209   :  { %v8731_v29 = vmax.f32 %v6260_v61, 0.0 }
 0x20a   :  { %v8735_v44 = vmax.f32 %v6269_v17, 0.0  ;;  %v977_v0 = vpop.f32.mrb[12].mxu1  ;;  %v1066_v52 = vpop.f32.mrb[20].mxu0  ;;  %3975 = vrot.lane.b32.xlu0 %v3974_v30, %s4335_s21  ;;  %3980 = vrot.lane.b32.xlu1 %v3979_v23, %s4335_s21  ;;  %v8745_v37 = vmax.f32 %v6283_v32, 0.0 }
 0x20b   :  { %v3984_v11 = vpack.i.bf16 %v8731_v29, %v8730_v16  ;;  %v6290_v21 = vadd.f32 %v977_v0, %v6262_v6  ;;  %v6293_v24 = vadd.f32 %v1066_v52, %v6114_v43  ;;  %v979_v18 = vpop.f32.mrb[13].mxu1  ;;  %v1068_v36 = vpop.f32.mrb[21].mxu0  ;;  %v8741_v52 = vmax.f32 %v6275_v63, 0.0 }
 0x20c   :  { %v6295_v30 = vpop.permute.xlu1 %706  ;;  %v3989_v9 = vpack.i.bf16 %v8736_v40, %v8735_v44  ;;  %v6302_v23 = vadd.f32 %v979_v18, %v6262_v6  ;;  %v6305_v16 = vadd.f32 %v1068_v36, %v6114_v43 }
 0x20d   :  { %v6309_v0 = vadd.f32 %v6104_v60, %v6295_v30  ;;  %v8740_v29 = vmax.f32 %v6290_v21, 0.0  ;;  %v8752_v36 = vmax.f32 %v6293_v24, 0.0  ;;  %v6345_v34 = vadd.f32 %v6102_v5, %v6295_v30 }
 0x20e   :  { %9032 = vst [vmem:[#allocation15_spill] sm:$0xff] %v6302_v23  ;;  %9033 = vst [vmem:[#allocation16_spill] sm:$0xff] %v6305_v16  ;;  %v8744_v10 = vmax.f32 %v6302_v23, 0.0  ;;  %v983_v13 = vpop.f32.mrb[14].mxu1  ;;  %v1072_v44 = vpop.f32.mrb[22].mxu0  ;;  %3990 = vrot.lane.b32.xlu0 %v3989_v9, %s4335_s21  ;;  %3985 = vrot.lane.b32.xlu1 %v3984_v11, %s4335_s21  ;;  %v8751_v9 = vmax.f32 %v6305_v16, 0.0 }
 0x20f   :  { %9034 = vst [vmem:[#allocation17_spill] sm:$0xff] %v6309_v0  ;;  %v3994_v60 = vpack.i.bf16 %v8740_v29, %v8741_v52  ;;  %v6323_v18 = vadd.f32 %v983_v13, %v6295_v30  ;;  %v6326_v40 = vadd.f32 %v1072_v44, %v6116_v51  ;;  %v985_v27 = vpop.f32.mrb[15].mxu1  ;;  %v1074_v3 = vpop.f32.mrb[23].mxu0  ;;  %v8750_v13 = vmax.f32 %v6309_v0, 0.0  ;;  %9038 = vst [vmem:[#allocation19_spill] sm:$0xff] %v6345_v34 }
 0x210   :  { %v3999_v11 = vpack.i.bf16 %v8745_v37, %v8744_v10  ;;  %v6334_v14 = vadd.f32 %v985_v27, %v6295_v30  ;;  %v6337_v29 = vadd.f32 %v1074_v3, %v6116_v51  ;;  %v6340_v52 = vpop.permute.xlu0 %711 }
 0x211   :  { %9035 = vst [vmem:[#allocation18_spill] sm:$0xff] %v6323_v18  ;;  %v8749_v44 = vmax.f32 %v6323_v18, 0.0  ;;  %v6372_v50 = vadd.f32 %v6106_v39, %v6340_v52 }
 0x212   :  { %9036 = vst [vmem:[#allocation2_spill] sm:$0xff] %v6334_v14  ;;  %9037 = vst [vmem:[#allocation3_spill] sm:$0xff] %v6337_v29  ;;  %v989_v58 = vpop.f32.mrb[16].mxu1  ;;  %v1078_v10 = vpop.f32.mrb[24].mxu0  ;;  %3995 = vrot.lane.b32.xlu0 %v3994_v60, %s4335_s21  ;;  %4000 = vrot.lane.b32.xlu1 %v3999_v11, %s4335_s21  ;;  %v4009_v60 = vpack.i.bf16 %v8751_v9, %v8752_v36  ;;  %v9044_v9 = vmax.f32 %v6337_v29, 0.0 }
 0x213   :  { %v4004_v3 = vpack.i.bf16 %v8749_v44, %v8750_v13  ;;  %v991_v4 = vpop.f32.mrb[17].mxu1  ;;  %v1080_v5 = vpop.f32.mrb[25].mxu0  ;;  %v6361_v11 = vadd.f32 %v1078_v10, %v6130_v45  ;;  %v8757_v13 = vmax.f32 %v6345_v34, 0.0  ;;  %9041 = vst [vmem:[#allocation5_spill] sm:$0xff] %v6372_v50  ;;  %v9042_v10 = vmax.f32 %v6334_v14, 0.0 }
 0x214   :  { %v6364_v23 = vadd.f32 %v991_v4, %v6340_v52  ;;  %v6367_v44 = vadd.f32 %v1080_v5, %v6130_v45  ;;  %v9043_v5 = vmax.f32 %v6326_v40, 0.0  ;;  %v6385_v16 = vadd.f32 %v989_v58, %v6340_v52 }
 0x215   :  { %v4014_v4 = vpack.i.bf16 %v8757_v13, %v9042_v10  ;;  %v8761_v13 = vmax.f32 %v6372_v50, 0.0  ;;  %v6401_v58 = vadd.f32 %v6108_v62, %v6340_v52  ;;  %v9049_v29 = vmax.f32 %v6361_v11, 0.0 }
 0x216   :  { %9039 = vst [vmem:[#allocation4_spill] sm:$0xff] %v6364_v23  ;;  %9040 = vst [vmem:[#allocation20_spill] sm:$0xff] %v6367_v44  ;;  %v995_v27 = vpop.f32.mrb[18].mxu1  ;;  %v1084_v37 = vpop.f32.mrb[26].mxu0  ;;  %4010 = vrot.lane.b32.xlu0 %v4009_v60, %s4335_s21  ;;  %4005 = vrot.lane.b32.xlu1 %v4004_v3, %s4335_s21  ;;  %v4019_v36 = vpack.i.bf16 %v9044_v9, %v9043_v5  ;;  %v8762_v39 = vmax.f32 %v6364_v23, 0.0 }
 0x217   :  { %9045 = vst [vmem:[#allocation6_spill] sm:$0xff] %v6385_v16  ;;  %v997_v18 = vpop.f32.mrb[19].mxu1  ;;  %v1086_v0 = vpop.f32.mrb[27].mxu0  ;;  %v6391_v14 = vadd.f32 %v1084_v37, %v6166_v2  ;;  %9047 = vst [vmem:[#allocation7_spill] sm:$0xff] %v6401_v58 }
 0x218   :  { %v6394_v10 = vadd.f32 %v1086_v0, %v6166_v2  ;;  %v6397_v9 = vpop.permute.xlu1 %716  ;;  %v4034_v37 = vpack.i.bf16 %v8761_v13, %v8762_v39 }
 0x219   :  { %v6411_v0 = vadd.f32 %v995_v27, %v6397_v9  ;;  %v6427_v27 = vadd.f32 %v6112_v59, %v6397_v9  ;;  %v9054_v59 = vmax.f32 %v6385_v16, 0.0 }
 0x21a   :  { %9046 = vst [vmem:[#allocation21_spill] sm:$0xff] %v6394_v10  ;;  %v1090_v5 = vpop.f32.mrb[28].mxu0  ;;  %4015 = vrot.lane.b32.xlu0 %v4014_v4, %s4335_s21  ;;  %4020 = vrot.lane.b32.xlu1 %v4019_v36, %s4335_s21  ;;  %v9050_v4 = vmax.f32 %v6367_v44, 0.0  ;;  %v9055_v44 = vmax.f32 %v6391_v14, 0.0 }
 0x21b   :  { %9048 = vst [vmem:[#allocation22_spill] sm:$0xff] %v6411_v0  ;;  %v6414_v60 = vadd.f32 %v1090_v5, %v6194_v47  ;;  %v1092_v62 = vpop.f32.mrb[29].mxu0  ;;  %9052 = vst [vmem:[#allocation23_spill] sm:$0xff] %v6427_v27  ;;  %v8765_v5 = vmax.f32 %v6401_v58, 0.0  ;;  %v8768_v39 = vmax.f32 %v6427_v27, 0.0 }
 0x21c   :  { %v4024_v34 = vpack.i.bf16 %v9050_v4, %v9049_v29  ;;  %v6423_v23 = vadd.f32 %v1092_v62, %v6194_v47  ;;  %v6434_v4 = vadd.f32 %v997_v18, %v6397_v9  ;;  %v6455_v62 = vadd.f32 %v6110_v12, %v6397_v9 }
 0x21d   :  { %v4029_v36 = vpack.i.bf16 %v9054_v59, %v8765_v5 }
 0x21e   :  { %9051 = vst [vmem:[#allocation8_spill] sm:$0xff] %v6423_v23  ;;  %v1096_v13 = vpop.f32.mrb[30].mxu0  ;;  %4025 = vrot.lane.b32.xlu0 %v4024_v34, %s4335_s21  ;;  %4035 = vrot.lane.b32.xlu1 %v4034_v37, %s4335_s21  ;;  %9053 = vst [vmem:[#allocation9_spill] sm:$0xff] %v6434_v4  ;;  %v9056_v34 = vmax.f32 %v6394_v10, 0.0 }
 0x21f   :  { %v1098_v3 = vpop.f32.mrb[31].mxu0  ;;  %v6447_v29 = vadd.f32 %v1096_v13, %v6233_v15  ;;  %9058 = vst [vmem:[#allocation11_spill] sm:$0xff] %v6455_v62 }
 0x220   :  { %v4039_v37 = vpack.i.bf16 %v9056_v34, %v9055_v44  ;;  %v6450_v18 = vadd.f32 %v1098_v3, %v6233_v15  ;;  %v9059_v44 = vmax.f32 %v6411_v0, 0.0  ;;  %v9060_v3 = vmax.f32 %v6414_v60, 0.0 }
 0x221   :  { %v9061_v34 = vmax.f32 %v6423_v23, 0.0  ;;  %v8773_v12 = vmax.f32 %v6447_v29, 0.0 }
 0x222   :  { %9057 = vst [vmem:[#allocation10_spill] sm:$0xff] %v6450_v18  ;;  %v1102_v50 = vpop.f32.mrb[32].mxu0  ;;  %4030 = vrot.lane.b32.xlu0 %v4029_v36, %s4335_s21  ;;  %4040 = vrot.lane.b32.xlu1 %v4039_v37, %s4335_s21  ;;  %v4044_v13 = vpack.i.bf16 %v9059_v44, %v8768_v39  ;;  %v8772_v16 = vmax.f32 %v6450_v18, 0.0  ;;  %v8771_v44 = vmax.f32 %v6455_v62, 0.0 }
 0x223   :  { %v4049_v5 = vpack.i.bf16 %v9061_v34, %v9060_v3  ;;  %v1104_v10 = vpop.f32.mrb[33].mxu0  ;;  %v6471_v36 = vadd.f32 %v1102_v50, %v6262_v6  ;;  %v9063_v3 = vmax.f32 %v6434_v4, 0.0 }
 0x224   :  { %v6474_v37 = vadd.f32 %v1104_v10, %v6262_v6  ;;  %v4059_v50 = vpack.i.bf16 %v8772_v16, %v8773_v12 }
 0x225   :  { %v4054_v34 = vpack.i.bf16 %v8771_v44, %v9063_v3  ;;  %v8777_v10 = vmax.f32 %v6471_v36, 0.0 }
 0x226   :  { %9062 = vst [vmem:[#allocation12_spill] sm:$0xff] %v6474_v37  ;;  %v1108_v39 = vpop.f32.mrb[34].mxu0  ;;  %4050 = vrot.lane.b32.xlu0 %v4049_v5, %s4335_s21  ;;  %4045 = vrot.lane.b32.xlu1 %v4044_v13, %s4335_s21  ;;  %v8776_v23 = vmax.f32 %v6474_v37, 0.0 }
 0x227   :  { %v1110_v59 = vpop.f32.mrb[35].mxu0  ;;  %v6511_v37 = vadd.f32 %v1108_v39, %v6295_v30 }
 0x228   :  { %v4064_v13 = vpack.i.bf16 %v8776_v23, %v8777_v10 }
 0x22a   :  { %v1114_v0 = vpop.f32.mrb[36].mxu0  ;;  %4055 = vrot.lane.b32.xlu0 %v4054_v34, %s4335_s21  ;;  %4060 = vrot.lane.b32.xlu1 %v4059_v50, %s4335_s21 }
 0x22b   :  { %v1116_v5 = vpop.f32.mrb[37].mxu0  ;;  %v6500_v4 = vadd.f32 %v1114_v0, %v6340_v52 }
 0x22c   :  { %v6503_v34 = vadd.f32 %v1116_v5, %v6340_v52 }
 0x22e   :  { %v1120_v3 = vpop.f32.mrb[38].mxu0  ;;  %4065 = vrot.lane.b32.xlu0 %v4064_v13, %s4335_s21  ;;  %9065 = vst [vmem:[#allocation14_spill] sm:$0xff] %v6503_v34 }
 0x22f   :  { %v1122_v44 = vpop.f32.mrb[39].mxu0 }
 0x232   :  { %v1191_v16 = vpop.f32.mrb[20].mxu1 }
 0x233   :  { %v6497_v12 = vadd.f32 %v1191_v16, %v6114_v43  ;;  %v1193_v18 = vpop.f32.mrb[21].mxu1  ;;  %v6514_v16 = vadd.f32 %v1110_v59, %v6295_v30 }
 0x234   :  { %v6506_v50 = vadd.f32 %v1193_v18, %v6114_v43 }
 0x235   :  { %9064 = vst [vmem:[#allocation13_spill] sm:$0xff] %v6497_v12  ;;  %v8784_v23 = vmax.f32 %v6497_v12, 0.0  ;;  %9066 = vst [vmem:[#allocation24_spill] sm:$0xff] %v6514_v16 }
 0x236   :  { %v8783_v10 = vmax.f32 %v6506_v50, 0.0  ;;  %v1197_v13 = vpop.f32.mrb[22].mxu1 }
 0x237   :  { %v6517_v0 = vadd.f32 %v1197_v13, %v6116_v51  ;;  %v1199_v62 = vpop.f32.mrb[23].mxu1 }
 0x238   :  { %v4069_v18 = vpack.i.bf16 %v8783_v10, %v8784_v23  ;;  %v6526_v27 = vadd.f32 %v1199_v62, %v6116_v51  ;;  %v9069_v10 = vmax.f32 %v6500_v4, 0.0  ;;  %v9070_v51 = vmax.f32 %v6503_v34, 0.0 }
 0x239   :  { %9067 = vst [vmem:[#allocation25_spill] sm:$0xff] %v6517_v0  ;;  %v8787_v39 = vmax.f32 %v6517_v0, 0.0  ;;  %v9072_v34 = vmax.f32 %v6511_v37, 0.0 }
 0x23a   :  { %9068 = vst [vmem:[#allocation26_spill] sm:$0xff] %v6526_v27  ;;  %v8788_v59 = vmax.f32 %v6526_v27, 0.0  ;;  %v1203_v58 = vpop.f32.mrb[24].mxu1  ;;  %4070 = vrot.lane.b32.xlu0 %v4069_v18, %s4335_s21  ;;  %v4084_v62 = vpack.i.bf16 %v9070_v51, %v9069_v10  ;;  %v9073_v10 = vmax.f32 %v6514_v16, 0.0  ;;  %v1994_v27 = vld [vmem:[%s8618_s3 + $0xc0] sm:$0xff] }
 0x23b   :  { %v6534_v43 = vadd.f32 %v1203_v58, %v6130_v45  ;;  %v1205_v12 = vpop.f32.mrb[25].mxu1 }
 0x23c   :  { %v4074_v23 = vpack.i.bf16 %v8788_v59, %v8787_v39  ;;  %v6545_v18 = vadd.f32 %v1205_v12, %v6130_v45  ;;  %v4079_v51 = vpack.i.bf16 %v9073_v10, %v9072_v34  ;;  %v6559_v45 = vadd.f32 %v1120_v3, %v6397_v9 }
 0x23d   :  { %v8790_v13 = vmax.f32 %v6534_v43, 0.0  ;;  %v6562_v12 = vadd.f32 %v1122_v44, %v6397_v9 }
 0x23e   :  { %9071 = vst [vmem:[#allocation27_spill] sm:$0xff] %v6545_v18  ;;  %v8789_v5 = vmax.f32 %v6545_v18, 0.0  ;;  %v1209_v58 = vpop.f32.mrb[26].mxu1  ;;  %4085 = vrot.lane.b32.xlu0 %v4084_v62, %s4335_s21  ;;  %4075 = vrot.lane.b32.xlu1 %v4074_v23, %s4335_s21 }
 0x23f   :  { %v6556_v0 = vadd.f32 %v1209_v58, %v6166_v2  ;;  %v1211_v39 = vpop.f32.mrb[27].mxu1  ;;  %9075 = vst [vmem:[#allocation29_spill] sm:$0xff] %v6562_v12  ;;  %v9081_v16 = vmax.f32 %v6562_v12, 0.0 }
 0x240   :  { %v4089_v23 = vpack.i.bf16 %v8789_v5, %v8790_v13  ;;  %v6569_v62 = vadd.f32 %v1211_v39, %v6166_v2  ;;  %v9080_v5 = vmax.f32 %v6559_v45, 0.0 }
 0x241   :  { %9074 = vst [vmem:[#allocation28_spill] sm:$0xff] %v6556_v0  ;;  %v8793_v34 = vmax.f32 %v6556_v0, 0.0 }
 0x242   :  { %9076 = vst [vmem:[#allocation30_spill] sm:$0xff] %v6569_v62  ;;  %v8794_v58 = vmax.f32 %v6569_v62, 0.0  ;;  %v1215_v10 = vpop.f32.mrb[28].mxu1  ;;  %4090 = vrot.lane.b32.xlu0 %v4089_v23, %s4335_s21  ;;  %4080 = vrot.lane.b32.xlu1 %v4079_v51, %s4335_s21  ;;  %v4104_v18 = vpack.i.bf16 %v9081_v16, %v9080_v5 }
 0x243   :  { %v6576_v44 = vadd.f32 %v1215_v10, %v6194_v47  ;;  %v1217_v3 = vpop.f32.mrb[29].mxu1 }
 0x244   :  { %v4094_v2 = vpack.i.bf16 %v8794_v58, %v8793_v34  ;;  %v6585_v39 = vadd.f32 %v1217_v3, %v6194_v47 }
 0x245   :  { %9077 = vst [vmem:[#allocation31_spill] sm:$0xff] %v6576_v44  ;;  %v8796_v23 = vmax.f32 %v6576_v44, 0.0 }
 0x246   :  { %9078 = vst [vmem:[#allocation32_spill] sm:$0xff] %v6585_v39  ;;  %v8795_v51 = vmax.f32 %v6585_v39, 0.0  ;;  %v1221_v13 = vpop.f32.mrb[30].mxu1  ;;  %4095 = vrot.lane.b32.xlu1 %v4094_v2, %s4335_s21 }
 0x247   :  { %v6591_v10 = vadd.f32 %v1221_v13, %v6233_v15  ;;  %v1223_v59 = vpop.f32.mrb[31].mxu1 }
 0x248   :  { %v4099_v47 = vpack.i.bf16 %v8795_v51, %v8796_v23  ;;  %v6602_v3 = vadd.f32 %v1223_v59, %v6233_v15 }
 0x249   :  { %9079 = vst [vmem:[#allocation33_spill] sm:$0xff] %v6591_v10  ;;  %v8797_v34 = vmax.f32 %v6591_v10, 0.0 }
 0x24a   :  { %9082 = vst [vmem:[#allocation34_spill] sm:$0xff] %v6602_v3  ;;  %v8798_v2 = vmax.f32 %v6602_v3, 0.0  ;;  %v1227_v13 = vpop.f32.mrb[32].mxu1  ;;  %4100 = vrot.lane.b32.xlu0 %v4099_v47, %s4335_s21  ;;  %4105 = vrot.lane.b32.xlu1 %v4104_v18, %s4335_s21 }
 0x24b   :  { %v6609_v58 = vadd.f32 %v1227_v13, %v6262_v6  ;;  %v1229_v16 = vpop.f32.mrb[33].mxu1 }
 0x24c   :  { %v4109_v5 = vpack.i.bf16 %v8798_v2, %v8797_v34  ;;  %v6616_v15 = vadd.f32 %v1229_v16, %v6262_v6 }
 0x24d   :  { %9083 = vst [vmem:[#allocation35_spill] sm:$0xff] %v6609_v58  ;;  %v8801_v59 = vmax.f32 %v6609_v58, 0.0  ;;  %v1990_v58 = vld [vmem:[%s8618_s3 + $0xa0] sm:$0xff] }
 0x24e   :  { %9084 = vst [vmem:[#allocation36_spill] sm:$0xff] %v6616_v15  ;;  %v8800_v51 = vmax.f32 %v6616_v15, 0.0  ;;  %v1233_v23 = vpop.f32.mrb[34].mxu1  ;;  %4110 = vrot.lane.b32.xlu1 %v4109_v5, %s4335_s21 }
 0x24f   :  { %v6622_v18 = vadd.f32 %v1233_v23, %v6295_v30  ;;  %v1235_v47 = vpop.f32.mrb[35].mxu1 }
 0x250   :  { %v4114_v13 = vpack.i.bf16 %v8800_v51, %v8801_v59  ;;  %v6629_v34 = vadd.f32 %v1235_v47, %v6295_v30 }
 0x251   :  { %9085 = vst [vmem:[#allocation37_spill] sm:$0xff] %v6622_v18  ;;  %v8808_v6 = vmax.f32 %v6622_v18, 0.0 }
 0x252   :  { %9086 = vst [vmem:[#allocation38_spill] sm:$0xff] %v6629_v34  ;;  %v8803_v16 = vmax.f32 %v6629_v34, 0.0  ;;  %v1239_v2 = vpop.f32.mrb[36].mxu1  ;;  %4115 = vrot.lane.b32.xlu1 %v4114_v13, %s4335_s21 }
 0x253   :  { %v6635_v5 = vadd.f32 %v1239_v2, %v6340_v52  ;;  %v1241_v23 = vpop.f32.mrb[37].mxu1 }
 0x254   :  { %v4119_v12 = vpack.i.bf16 %v8803_v16, %v8808_v6  ;;  %v6642_v51 = vadd.f32 %v1241_v23, %v6340_v52  ;;  %v2002_v6 = vld [vmem:[%s8618_s3 + $0x100] sm:$0xff] }
 0x255   :  { %9087 = vst [vmem:[#allocation39_spill] sm:$0xff] %v6635_v5  ;;  %v8807_v30 = vmax.f32 %v6635_v5, 0.0 }
 0x256   :  { %9088 = vst [vmem:[#allocation40_spill] sm:$0xff] %v6642_v51  ;;  %v8804_v47 = vmax.f32 %v6642_v51, 0.0  ;;  %v1245_v59 = vpop.f32.mrb[38].mxu1  ;;  %4120 = vrot.lane.b32.xlu0 %v4119_v12, %s4335_s21 }
 0x257   :  { %v6648_v13 = vadd.f32 %v1245_v59, %v6397_v9  ;;  %v1247_v2 = vpop.f32.mrb[39].mxu1  ;;  %v1986_v59 = vld [vmem:[%s8618_s3 + $0x80] sm:$0xff] }
 0x258   :  { %v4124_v15 = vpack.i.bf16 %v8804_v47, %v8807_v30  ;;  %v6655_v16 = vadd.f32 %v1247_v2, %v6397_v9  ;;  %v1987_v9 = vld [vmem:[%s8618_s3 + $0x88] sm:$0xff]  ;;  %v1970_v2 = vld [vmem:[%s8618_s3] sm:$0xff] }
 0x259   :  { %9089 = vst [vmem:[#allocation41_spill] sm:$0xff] %v6648_v13  ;;  %v8805_v52 = vmax.f32 %v6648_v13, 0.0  ;;  %v1971_v47 = vld [vmem:[%s8618_s3 + $0x8] sm:$0xff] }
 0x25a   :  { %9090 = vst [vmem:[#allocation42_spill] sm:$0xff] %v6655_v16  ;;  %v8806_v23 = vmax.f32 %v6655_v16, 0.0  ;;  %4125 = vrot.lane.b32.xlu0 %v4124_v15, %s4335_s21  ;;  %v3334_v15 = vpack.c.bf16 %v1987_v9, %v1986_v59  ;;  %v2003_v59 = vld [vmem:[%s8618_s3 + $0x108] sm:$0xff]  ;;  %v1988_v16 = vld [vmem:[%s8618_s3 + $0x90] sm:$0xff] }
 0x25b   :  { %v3368_v13 = vpack.c.bf16 %v2003_v59, %v2002_v6  ;;  %v1972_v6 = vld [vmem:[%s8618_s3 + $0x10] sm:$0xff] }
 0x25c   :  { %v4129_v12 = vpack.i.bf16 %v8806_v23, %v8805_v52  ;;  %v2019_v52 = vld [vmem:[%s8618_s3 + $0x188] sm:$0xff]  ;;  %v3336_v23 = vpack.c.bf16 %v1971_v47, %v1970_v2  ;;  %3335 = vmatprep.subr.bf16.mxu0 %v3334_v15  ;;  %v1989_v47 = vld [vmem:[%s8618_s3 + $0x98] sm:$0xff]  ;;  %v2020_v59 = vld [vmem:[%s8618_s3 + $0x190] sm:$0xff] }
 0x25d   :  { %v3338_v51 = vpack.c.bf16 %v1989_v47, %v1988_v16  ;;  %v1973_v15 = vld [vmem:[%s8618_s3 + $0x18] sm:$0xff] }
 0x25e   :  { %4130 = vrot.lane.b32.xlu1 %v4129_v12, %s4335_s21  ;;  %v2018_v12 = vld [vmem:[%s8618_s3 + $0x180] sm:$0xff]  ;;  %3337 = vmatpush3.bf16.msra.mxu0 %v3336_v23  ;;  %v3340_v2 = vpack.c.bf16 %v1973_v15, %v1972_v6  ;;  %v2021_v16 = vld [vmem:[%s8618_s3 + $0x198] sm:$0xff]  ;;  %v9092_v15 = vmax.f32 %v6119_v55, 0.0  ;;  %v9095_v55 = vmax.f32 %v6125_v8, 0.0  ;;  %v2023_v8 = vld [vmem:[%s8618_s3 + $0x1a8] sm:$0xff] }
 0x25f   :  { %v3366_v30 = vpack.c.bf16 %v2019_v52, %v2018_v12  ;;  %v2005_v23 = vld [vmem:[%s8618_s3 + $0x118] sm:$0xff]  ;;  %3339 = vmatprep.subr.bf16.mxu0 %v3338_v51  ;;  %v1974_v51 = vld [vmem:[%s8618_s3 + $0x20] sm:$0xff] }
 0x261   :  { %3367 = vmatprep.subr.bf16.mxu1 %v3366_v30  ;;  %v2004_v30 = vld [vmem:[%s8618_s3 + $0x110] sm:$0xff] }
 0x262   :  { %3369 = vmatpush3.bf16.msra.mxu1 %v3368_v13  ;;  %v3370_v13 = vpack.c.bf16 %v2021_v16, %v2020_v59  ;;  %v3372_v6 = vpack.c.bf16 %v2005_v23, %v2004_v30  ;;  %3341 = vmatpush3.bf16.msra.mxu0 %v3340_v2  ;;  %v2022_v30 = vld [vmem:[%s8618_s3 + $0x1a0] sm:$0xff] }
 0x264   :  { %3371 = vmatprep.subr.bf16.mxu1 %v3370_v13  ;;  %v2006_v13 = vld [vmem:[%s8618_s3 + $0x120] sm:$0xff] }
 0x266   :  { %3373 = vmatpush3.bf16.msra.mxu1 %v3372_v6 }
 0x26b   :  { %v6689_v9 = vpop.permute.xlu0 %3935 }
 0x26c   :  { %v3938_v52 = vunpack.i.h.bf16 %v6689_v9  ;;  %v6699_v12 = vpop.permute.xlu1 %3940  ;;  %v9091_v47 = vunpack.i.l.bf16 %v6689_v9 }
 0x26d   :  { %v9094_v18 = vunpack.i.l.bf16 %v6699_v12 }
 0x26e   :  { %v1540_v34 = vsel %vm103_vm1, %v9091_v47, %v3938_v52  ;;  %v1991_v47 = vld [vmem:[%s8618_s3 + $0xa8] sm:$0xff] }
 0x26f   :  { %v6726_v5 = vmax.f32 %v9092_v15, %v1540_v34  ;;  %v1530_v10 = vsel %vm103_vm1, %v3938_v52, %v9094_v18  ;;  %v3342_v18 = vpack.c.bf16 %v1991_v47, %v1990_v58  ;;  %v1975_v52 = vld [vmem:[%s8618_s3 + $0x28] sm:$0xff] }
 0x270   :  { %v6743_v34 = vmax.f32 %v9095_v55, %v1530_v10  ;;  %v6745_v59 = vpop.permute.xlu0 %3950  ;;  %v6747_v16 = vpop.permute.xlu1 %3945  ;;  %v2007_v15 = vld [vmem:[%s8618_s3 + $0x128] sm:$0xff]  ;;  %v3344_v55 = vpack.c.bf16 %v1975_v52, %v1974_v51  ;;  %v3374_v10 = vpack.c.bf16 %v2023_v8, %v2022_v30  ;;  %v1992_v51 = vld [vmem:[%s8618_s3 + $0xb0] sm:$0xff]  ;;  %v9101_v30 = vmax.f32 %v6150_v38, 0.0 }
 0x271   :  { %9093 = vst [vmem:[#allocation43_spill] sm:$0xff] %v6726_v5  ;;  %3343 = vmatprep.subr.bf16.mxu0 %v3342_v18  ;;  %v3376_v23 = vpack.c.bf16 %v2007_v15, %v2006_v13  ;;  %v9097_v2 = vunpack.i.l.bf16 %v6745_v59  ;;  %v9098_v58 = vunpack.i.h.bf16 %v6747_v16  ;;  %v9099_v3 = vunpack.i.l.bf16 %v6747_v16  ;;  %v1993_v18 = vld [vmem:[%s8618_s3 + $0xb8] sm:$0xff]  ;;  %v1976_v52 = vld [vmem:[%s8618_s3 + $0x30] sm:$0xff] }
 0x272   :  { %9096 = vst [vmem:[#allocation44_spill] sm:$0xff] %v6743_v34  ;;  %v4134_v47 = vpack.i.bf16 %v6743_v34, %v6726_v5  ;;  %v9100_v39 = vunpack.i.h.bf16 %v6745_v59  ;;  %3345 = vmatpush3.bf16.msra.mxu0 %v3344_v55  ;;  %v1977_v13 = vld [vmem:[%s8618_s3 + $0x38] sm:$0xff]  ;;  %v2024_v38 = vld [vmem:[%s8618_s3 + $0x1b0] sm:$0xff]  ;;  %3375 = vmatprep.subr.bf16.mxu1 %v3374_v10 }
 0x273   :  { %v1531_v6 = vsel %vm103_vm1, %v9098_v58, %v9097_v2  ;;  %v9103_v2 = vmax.f32 %v6136_v22, 0.0  ;;  %v2025_v22 = vld [vmem:[%s8618_s3 + $0x1b8] sm:$0xff]  ;;  %3377 = vmatpush3.bf16.msra.mxu1 %v3376_v23  ;;  %v3348_v34 = vpack.c.bf16 %v1977_v13, %v1976_v52  ;;  %v1995_v23 = vld [vmem:[%s8618_s3 + $0xc8] sm:$0xff]  ;;  %v9107_v13 = vmax.f32 %v6175_v57, 0.0 }
 0x274   :  { %v1551_v44 = vsel %vm103_vm1, %v9100_v39, %v9099_v3  ;;  %v6793_v8 = vmax.f32 %v9101_v30, %v1531_v6  ;;  %v6799_v39 = vpop.permute.xlu0 %3955  ;;  %v6801_v3 = vpop.permute.xlu1 %3960  ;;  %4135 = vrot.lane.b32.xlu0 %v4134_v47, %s4337_s27  ;;  %v2008_v47 = vld [vmem:[%s8618_s3 + $0x130] sm:$0xff]  ;;  %v2009_v55 = vld [vmem:[%s8618_s3 + $0x138] sm:$0xff]  ;;  %v3378_v5 = vpack.c.bf16 %v2025_v22, %v2024_v38  ;;  %v2027_v57 = vld [vmem:[%s8618_s3 + $0x1c8] sm:$0xff] }
 0x275   :  { %v6797_v58 = vmax.f32 %v9103_v2, %v1551_v44  ;;  %v3958_v44 = vunpack.i.h.bf16 %v6799_v39  ;;  %v8826_v15 = vunpack.i.l.bf16 %v6799_v39  ;;  %v8825_v6 = vunpack.i.l.bf16 %v6801_v3 }
 0x276   :  { %9102 = vst [vmem:[#allocation45_spill] sm:$0xff] %v6793_v8  ;;  %v3346_v2 = vpack.c.bf16 %v1993_v18, %v1992_v51  ;;  %v3380_v62 = vpack.c.bf16 %v2009_v55, %v2008_v47  ;;  %v1978_v51 = vld [vmem:[%s8618_s3 + $0x40] sm:$0xff]  ;;  %v9105_v18 = vmax.f32 %v6147_v56, 0.0  ;;  %v1979_v47 = vld [vmem:[%s8618_s3 + $0x48] sm:$0xff]  ;;  %3379 = vmatprep.subr.bf16.mxu1 %v3378_v5  ;;  %v1997_v5 = vld [vmem:[%s8618_s3 + $0xd8] sm:$0xff] }
 0x277   :  { %9104 = vst [vmem:[#allocation46_spill] sm:$0xff] %v6797_v58  ;;  %v4139_v30 = vpack.i.bf16 %v6797_v58, %v6793_v8  ;;  %v1542_v10 = vsel %vm103_vm1, %v8826_v15, %v3958_v44  ;;  %v1532_v0 = vsel %vm103_vm1, %v3958_v44, %v8825_v6  ;;  %v2026_v56 = vld [vmem:[%s8618_s3 + $0x1c0] sm:$0xff]  ;;  %v3350_v6 = vpack.c.bf16 %v1995_v23, %v1994_v27  ;;  %v1999_v58 = vld [vmem:[%s8618_s3 + $0xe8] sm:$0xff] }
 0x278   :  { %v6843_v52 = vmax.f32 %v9105_v18, %v1542_v10  ;;  %v6847_v38 = vmax.f32 %v9107_v13, %v1532_v0  ;;  %v6849_v22 = vpop.permute.xlu0 %3970  ;;  %v6851_v44 = vpop.permute.xlu1 %3965  ;;  %3347 = vmatprep.subr.bf16.mxu0 %v3346_v2  ;;  %v2010_v2 = vld [vmem:[%s8618_s3 + $0x140] sm:$0xff]  ;;  %v2011_v18 = vld [vmem:[%s8618_s3 + $0x148] sm:$0xff]  ;;  %3381 = vmatpush3.bf16.msra.mxu1 %v3380_v62  ;;  %v3352_v15 = vpack.c.bf16 %v1979_v47, %v1978_v51 }
 0x279   :  { %4140 = vrot.lane.b32.xlu0 %v4139_v30, %s4337_s27  ;;  %v8827_v55 = vunpack.i.l.bf16 %v6849_v22  ;;  %v8828_v10 = vunpack.i.h.bf16 %v6851_v44  ;;  %3349 = vmatpush3.bf16.msra.mxu0 %v3348_v34  ;;  %v3382_v0 = vpack.c.bf16 %v2027_v57, %v2026_v56  ;;  %v1996_v34 = vld [vmem:[%s8618_s3 + $0xd0] sm:$0xff]  ;;  %v9109_v62 = vunpack.i.l.bf16 %v6851_v44  ;;  %v1981_v56 = vld [vmem:[%s8618_s3 + $0x58] sm:$0xff]  ;;  %v1998_v8 = vld [vmem:[%s8618_s3 + $0xe0] sm:$0xff] }
 0x27a   :  { %9106 = vst [vmem:[#allocation47_spill] sm:$0xff] %v6843_v52  ;;  %9108 = vst [vmem:[#allocation48_spill] sm:$0xff] %v6847_v38  ;;  %v4144_v13 = vpack.i.bf16 %v6847_v38, %v6843_v52  ;;  %v1980_v30 = vld [vmem:[%s8618_s3 + $0x50] sm:$0xff]  ;;  %v9110_v23 = vunpack.i.h.bf16 %v6849_v22  ;;  %v3384_v47 = vpack.c.bf16 %v2011_v18, %v2010_v2  ;;  %v9113_v52 = vmax.f32 %v6190_v28, 0.0  ;;  %3351 = vmatprep.subr.bf16.mxu0 %v3350_v6 }
 0x27b   :  { %v1533_v27 = vsel %vm103_vm1, %v8828_v10, %v8827_v55  ;;  %v2028_v57 = vld [vmem:[%s8618_s3 + $0x1d0] sm:$0xff]  ;;  %v2029_v55 = vld [vmem:[%s8618_s3 + $0x1d8] sm:$0xff]  ;;  %v9111_v10 = vmax.f32 %v6204_v42, 0.0  ;;  %3383 = vmatprep.subr.bf16.mxu1 %v3382_v0  ;;  %v3354_v6 = vpack.c.bf16 %v1997_v5, %v1996_v34  ;;  %v1983_v34 = vld [vmem:[%s8618_s3 + $0x68] sm:$0xff] }
 0x27c   :  { %v1553_v51 = vsel %vm103_vm1, %v9110_v23, %v9109_v62  ;;  %v6913_v2 = vpop.permute.xlu0 %3975  ;;  %v6915_v18 = vpop.permute.xlu1 %3980  ;;  %4145 = vrot.lane.b32.xlu1 %v4144_v13, %s4337_s27  ;;  %v2012_v23 = vld [vmem:[%s8618_s3 + $0x150] sm:$0xff]  ;;  %v2013_v42 = vld [vmem:[%s8618_s3 + $0x158] sm:$0xff]  ;;  %3385 = vmatpush3.bf16.msra.mxu1 %v3384_v47  ;;  %v2030_v5 = vld [vmem:[%s8618_s3 + $0x1e0] sm:$0xff] }
 0x27d   :  { %v6907_v38 = vmax.f32 %v9111_v10, %v1533_v27  ;;  %v6911_v62 = vmax.f32 %v9113_v52, %v1553_v51  ;;  %v3978_v10 = vunpack.i.h.bf16 %v6913_v2  ;;  %v8833_v28 = vunpack.i.l.bf16 %v6913_v2  ;;  %3353 = vmatpush3.bf16.msra.mxu0 %v3352_v15  ;;  %v1982_v15 = vld [vmem:[%s8618_s3 + $0x60] sm:$0xff]  ;;  %v2031_v47 = vld [vmem:[%s8618_s3 + $0x1e8] sm:$0xff] }
 0x27e   :  { %v8834_v52 = vunpack.i.l.bf16 %v6915_v18  ;;  %v3356_v27 = vpack.c.bf16 %v1981_v56, %v1980_v30  ;;  %v3386_v51 = vpack.c.bf16 %v2029_v55, %v2028_v57  ;;  %v3388_v30 = vpack.c.bf16 %v2013_v42, %v2012_v23  ;;  %3355 = vmatprep.subr.bf16.mxu0 %v3354_v6 }
 0x27f   :  { %9112 = vst [vmem:[#allocation49_spill] sm:$0xff] %v6907_v38  ;;  %v4149_v13 = vpack.i.bf16 %v6911_v62, %v6907_v38  ;;  %v1544_v0 = vsel %vm103_vm1, %v8833_v28, %v3978_v10  ;;  %v9114_v56 = vmax.f32 %v6207_v33, 0.0  ;;  %v9115_v28 = vmax.f32 %v6230_v54, 0.0  ;;  %v2015_v33 = vld [vmem:[%s8618_s3 + $0x168] sm:$0xff] }
 0x280   :  { %v1534_v55 = vsel %vm103_vm1, %v3978_v10, %v8834_v52  ;;  %v6963_v23 = vpop.permute.xlu0 %3990  ;;  %v6965_v42 = vpop.permute.xlu1 %3985  ;;  %v2014_v52 = vld [vmem:[%s8618_s3 + $0x160] sm:$0xff]  ;;  %3387 = vmatprep.subr.bf16.mxu1 %v3386_v51  ;;  %v1985_v51 = vld [vmem:[%s8618_s3 + $0x78] sm:$0xff] }
 0x281   :  { %v6957_v57 = vmax.f32 %v9114_v56, %v1544_v0  ;;  %v6961_v10 = vmax.f32 %v9115_v28, %v1534_v55  ;;  %4150 = vrot.lane.b32.xlu1 %v4149_v13, %s4337_s27  ;;  %3357 = vmatpush3.bf16.msra.mxu0 %v3356_v27  ;;  %v3358_v28 = vpack.c.bf16 %v1999_v58, %v1998_v8  ;;  %v8836_v13 = vunpack.i.h.bf16 %v6699_v12  ;;  %v2000_v27 = vld [vmem:[%s8618_s3 + $0xf0] sm:$0xff]  ;;  %v2001_v8 = vld [vmem:[%s8618_s3 + $0xf8] sm:$0xff] }
 0x282   :  { %3389 = vmatpush3.bf16.msra.mxu1 %v3388_v30  ;;  %v3360_v0 = vpack.c.bf16 %v1983_v34, %v1982_v15  ;;  %v3390_v55 = vpack.c.bf16 %v2031_v47, %v2030_v5  ;;  %v3392_v56 = vpack.c.bf16 %v2015_v33, %v2014_v52  ;;  %v3362_v58 = vpack.c.bf16 %v2001_v8, %v2000_v27  ;;  %v1984_v52 = vld [vmem:[%s8618_s3 + $0x70] sm:$0xff]  ;;  %v2033_v34 = vld [vmem:[%s8618_s3 + $0x1f8] sm:$0xff] }
 0x283   :  { %9116 = vst [vmem:[#allocation50_spill] sm:$0xff] %v6961_v10  ;;  %v4154_v54 = vpack.i.bf16 %v6961_v10, %v6957_v57  ;;  %3359 = vmatprep.subr.bf16.mxu0 %v3358_v28  ;;  %v2032_v15 = vld [vmem:[%s8618_s3 + $0x1f0] sm:$0xff]  ;;  %v3364_v30 = vpack.c.bf16 %v1985_v51, %v1984_v52  ;;  %v2017_v47 = vld [vmem:[%s8618_s3 + $0x178] sm:$0xff]  ;;  %v9117_v33 = vunpack.i.l.bf16 %v6689_v9  ;;  %v9119_v27 = vunpack.i.l.bf16 %v6747_v16 }
 0x284   :  { %v6977_v6 = vpop.permute.xlu0 %3995  ;;  %v6979_v38 = vpop.permute.xlu1 %4000  ;;  %3391 = vmatprep.subr.bf16.mxu1 %v3390_v55  ;;  %v2016_v5 = vld [vmem:[%s8618_s3 + $0x170] sm:$0xff]  ;;  %v3394_v55 = vpack.c.bf16 %v2033_v34, %v2032_v15  ;;  %v9120_v15 = vunpack.i.l.bf16 %v6699_v12  ;;  %v9121_v34 = vmax.f32 %v6122_v31, 0.0  ;;  %v9126_v31 = vunpack.i.l.bf16 %v6799_v39 }
 0x285   :  { %4155 = vrot.lane.b32.xlu0 %v4154_v54, %s4337_s27  ;;  %3361 = vmatpush3.bf16.msra.mxu0 %v3360_v0  ;;  %v1550_v54 = vsel %vm103_vm1, %v8836_v13, %v9117_v33  ;;  %v3396_v33 = vpack.c.bf16 %v2017_v47, %v2016_v5  ;;  %v9124_v47 = vmax.f32 %v6293_v24, 0.0  ;;  %v3988_v39 = vunpack.i.h.bf16 %v6965_v42 }
 0x286   :  { %3393 = vmatpush3.bf16.msra.mxu1 %v3392_v56  ;;  %3363 = vmatprep.subr.bf16.mxu0 %v3362_v58  ;;  %v9118_v56 = vunpack.i.h.bf16 %v6747_v16 }
 0x287   :  { %3395 = vmatprep.subr.bf16.mxu1 %v3394_v55 }
 0x288   :  { %v7012_v28 = vpop.permute.xlu0 %4010  ;;  %v7014_v0 = vpop.permute.xlu1 %4005  ;;  %v1541_v8 = vsel %vm103_vm1, %v9119_v27, %v9118_v56  ;;  %v7035_v56 = vmax.f32 %v9121_v34, %v1550_v54  ;;  %v9122_v27 = vmax.f32 %v6128_v7, 0.0  ;;  %v9127_v54 = vunpack.i.h.bf16 %v6801_v3 }
 0x289   :  { %v8837_v52 = vunpack.i.h.bf16 %v7012_v28  ;;  %v4012_v51 = vunpack.i.l.bf16 %v7012_v28  ;;  %3365 = vmatpush3.bf16.msra.mxu0 %v3364_v30  ;;  %v9123_v30 = vmax.f32 %v6133_v53, 0.0  ;;  %v9128_v53 = vunpack.i.h.bf16 %v6851_v44 }
 0x28a   :  { %v7039_v13 = vmax.f32 %v9122_v27, %v1541_v8  ;;  %3397 = vmatpush3.bf16.msra.mxu1 %v3396_v33  ;;  %v1552_v7 = vsel %vm103_vm1, %v9127_v54, %v9126_v31  ;;  %v9129_v8 = vunpack.i.l.bf16 %v6851_v44  ;;  %v3987_v44 = vunpack.i.l.bf16 %v6965_v42 }
 0x28b   :  { %v1510_v58 = vsel %vm103_vm1, %v4012_v51, %v8837_v52  ;;  %v1520_v16 = vsel %vm103_vm1, %v9120_v15, %v4012_v51  ;;  %v9131_v31 = vmax.f32 %v6161_v1, 0.0 }
 0x28c   :  { %v7043_v5 = vmax.f32 %v9123_v30, %v1520_v16  ;;  %v7047_v55 = vmax.f32 %v9124_v47, %v1510_v58  ;;  %v7049_v52 = vpop.permute.xlu0 %4015  ;;  %v7051_v9 = vpop.permute.xlu1 %4020  ;;  %v1543_v24 = vsel %vm103_vm1, %v9129_v8, %v9128_v53  ;;  %v9130_v30 = vunpack.i.l.bf16 %v6745_v59 }
 0x28d   :  { %v8838_v51 = vunpack.i.h.bf16 %v7051_v9  ;;  %v4022_v58 = vunpack.i.l.bf16 %v7051_v9  ;;  %v9132_v53 = vmax.f32 %v6326_v40, 0.0  ;;  %v9135_v40 = vmax.f32 %v6172_v26, 0.0 }
 0x28e   :  { %9125 = vst [vmem:[#allocation51_spill] sm:$0xff] %v7047_v55  ;;  %v4164_v15 = vpack.i.bf16 %v7039_v13, %v7047_v55  ;;  %v4159_v16 = vpack.i.bf16 %v7043_v5, %v7035_v56 }
 0x28f   :  { %v1511_v27 = vsel %vm103_vm1, %v4022_v58, %v8838_v51  ;;  %v1521_v47 = vsel %vm103_vm1, %v9130_v30, %v4022_v58  ;;  %v9134_v51 = vmax.f32 %v6154_v19, 0.0 }
 0x290   :  { %v7085_v54 = vmax.f32 %v9131_v31, %v1521_v47  ;;  %v7089_v8 = vmax.f32 %v9132_v53, %v1511_v27  ;;  %v7091_v34 = vpop.permute.xlu0 %4025  ;;  %v7093_v42 = vpop.permute.xlu1 %4035  ;;  %4165 = vrot.lane.b32.xlu0 %v4164_v15, %s4337_s27  ;;  %4160 = vrot.lane.b32.xlu1 %v4159_v16, %s4337_s27  ;;  %v7105_v27 = vmax.f32 %v9135_v40, %v1543_v24  ;;  %v9136_v47 = vunpack.i.l.bf16 %v6963_v23 }
 0x291   :  { %v7098_v33 = vmax.f32 %v9134_v51, %v1552_v7  ;;  %v8841_v58 = vunpack.i.h.bf16 %v7091_v34  ;;  %v4027_v1 = vunpack.i.l.bf16 %v7091_v34  ;;  %v9137_v7 = vunpack.i.h.bf16 %v6963_v23 }
 0x292   :  { %9133 = vst [vmem:[#allocation52_spill] sm:$0xff] %v7089_v8  ;;  %v1535_v15 = vsel %vm103_vm1, %v3988_v39, %v9136_v47  ;;  %v4169_v19 = vpack.i.bf16 %v7089_v8, %v7085_v54  ;;  %v3998_v16 = vunpack.i.h.bf16 %v6977_v6  ;;  %v9138_v24 = vunpack.i.l.bf16 %v6801_v3 }
 0x293   :  { %v1555_v51 = vsel %vm103_vm1, %v9137_v7, %v3987_v44  ;;  %v1512_v26 = vsel %vm103_vm1, %v4027_v1, %v8841_v58  ;;  %v3997_v53 = vunpack.i.l.bf16 %v6977_v6  ;;  %v8844_v40 = vunpack.i.l.bf16 %v6979_v38 }
 0x294   :  { %v1522_v31 = vsel %vm103_vm1, %v9138_v24, %v4027_v1  ;;  %v9139_v47 = vmax.f32 %v6187_v49, 0.0  ;;  %v9140_v7 = vmax.f32 %v6361_v11, 0.0  ;;  %v7137_v55 = vpop.permute.xlu0 %4030  ;;  %v7139_v58 = vpop.permute.xlu1 %4040  ;;  %4170 = vrot.lane.b32.xlu1 %v4169_v19, %s4337_s27  ;;  %v9142_v6 = vmax.f32 %v6260_v61, 0.0 }
 0x295   :  { %v8843_v10 = vunpack.i.h.bf16 %v7139_v58  ;;  %v4042_v1 = vunpack.i.l.bf16 %v7139_v58  ;;  %v9144_v49 = vmax.f32 %v6253_v41, 0.0  ;;  %v1545_v61 = vsel %vm103_vm1, %v3987_v44, %v3988_v39 }
 0x296   :  { %v7131_v30 = vmax.f32 %v9139_v47, %v1522_v31  ;;  %v7135_v8 = vmax.f32 %v9140_v7, %v1512_v26  ;;  %v7146_v24 = vmax.f32 %v9142_v6, %v1535_v15  ;;  %v9145_v47 = vunpack.i.l.bf16 %v6913_v2 }
 0x297   :  { %v7150_v31 = vmax.f32 %v9144_v49, %v1555_v51  ;;  %v9146_v7 = vunpack.i.h.bf16 %v6915_v18  ;;  %v1513_v41 = vsel %vm103_vm1, %v4042_v1, %v8843_v10  ;;  %v1546_v15 = vsel %vm103_vm1, %v3997_v53, %v3998_v16 }
 0x298   :  { %9141 = vst [vmem:[#allocation53_spill] sm:$0xff] %v7135_v8  ;;  %9143 = vst [vmem:[#allocation54_spill] sm:$0xff] %v7146_v24  ;;  %v4174_v11 = vpack.i.bf16 %v7131_v30, %v7098_v33  ;;  %v4179_v26 = vpack.i.bf16 %v7105_v27, %v7135_v8  ;;  %v1536_v2 = vsel %vm103_vm1, %v3998_v16, %v8844_v40  ;;  %v9147_v6 = vunpack.i.l.bf16 %v6849_v22  ;;  %v7179_v44 = vpop.permute.xlu0 %4050  ;;  %v7181_v49 = vpop.permute.xlu1 %4045 }
 0x299   :  { %v1554_v19 = vsel %vm103_vm1, %v9146_v7, %v9145_v47  ;;  %v9148_v47 = vmax.f32 %v6214_v35, 0.0  ;;  %v9149_v10 = vmax.f32 %v6391_v14, 0.0  ;;  %v8846_v16 = vunpack.i.h.bf16 %v7179_v44 }
 0x29a   :  { %v1523_v39 = vsel %vm103_vm1, %v9147_v6, %v4042_v1  ;;  %4175 = vrot.lane.b32.xlu0 %v4174_v11, %s4337_s27  ;;  %v4052_v40 = vunpack.i.l.bf16 %v7179_v44  ;;  %4180 = vrot.lane.b32.xlu1 %v4179_v26, %s4337_s27  ;;  %v9151_v1 = vmax.f32 %v6219_v25, 0.0  ;;  %v9152_v11 = vmax.f32 %v6245_v20, 0.0 }
 0x29b   :  { %v7186_v7 = vmax.f32 %v9148_v47, %v1523_v39  ;;  %v7190_v51 = vmax.f32 %v9149_v10, %v1513_v41  ;;  %v4008_v35 = vunpack.i.h.bf16 %v7014_v0  ;;  %v4184_v14 = vpack.i.bf16 %v7150_v31, %v7146_v24 }
 0x29c   :  { %v7197_v6 = vmax.f32 %v9151_v1, %v1554_v19  ;;  %v7201_v8 = vmax.f32 %v9152_v11, %v1545_v61  ;;  %v4007_v10 = vunpack.i.l.bf16 %v7014_v0  ;;  %v1514_v26 = vsel %vm103_vm1, %v4052_v40, %v8846_v16 }
 0x29d   :  { %9150 = vst [vmem:[#allocation55_spill] sm:$0xff] %v7190_v51  ;;  %v9153_v25 = vunpack.i.l.bf16 %v6915_v18  ;;  %v4189_v20 = vpack.i.bf16 %v7190_v51, %v7186_v7  ;;  %v9154_v61 = vmax.f32 %v6275_v63, 0.0  ;;  %v9156_v39 = vmax.f32 %v6290_v21, 0.0 }
 0x29e   :  { %v9158_v47 = vmax.f32 %v6240_v48, 0.0  ;;  %v9159_v11 = vmax.f32 %v6414_v60, 0.0  ;;  %v9161_v63 = vunpack.i.h.bf16 %v6979_v38  ;;  %4185 = vrot.lane.b32.xlu1 %v4184_v14, %s4337_s27  ;;  %v2051_v14 = vld [vmem:[%s8618_s3 + $0x288] sm:$0xff]  ;;  %v9173_v51 = vunpack.i.h.bf16 %v7049_v52 }
 0x29f   :  { %v1524_v19 = vsel %vm103_vm1, %v9153_v25, %v4052_v40  ;;  %v7219_v41 = vmax.f32 %v9154_v61, %v1546_v15  ;;  %v7223_v0 = vmax.f32 %v9156_v39, %v1536_v2  ;;  %v7233_v40 = vpop.permute.xlu0 %4055  ;;  %v7235_v25 = vpop.permute.xlu1 %4060  ;;  %4190 = vrot.lane.b32.xlu0 %v4189_v20, %s4337_s27  ;;  %v2050_v20 = vld [vmem:[%s8618_s3 + $0x280] sm:$0xff]  ;;  %v9162_v61 = vmax.f32 %v6283_v32, 0.0 }
 0x2a0   :  { %v7227_v1 = vmax.f32 %v9158_v47, %v1524_v19  ;;  %v7231_v16 = vmax.f32 %v9159_v11, %v1514_v26  ;;  %v1556_v15 = vsel %vm103_vm1, %v9161_v63, %v3997_v53  ;;  %v8847_v21 = vunpack.i.h.bf16 %v7235_v25  ;;  %v2082_v32 = vld [vmem:[%s8618_s3 + $0x380] sm:$0xff] }
 0x2a1   :  { %9155 = vst [vmem:[#allocation56_spill] sm:$0xff] %v7219_v41  ;;  %9157 = vst [vmem:[#allocation57_spill] sm:$0xff] %v7223_v0  ;;  %v4062_v60 = vunpack.i.l.bf16 %v7235_v25  ;;  %v1547_v19 = vsel %vm103_vm1, %v4007_v10, %v4008_v35  ;;  %v7261_v39 = vmax.f32 %v9162_v61, %v1556_v15  ;;  %v9164_v11 = vunpack.i.l.bf16 %v6963_v23 }
 0x2a2   :  { %9160 = vst [vmem:[#allocation58_spill] sm:$0xff] %v7231_v16  ;;  %v4204_v2 = vpack.i.bf16 %v7201_v8, %v7231_v16  ;;  %v4194_v26 = vpack.i.bf16 %v7227_v1, %v7197_v6  ;;  %v4199_v48 = vpack.i.bf16 %v7223_v0, %v7219_v41  ;;  %v9165_v15 = vmax.f32 %v6269_v17, 0.0  ;;  %v9169_v0 = vld [vmem:[#allocation17_spill] sm:$0xff] }
 0x2a3   :  { %9163 = vst [vmem:[#allocation59_spill] sm:$0xff] %v7261_v39  ;;  %v1515_v47 = vsel %vm103_vm1, %v4062_v60, %v8847_v21  ;;  %v1525_v63 = vsel %vm103_vm1, %v9164_v11, %v4062_v60  ;;  %v7271_v53 = vpop.permute.xlu0 %4065  ;;  %v9167_v21 = vmax.f32 %v6447_v29, 0.0  ;;  %v2083_v11 = vld [vmem:[%s8618_s3 + $0x388] sm:$0xff]  ;;  %v9170_v17 = vmax.f32 %v9169_v0, 0.0 }
 0x2a4   :  { %v7280_v61 = vmax.f32 %v9165_v15, %v1525_v63  ;;  %v4067_v60 = vunpack.i.l.bf16 %v7271_v53  ;;  %4205 = vrot.lane.b32.xlu0 %v4204_v2, %s4337_s27  ;;  %4195 = vrot.lane.b32.xlu1 %v4194_v26, %s4337_s27  ;;  %v9172_v29 = vunpack.i.l.bf16 %v7049_v52  ;;  %v3430_v15 = vpack.c.bf16 %v2083_v11, %v2082_v32  ;;  %v9176_v32 = vld [vmem:[#allocation15_spill] sm:$0xff] }
 0x2a5   :  { %v7284_v16 = vmax.f32 %v9167_v21, %v1515_v47  ;;  %v7295_v63 = vmax.f32 %v9170_v17, %v1547_v19  ;;  %v3398_v47 = vpack.c.bf16 %v2051_v14, %v2050_v20  ;;  %v1557_v2 = vsel %vm103_vm1, %v9173_v51, %v4007_v10 }
 0x2a6   :  { %9166 = vst [vmem:[#allocation60_spill] sm:$0xff] %v7280_v61  ;;  %v1537_v21 = vsel %vm103_vm1, %v4008_v35, %v9172_v29  ;;  %v9174_v26 = vunpack.i.h.bf16 %v7271_v53  ;;  %v9175_v0 = vunpack.i.l.bf16 %v6979_v38  ;;  %v4033_v20 = vunpack.i.h.bf16 %v7137_v55  ;;  %3431 = vmatprep.subr.bf16.mxu1 %v3430_v15 }
 0x2a7   :  { %9168 = vst [vmem:[#allocation61_spill] sm:$0xff] %v7284_v16  ;;  %9171 = vst [vmem:[#allocation17_spill] sm:$0xff] %v7295_v63  ;;  %v4209_v35 = vpack.i.bf16 %v7284_v16, %v7280_v61  ;;  %v4032_v14 = vunpack.i.l.bf16 %v7137_v55  ;;  %v9177_v11 = vmax.f32 %v9176_v32, 0.0  ;;  %v9179_v10 = vmax.f32 %v6471_v36, 0.0  ;;  %3399 = vmatprep.subr.bf16.mxu0 %v3398_v47  ;;  %v9184_v36 = vld [vmem:[#allocation18_spill] sm:$0xff]  ;;  %v9228_v61 = vld [vmem:[#allocation3_spill] sm:$0xff] }
 0x2a8   :  { %v1516_v24 = vsel %vm103_vm1, %v4067_v60, %v9174_v26  ;;  %v1526_v19 = vsel %vm103_vm1, %v9175_v0, %v4067_v60  ;;  %4200 = vrot.lane.b32.xlu1 %v4199_v48, %s4337_s27  ;;  %v4037_v60 = vunpack.i.l.bf16 %v7093_v42  ;;  %v9181_v26 = vld [vmem:[#allocation19_spill] sm:$0xff] }
 0x2a9   :  { %v7319_v51 = vmax.f32 %v9177_v11, %v1526_v19  ;;  %v7323_v17 = vmax.f32 %v9179_v10, %v1516_v24  ;;  %4210 = vrot.lane.b32.xlu0 %v4209_v35, %s4337_s27  ;;  %v9182_v0 = vmax.f32 %v9181_v26, 0.0  ;;  %v9185_v24 = vmax.f32 %v9184_v36, 0.0  ;;  %v9187_v35 = vld [vmem:[#allocation7_spill] sm:$0xff] }
 0x2aa   :  { %v1538_v15 = vsel %vm103_vm1, %v4033_v20, %v4037_v60  ;;  %v1548_v48 = vsel %vm103_vm1, %v4032_v14, %v4033_v20  ;;  %v9188_v32 = vmax.f32 %v9187_v35, 0.0  ;;  %v4048_v36 = vunpack.i.h.bf16 %v7181_v49 }
 0x2ab   :  { %9178 = vst [vmem:[#allocation15_spill] sm:$0xff] %v7319_v51  ;;  %9180 = vst [vmem:[#allocation62_spill] sm:$0xff] %v7323_v17  ;;  %v4214_v29 = vpack.i.bf16 %v7319_v51, %v7261_v39  ;;  %v4229_v55 = vpack.i.bf16 %v7295_v63, %v7323_v17  ;;  %v7334_v19 = vmax.f32 %v9182_v0, %v1557_v2  ;;  %v9190_v2 = vld [vmem:[#allocation6_spill] sm:$0xff]  ;;  %v4047_v20 = vunpack.i.l.bf16 %v7181_v49  ;;  %v9205_v39 = vld [vmem:[#allocation4_spill] sm:$0xff] }
 0x2ac   :  { %v7338_v47 = vmax.f32 %v9185_v24, %v1537_v21  ;;  %v7348_v11 = vmax.f32 %v9188_v32, %v1548_v48  ;;  %v9191_v10 = vmax.f32 %v9190_v2, 0.0  ;;  %v4071_v0 = vpop.permute.xlu0 %4070  ;;  %v9193_v32 = vld [vmem:[#allocation23_spill] sm:$0xff] }
 0x2ad   :  { %9183 = vst [vmem:[#allocation19_spill] sm:$0xff] %v7334_v19  ;;  %4215 = vrot.lane.b32.xlu0 %v4214_v29, %s4337_s27  ;;  %4230 = vrot.lane.b32.xlu1 %v4229_v55, %s4337_s27  ;;  %v9194_v2 = vmax.f32 %v9193_v32, 0.0  ;;  %v4073_v63 = vunpack.i.h.bf16 %v4071_v0 }
 0x2ae   :  { %9186 = vst [vmem:[#allocation18_spill] sm:$0xff] %v7338_v47  ;;  %9189 = vst [vmem:[#allocation7_spill] sm:$0xff] %v7348_v11  ;;  %v7352_v26 = vmax.f32 %v9191_v10, %v1538_v15  ;;  %v4219_v21 = vpack.i.bf16 %v7334_v19, %v7338_v47  ;;  %v1549_v15 = vsel %vm103_vm1, %v4047_v20, %v4048_v36 }
 0x2af   :  { %v7376_v10 = vmax.f32 %v9194_v2, %v1549_v15  ;;  %v9198_v2 = vunpack.i.l.bf16 %v7049_v52 }
 0x2b0   :  { %9192 = vst [vmem:[#allocation6_spill] sm:$0xff] %v7352_v26  ;;  %v4224_v29 = vpack.i.bf16 %v7352_v26, %v7348_v11  ;;  %v7361_v55 = vpop.permute.xlu0 %4085  ;;  %v7363_v24 = vpop.permute.xlu1 %4075 }
 0x2b1   :  { %4220 = vrot.lane.b32.xlu0 %v4219_v21, %s4337_s27  ;;  %v8857_v48 = vunpack.i.h.bf16 %v7361_v55  ;;  %v4087_v35 = vunpack.i.l.bf16 %v7361_v55  ;;  %9195 = vst [vmem:[#allocation23_spill] sm:$0xff] %v7376_v10  ;;  %v9196_v21 = vmax.f32 %v6500_v4, 0.0 }
 0x2b3   :  { %v1518_v49 = vsel %vm103_vm1, %v4087_v35, %v8857_v48  ;;  %v1528_v32 = vsel %vm103_vm1, %v4037_v60, %v4087_v35  ;;  %v9199_v48 = vmax.f32 %v6511_v37, 0.0  ;;  %v4072_v60 = vunpack.i.l.bf16 %v4071_v0 }
 0x2b4   :  { %v7380_v17 = vmax.f32 %v9196_v21, %v1518_v49  ;;  %v7382_v16 = vpop.permute.xlu1 %4080  ;;  %v4057_v49 = vunpack.i.l.bf16 %v7233_v40  ;;  %v4077_v35 = vunpack.i.l.bf16 %v7363_v24  ;;  %v4091_v51 = vpop.permute.xlu0 %4090 }
 0x2b5   :  { %4225 = vrot.lane.b32.xlu0 %v4224_v29, %s4337_s27  ;;  %v8859_v26 = vunpack.i.h.bf16 %v7382_v16  ;;  %v4082_v47 = vunpack.i.l.bf16 %v7382_v16 }
 0x2b6   :  { %9197 = vst [vmem:[#allocation63_spill] sm:$0xff] %v7380_v17  ;;  %v4254_v29 = vpack.i.bf16 %v7376_v10, %v7380_v17  ;;  %v9201_v17 = vld [vmem:[#allocation2_spill] sm:$0xff] }
 0x2b7   :  { %v1517_v4 = vsel %vm103_vm1, %v4082_v47, %v8859_v26  ;;  %v1527_v21 = vsel %vm103_vm1, %v9198_v2, %v4082_v47  ;;  %v9202_v26 = vmax.f32 %v9201_v17, 0.0  ;;  %v9206_v47 = vmax.f32 %v9205_v39, 0.0  ;;  %v9209_v39 = vld [vmem:[#allocation5_spill] sm:$0xff] }
 0x2b8   :  { %v7394_v15 = vpop.permute.xlu1 %4095  ;;  %v7406_v11 = vmax.f32 %v9199_v48, %v1517_v4  ;;  %v9208_v48 = vunpack.i.h.bf16 %v7233_v40 }
 0x2b9   :  { %4255 = vrot.lane.b32.xlu0 %v4254_v29, %s4337_s27  ;;  %v7410_v10 = vmax.f32 %v9202_v26, %v1527_v21  ;;  %v9204_v29 = vunpack.i.h.bf16 %v7093_v42  ;;  %v7419_v2 = vmax.f32 %v9206_v47, %v1528_v32  ;;  %v1539_v26 = vsel %vm103_vm1, %v4048_v36, %v4057_v49 }
 0x2ba   :  { %9200 = vst [vmem:[#allocation64_spill] sm:$0xff] %v7406_v11  ;;  %v9210_v32 = vmax.f32 %v9209_v39, 0.0  ;;  %v4092_v47 = vunpack.i.l.bf16 %v4091_v51  ;;  %v1490_v36 = vsel %vm103_vm1, %v4072_v60, %v4073_v63  ;;  %v9215_v39 = vld [vmem:[#allocation11_spill] sm:$0xff] }
 0x2bb   :  { %9203 = vst [vmem:[#allocation2_spill] sm:$0xff] %v7410_v10  ;;  %v1558_v19 = vsel %vm103_vm1, %v9204_v29, %v4032_v14  ;;  %9207 = vst [vmem:[#allocation4_spill] sm:$0xff] %v7419_v2  ;;  %v4234_v17 = vpack.i.bf16 %v7406_v11, %v7410_v10  ;;  %v1559_v14 = vsel %vm103_vm1, %v9208_v48, %v4047_v20  ;;  %v4093_v29 = vunpack.i.h.bf16 %v4091_v51  ;;  %v9217_v10 = vld [vmem:[#allocation22_spill] sm:$0xff] }
 0x2bc   :  { %v7421_v37 = vpop.permute.xlu1 %4105  ;;  %v7435_v21 = vmax.f32 %v9210_v32, %v1558_v19  ;;  %v9212_v11 = vunpack.i.h.bf16 %v7012_v28  ;;  %v9213_v48 = vunpack.i.h.bf16 %v7051_v9  ;;  %v9218_v41 = vmax.f32 %v9217_v10, 0.0 }
 0x2bd   :  { %v4107_v4 = vunpack.i.l.bf16 %v7421_v37  ;;  %4235 = vrot.lane.b32.xlu1 %v4234_v17, %s4337_s27  ;;  %v9214_v19 = vunpack.i.h.bf16 %v7421_v37  ;;  %v9216_v17 = vmax.f32 %v9215_v39, 0.0  ;;  %v9220_v39 = vld [vmem:[#allocation9_spill] sm:$0xff] }
 0x2be   :  { %9211 = vst [vmem:[#allocation5_spill] sm:$0xff] %v7435_v21  ;;  %v1500_v20 = vsel %vm103_vm1, %v9212_v11, %v4072_v60  ;;  %v1501_v0 = vsel %vm103_vm1, %v9213_v48, %v4077_v35  ;;  %v7458_v28 = vmax.f32 %v9218_v41, %v1539_v26  ;;  %v4239_v9 = vpack.i.bf16 %v7419_v2, %v7435_v21  ;;  %v9224_v26 = vld [vmem:[#allocation16_spill] sm:$0xff]  ;;  %v9226_v2 = vld [vmem:[#allocation13_spill] sm:$0xff] }
 0x2bf   :  { %v1519_v51 = vsel %vm103_vm1, %v4107_v4, %v9214_v19  ;;  %v7454_v32 = vmax.f32 %v9216_v17, %v1559_v14  ;;  %v1529_v11 = vsel %vm103_vm1, %v4057_v49, %v4107_v4  ;;  %v9219_v60 = vunpack.i.h.bf16 %v6699_v12 }
 0x2c0   :  { %v4078_v19 = vunpack.i.h.bf16 %v7363_v24  ;;  %v9221_v14 = vmax.f32 %v9220_v39, 0.0  ;;  %v9222_v41 = vmax.f32 %v6559_v45, 0.0  ;;  %v9225_v49 = vmax.f32 %v9224_v26, 0.0  ;;  %v9234_v39 = vld [vmem:[#allocation20_spill] sm:$0xff] }
 0x2c1   :  { %v1560_v48 = vsel %vm103_vm1, %v4073_v63, %v9219_v60  ;;  %v9227_v21 = vmax.f32 %v9226_v2, 0.0  ;;  %v9229_v63 = vmax.f32 %v9228_v61, 0.0  ;;  %v1492_v24 = vsel %vm103_vm1, %v4092_v47, %v4093_v29  ;;  %4240 = vrot.lane.b32.xlu1 %v4239_v9, %s4337_s27 }
 0x2c2   :  { %v7471_v17 = vmax.f32 %v9221_v14, %v1529_v11  ;;  %v7475_v10 = vmax.f32 %v9222_v41, %v1519_v51  ;;  %v7479_v4 = vmax.f32 %v9225_v49, %v1500_v20  ;;  %v9231_v45 = vunpack.i.h.bf16 %v7091_v34  ;;  %v4101_v11 = vpop.permute.xlu0 %4100 }
 0x2c3   :  { %v7483_v12 = vmax.f32 %v9227_v21, %v1490_v36  ;;  %v7487_v60 = vmax.f32 %v9229_v63, %v1501_v0  ;;  %v4098_v20 = vunpack.i.h.bf16 %v7394_v15  ;;  %v4097_v2 = vunpack.i.l.bf16 %v7394_v15  ;;  %v4111_v21 = vpop.permute.xlu1 %4110 }
 0x2c4   :  { %9223 = vst [vmem:[#allocation11_spill] sm:$0xff] %v7475_v10  ;;  %v1502_v51 = vsel %vm103_vm1, %v9231_v45, %v4092_v47  ;;  %v4259_v61 = vpack.i.bf16 %v7475_v10, %v7471_v17  ;;  %v9232_v0 = vmax.f32 %v6506_v50, 0.0  ;;  %v4244_v9 = vpack.i.bf16 %v7454_v32, %v7458_v28  ;;  %v9241_v45 = vld [vmem:[#allocation26_spill] sm:$0xff] }
 0x2c5   :  { %9230 = vst [vmem:[#allocation22_spill] sm:$0xff] %v7487_v60  ;;  %v9233_v34 = vunpack.i.h.bf16 %v6745_v59  ;;  %v1491_v15 = vsel %vm103_vm1, %v4077_v35, %v4078_v19  ;;  %v9235_v14 = vmax.f32 %v9234_v39, 0.0  ;;  %v9237_v50 = vmax.f32 %v6534_v43, 0.0 }
 0x2c6   :  { %v7502_v36 = vmax.f32 %v9232_v0, %v1560_v48  ;;  %4260 = vrot.lane.b32.xlu0 %v4259_v61, %s4337_s27  ;;  %4245 = vrot.lane.b32.xlu1 %v4244_v9, %s4337_s27  ;;  %v4249_v26 = vpack.i.bf16 %v7483_v12, %v7479_v4  ;;  %v9239_v35 = vunpack.i.h.bf16 %v6849_v22  ;;  %v9240_v49 = vunpack.i.h.bf16 %v7139_v58  ;;  %v9244_v0 = vld [vmem:[#allocation25_spill] sm:$0xff] }
 0x2c7   :  { %v1561_v47 = vsel %vm103_vm1, %v4078_v19, %v9233_v34  ;;  %v7515_v41 = vmax.f32 %v9235_v14, %v1502_v51  ;;  %v7519_v48 = vmax.f32 %v9237_v50, %v1492_v24  ;;  %v4103_v63 = vunpack.i.h.bf16 %v4101_v11  ;;  %v4116_v14 = vpop.permute.xlu1 %4115  ;;  %v9248_v50 = vld [vmem:[#allocation30_spill] sm:$0xff] }
 0x2c8   :  { %v4264_v59 = vpack.i.bf16 %v7487_v60, %v7502_v36  ;;  %v1563_v19 = vsel %vm103_vm1, %v4098_v20, %v9239_v35  ;;  %v1503_v43 = vsel %vm103_vm1, %v9240_v49, %v4097_v2  ;;  %v4102_v24 = vunpack.i.l.bf16 %v4101_v11  ;;  %v9251_v49 = vld [vmem:[#allocation21_spill] sm:$0xff] }
 0x2c9   :  { %9236 = vst [vmem:[#allocation9_spill] sm:$0xff] %v7515_v41  ;;  %9238 = vst [vmem:[#allocation16_spill] sm:$0xff] %v7519_v48  ;;  %v9242_v51 = vmax.f32 %v9241_v45, 0.0  ;;  %v9245_v9 = vmax.f32 %v9244_v0, 0.0  ;;  %v1493_v22 = vsel %vm103_vm1, %v4097_v2, %v4098_v20  ;;  %v4112_v39 = vunpack.i.l.bf16 %v4111_v21  ;;  %v9254_v2 = vld [vmem:[#allocation28_spill] sm:$0xff] }
 0x2ca   :  { %4265 = vrot.lane.b32.xlu0 %v4264_v59, %s4337_s27  ;;  %v9247_v58 = vunpack.i.h.bf16 %v6801_v3  ;;  %v9249_v35 = vmax.f32 %v9248_v50, 0.0  ;;  %v9252_v45 = vmax.f32 %v9251_v49, 0.0  ;;  %4250 = vrot.lane.b32.xlu1 %v4249_v26, %s4337_s27  ;;  %v4274_v20 = vpack.i.bf16 %v7519_v48, %v7515_v41  ;;  %v4121_v50 = vpop.permute.xlu0 %4120 }
 0x2cb   :  { %v7536_v61 = vmax.f32 %v9242_v51, %v1561_v47  ;;  %v7540_v34 = vmax.f32 %v9245_v9, %v1491_v15  ;;  %v9255_v59 = vmax.f32 %v9254_v2, 0.0  ;;  %v1494_v3 = vsel %vm103_vm1, %v4102_v24, %v4103_v63 }
 0x2cc   :  { %v1562_v11 = vsel %vm103_vm1, %v4093_v29, %v9247_v58  ;;  %v7551_v47 = vmax.f32 %v9249_v35, %v1563_v19  ;;  %v7555_v15 = vmax.f32 %v9252_v45, %v1503_v43  ;;  %v9257_v29 = vunpack.i.h.bf16 %v7179_v44  ;;  %v9259_v35 = vld [vmem:[#allocation27_spill] sm:$0xff] }
 0x2cd   :  { %9243 = vst [vmem:[#allocation13_spill] sm:$0xff] %v7536_v61  ;;  %9246 = vst [vmem:[#allocation3_spill] sm:$0xff] %v7540_v34  ;;  %v7562_v51 = vmax.f32 %v9255_v59, %v1493_v22  ;;  %v4113_v0 = vunpack.i.h.bf16 %v4111_v21  ;;  %v9258_v43 = vunpack.i.h.bf16 %v7235_v25  ;;  %v4118_v9 = vunpack.i.h.bf16 %v4116_v14  ;;  %v9263_v21 = vld [vmem:[#allocation8_spill] sm:$0xff] }
 0x2ce   :  { %9250 = vst [vmem:[#allocation20_spill] sm:$0xff] %v7551_v47  ;;  %9253 = vst [vmem:[#allocation26_spill] sm:$0xff] %v7555_v15  ;;  %v1504_v19 = vsel %vm103_vm1, %v9257_v29, %v4102_v24  ;;  %v4117_v58 = vunpack.i.l.bf16 %v4116_v14  ;;  %v4269_v22 = vpack.i.bf16 %v7536_v61, %v7540_v34  ;;  %v9260_v49 = vmax.f32 %v9259_v35, 0.0  ;;  %4275 = vrot.lane.b32.xlu0 %v4274_v20, %s4337_s27  ;;  %v9266_v14 = vld [vmem:[#allocation31_spill] sm:$0xff] }
 0x2cf   :  { %9256 = vst [vmem:[#allocation25_spill] sm:$0xff] %v7562_v51  ;;  %v1505_v26 = vsel %vm103_vm1, %v9258_v43, %v4112_v39  ;;  %v9262_v44 = vunpack.i.h.bf16 %v6915_v18  ;;  %v9264_v24 = vmax.f32 %v9263_v21, 0.0  ;;  %v9267_v59 = vmax.f32 %v9266_v14, 0.0  ;;  %v9270_v43 = vld [vmem:[#allocation10_spill] sm:$0xff]  ;;  %v9274_v21 = vld [vmem:[#allocation32_spill] sm:$0xff] }
 0x2d0   :  { %v7578_v45 = vmax.f32 %v9260_v49, %v1562_v11  ;;  %4270 = vrot.lane.b32.xlu1 %v4269_v22, %s4337_s27  ;;  %v9269_v11 = vunpack.i.h.bf16 %v6963_v23  ;;  %v9271_v18 = vmax.f32 %v9270_v43, 0.0  ;;  %v9273_v22 = vunpack.i.h.bf16 %v7271_v53  ;;  %v9277_v43 = vld [vmem:[#allocation34_spill] sm:$0xff] }
 0x2d1   :  { %v1564_v25 = vsel %vm103_vm1, %v4103_v63, %v9262_v44  ;;  %v7587_v2 = vmax.f32 %v9264_v24, %v1504_v19  ;;  %v7591_v29 = vmax.f32 %v9267_v59, %v1494_v3  ;;  %v4284_v63 = vpack.i.bf16 %v7551_v47, %v7562_v51  ;;  %v4131_v59 = vpop.permute.xlu1 %4130  ;;  %v7886_v51 = vld [vmem:[%s8618_s3 + $0x328] sm:$0xff] }
 0x2d2   :  { %9261 = vst [vmem:[#allocation30_spill] sm:$0xff] %v7578_v45  ;;  %v1565_v20 = vsel %vm103_vm1, %v4113_v0, %v9269_v11  ;;  %v7600_v35 = vmax.f32 %v9271_v18, %v1505_v26  ;;  %v4279_v19 = vpack.i.bf16 %v7555_v15, %v7578_v45  ;;  %v1496_v3 = vsel %vm103_vm1, %v4117_v58, %v4118_v9  ;;  %v4126_v11 = vpop.permute.xlu0 %4125 }
 0x2d3   :  { %9265 = vst [vmem:[#allocation21_spill] sm:$0xff] %v7587_v2  ;;  %9268 = vst [vmem:[#allocation28_spill] sm:$0xff] %v7591_v29  ;;  %v1506_v23 = vsel %vm103_vm1, %v9273_v22, %v4117_v58  ;;  %v4123_v49 = vunpack.i.h.bf16 %v4121_v50  ;;  %v4122_v44 = vunpack.i.l.bf16 %v4121_v50  ;;  %v9275_v24 = vmax.f32 %v9274_v21, 0.0  ;;  %4285 = vrot.lane.b32.xlu0 %v4284_v63, %s4337_s27  ;;  %v9280_v50 = vld [vmem:[#allocation12_spill] sm:$0xff]  ;;  %v9283_v21 = vld [vmem:[#allocation35_spill] sm:$0xff] }
 0x2d4   :  { %9272 = vst [vmem:[#allocation27_spill] sm:$0xff] %v7600_v35  ;;  %v1495_v14 = vsel %vm103_vm1, %v4112_v39, %v4113_v0  ;;  %4280 = vrot.lane.b32.xlu1 %v4279_v19, %s4337_s27  ;;  %v4289_v53 = vpack.i.bf16 %v7591_v29, %v7587_v2  ;;  %v9278_v58 = vmax.f32 %v9277_v43, 0.0  ;;  %v9281_v22 = vmax.f32 %v9280_v50, 0.0  ;;  %v9286_v63 = vld [vmem:[#allocation33_spill] sm:$0xff] }
 0x2d5   :  { %v7614_v26 = vmax.f32 %v9275_v24, %v1564_v25  ;;  %v9284_v24 = vmax.f32 %v9283_v21, 0.0  ;;  %v9287_v19 = vmax.f32 %v9286_v63, 0.0  ;;  %v1497_v43 = vsel %vm103_vm1, %v4122_v44, %v4123_v49 }
 0x2d6   :  { %v7624_v18 = vmax.f32 %v9278_v58, %v1565_v20  ;;  %v7628_v25 = vmax.f32 %v9281_v22, %v1506_v23  ;;  %v9289_v20 = vunpack.i.h.bf16 %v7049_v52  ;;  %v4132_v58 = vunpack.i.l.bf16 %v4131_v59 }
 0x2d7   :  { %9276 = vst [vmem:[#allocation8_spill] sm:$0xff] %v7614_v26  ;;  %v7632_v39 = vmax.f32 %v9284_v24, %v1496_v3  ;;  %v4294_v0 = vpack.i.bf16 %v7600_v35, %v7614_v26  ;;  %v7638_v10 = vmax.f32 %v9287_v19, %v1495_v14  ;;  %v9290_v50 = vunpack.i.h.bf16 %v7382_v16  ;;  %v9292_v24 = vld [vmem:[#allocation37_spill] sm:$0xff]  ;;  %v9295_v19 = vld [vmem:[#allocation38_spill] sm:$0xff] }
 0x2d8   :  { %9279 = vst [vmem:[#allocation31_spill] sm:$0xff] %v7624_v18  ;;  %9282 = vst [vmem:[#allocation10_spill] sm:$0xff] %v7628_v25  ;;  %v1567_v23 = vsel %vm103_vm1, %v4123_v49, %v9289_v20  ;;  %v4128_v22 = vunpack.i.h.bf16 %v4126_v11  ;;  %v4127_v21 = vunpack.i.l.bf16 %v4126_v11  ;;  %4290 = vrot.lane.b32.xlu1 %v4289_v53, %s4337_s27  ;;  %v9291_v14 = vunpack.i.h.bf16 %v6979_v38  ;;  %v9298_v11 = vld [vmem:[#allocation24_spill] sm:$0xff] }
 0x2d9   :  { %9285 = vst [vmem:[#allocation32_spill] sm:$0xff] %v7632_v39  ;;  %9288 = vst [vmem:[#allocation34_spill] sm:$0xff] %v7638_v10  ;;  %v1507_v3 = vsel %vm103_vm1, %v9290_v50, %v4122_v44  ;;  %4295 = vrot.lane.b32.xlu0 %v4294_v0, %s4337_s27  ;;  %v9293_v63 = vmax.f32 %v9292_v24, 0.0  ;;  %v9296_v16 = vmax.f32 %v9295_v19, 0.0  ;;  %v4304_v44 = vpack.i.bf16 %v7632_v39, %v7628_v25 }
 0x2da   :  { %v1566_v52 = vsel %vm103_vm1, %v4118_v9, %v9291_v14  ;;  %v9299_v0 = vmax.f32 %v9298_v11, 0.0  ;;  %v9301_v38 = vunpack.i.h.bf16 %v7421_v37  ;;  %v4299_v53 = vpack.i.bf16 %v7624_v18, %v7638_v10 }
 0x2db   :  { %v7658_v49 = vmax.f32 %v9293_v63, %v1497_v43  ;;  %v7662_v20 = vmax.f32 %v9296_v16, %v1567_v23  ;;  %v1498_v43 = vsel %vm103_vm1, %v4127_v21, %v4128_v22  ;;  %v9302_v23 = vunpack.i.h.bf16 %v7361_v55  ;;  %v9307_v16 = vld [vmem:[#allocation29_spill] sm:$0xff] }
 0x2dc   :  { %v7668_v50 = vmax.f32 %v9299_v0, %v1507_v3  ;;  %v1509_v9 = vsel %vm103_vm1, %v9301_v38, %v4132_v58  ;;  %v9303_v3 = vld [vmem:[#allocation36_spill] sm:$0xff]  ;;  %v9306_v37 = vunpack.i.h.bf16 %v7093_v42  ;;  %4300 = vrot.lane.b32.xlu1 %v4299_v53, %s4337_s27  ;;  %v9308_v11 = vmax.f32 %v9307_v16, 0.0 }
 0x2dd   :  { %9294 = vst [vmem:[#allocation12_spill] sm:$0xff] %v7658_v49  ;;  %9297 = vst [vmem:[#allocation35_spill] sm:$0xff] %v7662_v20  ;;  %v1508_v14 = vsel %vm103_vm1, %v9302_v23, %v4127_v21  ;;  %4305 = vrot.lane.b32.xlu0 %v4304_v44, %s4337_s27  ;;  %v9304_v24 = vmax.f32 %v9303_v3, 0.0  ;;  %v4314_v55 = vpack.i.bf16 %v7662_v20, %v7658_v49  ;;  %v9310_v21 = vld [vmem:[#allocation14_spill] sm:$0xff]  ;;  %v4133_v42 = vunpack.i.h.bf16 %v4131_v59  ;;  %v9316_v53 = vld [vmem:[#allocation40_spill] sm:$0xff] }
 0x2de   :  { %9300 = vst [vmem:[#allocation33_spill] sm:$0xff] %v7668_v50  ;;  %v1568_v19 = vsel %vm103_vm1, %v4128_v22, %v9306_v37  ;;  %v7694_v0 = vmax.f32 %v9308_v11, %v1509_v9  ;;  %v9311_v44 = vmax.f32 %v9310_v21, 0.0  ;;  %v9323_v21 = vld [vmem:[#allocation41_spill] sm:$0xff] }
 0x2df   :  { %v7685_v63 = vmax.f32 %v9304_v24, %v1566_v52  ;;  %v9313_v52 = vld [vmem:[#allocation39_spill] sm:$0xff]  ;;  %v9317_v24 = vmax.f32 %v9316_v53, 0.0  ;;  %v1499_v16 = vsel %vm103_vm1, %v4132_v58, %v4133_v42 }
 0x2e0   :  { %9309 = vst [vmem:[#allocation38_spill] sm:$0xff] %v7694_v0  ;;  %v7700_v38 = vmax.f32 %v9311_v44, %v1508_v14  ;;  %v9314_v23 = vmax.f32 %v9313_v52, 0.0  ;;  %v9319_v14 = vunpack.i.h.bf16 %v7233_v40  ;;  %v9324_v44 = vmax.f32 %v9323_v21, 0.0 }
 0x2e1   :  { %9305 = vst [vmem:[#allocation37_spill] sm:$0xff] %v7685_v63  ;;  %v4309_v22 = vpack.i.bf16 %v7668_v50, %v7685_v63  ;;  %v7710_v37 = vmax.f32 %v9317_v24, %v1568_v19  ;;  %4315 = vrot.lane.b32.xlu0 %v4314_v55, %s4337_s27  ;;  %v9320_v19 = vld [vmem:[#allocation42_spill] sm:$0xff]  ;;  %v7850_v50 = vld [vmem:[%s8618_s3 + $0x228] sm:$0xff] }
 0x2e2   :  { %9312 = vst [vmem:[#allocation24_spill] sm:$0xff] %v7700_v38  ;;  %v7704_v3 = vmax.f32 %v9314_v23, %v1498_v43  ;;  %v1569_v43 = vsel %vm103_vm1, %v4133_v42, %v9319_v14  ;;  %v9321_v11 = vmax.f32 %v9320_v19, 0.0  ;;  %v7732_v40 = vmax.f32 %v9324_v44, %v1499_v16  ;;  %v7748_v14 = vld [vmem:[%s8618_s3 + $0x200] sm:$0xff]  ;;  %v7765_v19 = vld [vmem:[%s8618_s3 + $0x308] sm:$0xff]  ;;  %v7777_v44 = vld [vmem:[%s8618_s3 + $0x298] sm:$0xff] }
 0x2e3   :  { %9318 = vst [vmem:[#allocation29_spill] sm:$0xff] %v7710_v37  ;;  %4310 = vrot.lane.b32.xlu1 %v4309_v22, %s4337_s27  ;;  %v4324_v9 = vpack.i.bf16 %v7694_v0, %v7710_v37  ;;  %v9326_v22 = vld [vmem:[#allocation43_spill] sm:$0xff]  ;;  %v7760_v16 = vld [vmem:[%s8618_s3 + $0x300] sm:$0xff]  ;;  %v7807_v0 = vld [vmem:[%s8618_s3 + $0x318] sm:$0xff] }
 0x2e4   :  { %9315 = vst [vmem:[#allocation36_spill] sm:$0xff] %v7704_v3  ;;  %v4319_v59 = vpack.i.bf16 %v7704_v3, %v7700_v38  ;;  %v7728_v55 = vmax.f32 %v9321_v11, %v1569_v43  ;;  %9325 = vst [vmem:[#allocation39_spill] sm:$0xff] %v7732_v40  ;;  %v7753_v43 = vld [vmem:[%s8618_s3 + $0x208] sm:$0xff]  ;;  %v7770_v11 = vld [vmem:[%s8618_s3 + $0x290] sm:$0xff]  ;;  %v3432_v49 = vpack.c.bf16 %v7765_v19, %v7760_v16 }
 0x2e5   :  { %4325 = vrot.lane.b32.xlu0 %v4324_v9, %s4337_s27  ;;  %v7817_v3 = vld [vmem:[%s8618_s3 + $0x2a8] sm:$0xff]  ;;  %v3400_v38 = vpack.c.bf16 %v7753_v43, %v7748_v14  ;;  %v3402_v20 = vpack.c.bf16 %v7777_v44, %v7770_v11  ;;  %v7845_v44 = vld [vmem:[%s8618_s3 + $0x220] sm:$0xff] }
 0x2e6   :  { %9322 = vst [vmem:[#allocation14_spill] sm:$0xff] %v7728_v55  ;;  %v4136_v52 = vpop.permute.xlu0 %4135  ;;  %v7860_v11 = vld [vmem:[%s8618_s3 + $0x3a0] sm:$0xff]  ;;  %v7865_v16 = vld [vmem:[%s8618_s3 + $0x3a8] sm:$0xff] }
 0x2e7   :  { %4320 = vrot.lane.b32.xlu1 %v4319_v59, %s4337_s27  ;;  %v4138_v58 = vunpack.i.h.bf16 %v4136_v52  ;;  %v4137_v23 = vunpack.i.l.bf16 %v4136_v52  ;;  %v7782_v52 = vld [vmem:[%s8618_s3 + $0x210] sm:$0xff] }
 0x2e9   :  { %1808 = vrot.lane.b32.xlu0 %v7728_v55, %s4337_s27  ;;  %v1860_v42 = vsel %vm249_vm3, %v4137_v23, %v4138_v58  ;;  %v7812_v55 = vld [vmem:[%s8618_s3 + $0x2a0] sm:$0xff] }
 0x2ea   :  { %v1891_v53 = vmax.f32 %v9326_v22, %v1860_v42  ;;  %v7787_v42 = vld [vmem:[%s8618_s3 + $0x218] sm:$0xff]  ;;  %v7792_v22 = vld [vmem:[%s8618_s3 + $0x390] sm:$0xff] }
 0x2eb   :  { %1788 = vrot.lane.b32.xlu1 %v7732_v40, %s4337_s27  ;;  %v7743_v9 = vpop.permute.xlu0 %4140  ;;  %v7802_v40 = vld [vmem:[%s8618_s3 + $0x310] sm:$0xff] }
 0x2ec   :  { %2162 = vmatprep.mubr.f32.mxu0 %v1891_v53  ;;  %v7797_v53 = vld [vmem:[%s8618_s3 + $0x398] sm:$0xff]  ;;  %v4142_v39 = vunpack.i.l.bf16 %v7743_v9 }
 0x2ed   :  { %v3434_v14 = vpack.c.bf16 %v7797_v53, %v7792_v22  ;;  %v7870_v22 = vld [vmem:[%s8618_s3 + $0x320] sm:$0xff] }
 0x2ee   :  { %v7741_v24 = vpop.permute.xlu1 %4145 }
 0x2ef   :  { %v4148_v53 = vunpack.i.h.bf16 %v7741_v24  ;;  %v4147_v25 = vunpack.i.l.bf16 %v7741_v24 }
 0x2f3   :  { %v7772_v21 = vpop.permute.xlu1 %4150 }
 0x2f7   :  { %v7755_v59 = vpop.permute.xlu0 %4155 }
 0x302   :  { %v7819_v37 = vpop.permute.xlu0 %4165  ;;  %v7832_v10 = vpop.permute.xlu1 %4160 }
 0x303   :  { %v4168_v63 = vunpack.i.h.bf16 %v7819_v37  ;;  %v4163_v43 = vunpack.i.h.bf16 %v7832_v10  ;;  %v9327_v18 = vunpack.i.l.bf16 %v7832_v10  ;;  %v9328_v29 = vunpack.i.l.bf16 %v7819_v37 }
 0x305   :  { %v1861_v19 = vsel %vm249_vm3, %v4168_v63, %v4142_v39  ;;  %v1850_v24 = vsel %vm249_vm3, %v4138_v58, %v4163_v43  ;;  %v1870_v35 = vsel %vm249_vm3, %v9327_v18, %v4137_v23  ;;  %v1840_v26 = vsel %vm249_vm3, %v4163_v43, %v9328_v29  ;;  %v7891_v58 = vld [vmem:[%s8618_s3 + $0x2b0] sm:$0xff]  ;;  %v7896_v18 = vld [vmem:[%s8618_s3 + $0x2b8] sm:$0xff] }
 0x306   :  { %v1899_v2 = vmax.f32 %v7039_v13, %v1861_v19  ;;  %v9329_v23 = vld [vmem:[#allocation44_spill] sm:$0xff]  ;;  %v1890_v29 = vmax.f32 %v7035_v56, %v1870_v35  ;;  %v7900_v13 = vpop.permute.xlu1 %4170  ;;  %v1893_v43 = vmax.f32 %v7043_v5, %v1840_v26  ;;  %v9330_v19 = vunpack.i.h.bf16 %v7743_v9  ;;  %v9334_v35 = vld [vmem:[#allocation45_spill] sm:$0xff]  ;;  %v9335_v56 = vld [vmem:[#allocation47_spill] sm:$0xff] }
 0x307   :  { %v1892_v47 = vmax.f32 %v9329_v23, %v1850_v24  ;;  %v8896_v48 = vunpack.i.h.bf16 %v7900_v13  ;;  %v4172_v45 = vunpack.i.l.bf16 %v7900_v13  ;;  %v1862_v5 = vsel %vm249_vm3, %v4147_v25, %v4148_v53  ;;  %v7933_v26 = vld [vmem:[%s8618_s3 + $0x230] sm:$0xff] }
 0x308   :  { %v1871_v15 = vsel %vm249_vm3, %v9330_v19, %v4168_v63  ;;  %2163 = vmatmul.mubr.f32.vlgmr.msra.gmra.mrb[40].mxu0 %v1890_v29  ;;  %2277 = vmatprep.mubr.f32.mxu1 %v1893_v43  ;;  %v9332_v19 = vld [vmem:[#allocation46_spill] sm:$0xff]  ;;  %v1907_v34 = vmax.f32 %v9335_v56, %v1862_v5  ;;  %v7971_v56 = vld [vmem:[%s8618_s3 + $0x330] sm:$0xff] }
 0x309   :  { %2167 = vmatprep.mubr.f32.mxu0 %v1899_v2  ;;  %2278 = vmatmul.mubr.f32.vlgmr.msra.gmra.mrb[40].mxu1 %v1892_v47  ;;  %v1898_v24 = vmax.f32 %v9332_v19, %v1871_v15  ;;  %v1841_v29 = vsel %vm249_vm3, %v4172_v45, %v8896_v48  ;;  %v1851_v43 = vsel %vm249_vm3, %v4142_v39, %v4172_v45  ;;  %v7938_v47 = vld [vmem:[%s8618_s3 + $0x238] sm:$0xff]  ;;  %v4152_v39 = vunpack.i.l.bf16 %v7772_v21  ;;  %v7953_v2 = vld [vmem:[%s8618_s3 + $0x3b0] sm:$0xff] }
 0x30a   :  { %v1901_v48 = vmax.f32 %v7085_v54, %v1841_v29  ;;  %v1900_v45 = vmax.f32 %v9334_v35, %v1851_v43  ;;  %3401 = vmatpush3.bf16.msra.mxu0 %v3400_v38  ;;  %3433 = vmatpush3.bf16.msra.mxu1 %v3432_v49  ;;  %v7958_v54 = vld [vmem:[%s8618_s3 + $0x3b8] sm:$0xff]  ;;  %v7994_v29 = vld [vmem:[%s8618_s3 + $0x2c8] sm:$0xff] }
 0x30b   :  { %3403 = vmatprep.subr.bf16.mxu0 %v3402_v20  ;;  %3435 = vmatprep.subr.bf16.mxu1 %v3434_v14  ;;  %v9338_v14 = vunpack.i.h.bf16 %v7755_v59 }
 0x30c   :  { %v7921_v23 = vpop.permute.xlu0 %4175  ;;  %v7942_v19 = vpop.permute.xlu1 %4180  ;;  %2168 = vmatmul.mubr.f32.gmra.mrb[42].mxu0 %v1898_v24  ;;  %2282 = vmatprep.mubr.f32.mxu1 %v1901_v48  ;;  %v7976_v48 = vld [vmem:[%s8618_s3 + $0x338] sm:$0xff] }
 0x30d   :  { %9331 = vst [vmem:[#allocation40_spill] sm:$0xff] %v7921_v23  ;;  %v4178_v15 = vunpack.i.h.bf16 %v7921_v23  ;;  %9333 = vst [vmem:[#allocation42_spill] sm:$0xff] %v7942_v19  ;;  %v4183_v41 = vunpack.i.h.bf16 %v7942_v19  ;;  %v8898_v63 = vunpack.i.l.bf16 %v7942_v19  ;;  %v9336_v49 = vunpack.i.l.bf16 %v7921_v23  ;;  %2172 = vmatprep.mubr.f32.mxu0 %v1907_v34  ;;  %2283 = vmatmul.mubr.f32.gmra.mrb[42].mxu1 %v1900_v45  ;;  %v7999_v34 = vld [vmem:[%s8618_s3 + $0x3c0] sm:$0xff] }
 0x30e   :  { %v9340_v19 = vpack.c.bf16 %v7787_v42, %v7782_v52  ;;  %v3442_v52 = vpack.c.bf16 %v7958_v54, %v7953_v2  ;;  %v3444_v42 = vpack.c.bf16 %v7976_v48, %v7971_v56 }
 0x30f   :  { %v1872_v38 = vsel %vm249_vm3, %v9336_v49, %v4147_v25  ;;  %v1852_v20 = vsel %vm249_vm3, %v4148_v53, %v4178_v15  ;;  %v7981_v25 = vld [vmem:[%s8618_s3 + $0x2c0] sm:$0xff]  ;;  %v1842_v5 = vsel %vm249_vm3, %v4178_v15, %v8898_v63  ;;  %v1863_v35 = vsel %vm249_vm3, %v4183_v41, %v4152_v39 }
 0x310   :  { %v1906_v24 = vmax.f32 %v7098_v33, %v1872_v38  ;;  %v8004_v33 = vld [vmem:[%s8618_s3 + $0x3c8] sm:$0xff]  ;;  %v8008_v15 = vpop.permute.xlu1 %4185  ;;  %v1909_v45 = vmax.f32 %v7131_v30, %v1842_v5  ;;  %v1915_v49 = vmax.f32 %v7105_v27, %v1863_v35  ;;  %v9337_v38 = vld [vmem:[#allocation48_spill] sm:$0xff]  ;;  %v9339_v53 = vunpack.i.l.bf16 %v7755_v59  ;;  %3405 = vmatpush3.bf16.msra.mxu0 %v9340_v19  ;;  %v9344_v5 = vld [vmem:[#allocation49_spill] sm:$0xff] }
 0x311   :  { %v8006_v43 = vpop.permute.xlu0 %4190  ;;  %v1908_v63 = vmax.f32 %v9337_v38, %v1852_v20  ;;  %v9341_v30 = vunpack.i.h.bf16 %v7772_v21  ;;  %v9342_v20 = vpack.c.bf16 %v7807_v0, %v7802_v40  ;;  %v3414_v19 = vpack.c.bf16 %v7994_v29, %v7981_v25  ;;  %v8045_v0 = vld [vmem:[%s8618_s3 + $0x240] sm:$0xff]  ;;  %v8067_v25 = vld [vmem:[%s8618_s3 + $0x348] sm:$0xff] }
 0x312   :  { %v1864_v23 = vsel %vm249_vm3, %v9339_v53, %v9338_v14  ;;  %v4193_v61 = vunpack.i.h.bf16 %v8006_v43  ;;  %v4192_v60 = vunpack.i.l.bf16 %v8006_v43  ;;  %v9343_v14 = vpack.c.bf16 %v7817_v3, %v7812_v55  ;;  %2173 = vmatmul.mubr.f32.gmra.mrb[44].mxu0 %v1906_v24  ;;  %2287 = vmatprep.mubr.f32.mxu1 %v1909_v45  ;;  %v8050_v3 = vld [vmem:[%s8618_s3 + $0x248] sm:$0xff]  ;;  %v8055_v55 = vld [vmem:[%s8618_s3 + $0x340] sm:$0xff]  ;;  %v8072_v53 = vld [vmem:[%s8618_s3 + $0x2d0] sm:$0xff] }
 0x313   :  { %v1873_v27 = vsel %vm249_vm3, %v9341_v30, %v4183_v41  ;;  %3437 = vmatpush3.bf16.msra.mxu1 %v9342_v20  ;;  %v3446_v41 = vpack.c.bf16 %v8004_v33, %v7999_v34  ;;  %2177 = vmatprep.mubr.f32.mxu0 %v1915_v49  ;;  %v1923_v2 = vmax.f32 %v6957_v57, %v1864_v23  ;;  %v4187_v57 = vunpack.i.l.bf16 %v8008_v15  ;;  %v8125_v20 = vld [vmem:[%s8618_s3 + $0x250] sm:$0xff] }
 0x314   :  { %3407 = vmatprep.subr.bf16.mxu0 %v9343_v14  ;;  %2288 = vmatmul.mubr.f32.gmra.mrb[44].mxu1 %v1908_v63  ;;  %v1843_v40 = vsel %vm249_vm3, %v4192_v60, %v4193_v61  ;;  %v1853_v54 = vsel %vm249_vm3, %v4152_v39, %v4192_v60  ;;  %v8077_v63 = vld [vmem:[%s8618_s3 + $0x2d8] sm:$0xff]  ;;  %v1914_v39 = vmax.f32 %v6911_v62, %v1873_v27  ;;  %v4188_v27 = vunpack.i.h.bf16 %v8008_v15 }
 0x315   :  { %v1917_v24 = vmax.f32 %v7186_v7, %v1843_v40  ;;  %v1916_v35 = vmax.f32 %v9344_v5, %v1853_v54  ;;  %v9345_v29 = vpack.c.bf16 %v7850_v50, %v7845_v44  ;;  %v9346_v45 = vpack.c.bf16 %v7865_v16, %v7860_v11  ;;  %v8130_v14 = vld [vmem:[%s8618_s3 + $0x258] sm:$0xff] }
 0x316   :  { %v8080_v23 = vpop.permute.xlu0 %4205  ;;  %v8082_v60 = vpop.permute.xlu1 %4195  ;;  %v9347_v7 = vpack.c.bf16 %v7886_v51, %v7870_v22  ;;  %v9348_v50 = vpack.c.bf16 %v7896_v18, %v7891_v58  ;;  %2178 = vmatmul.mubr.f32.gmra.mrb[46].mxu0 %v1914_v39  ;;  %v3416_v16 = vpack.c.bf16 %v8050_v3, %v8045_v0  ;;  %v3448_v11 = vpack.c.bf16 %v8067_v25, %v8055_v55  ;;  %v2079_v55 = vld [vmem:[%s8618_s3 + $0x368] sm:$0xff] }
 0x317   :  { %3409 = vmatpush3.bf16.msra.mxu0 %v9345_v29  ;;  %3439 = vmatprep.subr.bf16.mxu1 %v9346_v45  ;;  %v4208_v49 = vunpack.i.h.bf16 %v8080_v23  ;;  %v4207_v38 = vunpack.i.l.bf16 %v8080_v23  ;;  %v4198_v30 = vunpack.i.h.bf16 %v8082_v60  ;;  %v4197_v62 = vunpack.i.l.bf16 %v8082_v60  ;;  %v2063_v45 = vld [vmem:[%s8618_s3 + $0x2e8] sm:$0xff] }
 0x318   :  { %3441 = vmatpush3.bf16.msra.mxu1 %v9347_v7  ;;  %3411 = vmatprep.subr.bf16.mxu0 %v9348_v50  ;;  %v3418_v44 = vpack.c.bf16 %v8077_v63, %v8072_v53  ;;  %v9349_v51 = vunpack.i.l.bf16 %v7755_v59  ;;  %v9350_v53 = vunpack.i.h.bf16 %v7755_v59  ;;  %v9351_v39 = vpack.c.bf16 %v7938_v47, %v7933_v26 }
 0x319   :  { %2292 = vmatprep.mubr.f32.mxu1 %v1917_v24  ;;  %2182 = vmatprep.mubr.f32.mxu0 %v1923_v2  ;;  %v1844_v58 = vsel %vm249_vm3, %v4198_v30, %v4207_v38  ;;  %v1865_v18 = vsel %vm249_vm3, %v4208_v49, %v4187_v57  ;;  %v1875_v26 = vsel %vm249_vm3, %v4188_v27, %v4208_v49 }
 0x31a   :  { %2293 = vmatmul.mubr.f32.gmra.mrb[46].mxu1 %v1916_v35  ;;  %v1874_v22 = vsel %vm249_vm3, %v4197_v62, %v9349_v51  ;;  %v4201_v3 = vpop.permute.xlu1 %4200  ;;  %v1925_v2 = vmax.f32 %v7227_v1, %v1844_v58  ;;  %v1931_v54 = vmax.f32 %v7201_v8, %v1865_v18  ;;  %v1854_v63 = vsel %vm249_vm3, %v9350_v53, %v4198_v30  ;;  %v8149_v8 = vld [vmem:[%s8618_s3 + $0x3d0] sm:$0xff]  ;;  %v9352_v1 = vld [vmem:[#allocation50_spill] sm:$0xff]  ;;  %v2077_v51 = vld [vmem:[%s8618_s3 + $0x358] sm:$0xff] }
 0x31b   :  { %v8132_v0 = vpop.permute.xlu0 %4210  ;;  %v1922_v40 = vmax.f32 %v7197_v6, %v1874_v22  ;;  %3413 = vmatpush3.bf16.msra.mxu0 %v9351_v39  ;;  %v4203_v35 = vunpack.i.h.bf16 %v4201_v3  ;;  %v4202_v29 = vunpack.i.l.bf16 %v4201_v3  ;;  %3443 = vmatprep.subr.bf16.mxu1 %v3442_v52  ;;  %v8154_v6 = vld [vmem:[%s8618_s3 + $0x3d8] sm:$0xff]  ;;  %v1924_v59 = vmax.f32 %v9352_v1, %v1854_v63  ;;  %v8166_v52 = vld [vmem:[%s8618_s3 + $0x350] sm:$0xff]  ;;  %v2046_v22 = vld [vmem:[%s8618_s3 + $0x260] sm:$0xff] }
 0x31c   :  { %v4213_v24 = vunpack.i.h.bf16 %v8132_v0  ;;  %v4212_v5 = vunpack.i.l.bf16 %v8132_v0  ;;  %3415 = vmatprep.subr.bf16.mxu0 %v3414_v19  ;;  %2297 = vmatprep.mubr.f32.mxu1 %v1925_v2  ;;  %v3420_v47 = vpack.c.bf16 %v8130_v14, %v8125_v20  ;;  %v2062_v19 = vld [vmem:[%s8618_s3 + $0x2e0] sm:$0xff]  ;;  %v1930_v30 = vmax.f32 %v7150_v31, %v1875_v26  ;;  %v2047_v31 = vld [vmem:[%s8618_s3 + $0x268] sm:$0xff]  ;;  %v9353_v20 = vld [vmem:[#allocation60_spill] sm:$0xff] }
 0x31d   :  { %2183 = vmatmul.mubr.f32.gmra.mrb[48].mxu0 %v1922_v40  ;;  %v1866_v7 = vsel %vm249_vm3, %v4202_v29, %v4203_v35  ;;  %v9355_v40 = vld [vmem:[#allocation54_spill] sm:$0xff]  ;;  %3445 = vmatpush3.bf16.msra.mxu1 %v3444_v42  ;;  %v3422_v39 = vpack.c.bf16 %v2063_v45, %v2062_v19  ;;  %v3452_v1 = vpack.c.bf16 %v2077_v51, %v8166_v52  ;;  %v2065_v26 = vld [vmem:[%s8618_s3 + $0x2f8] sm:$0xff]  ;;  %v9357_v19 = vld [vmem:[#allocation15_spill] sm:$0xff] }
 0x31e   :  { %2187 = vmatprep.mubr.f32.mxu0 %v1931_v54  ;;  %v1845_v49 = vsel %vm249_vm3, %v4212_v5, %v4213_v24  ;;  %v1855_v50 = vsel %vm249_vm3, %v4187_v57, %v4212_v5  ;;  %2298 = vmatmul.mubr.f32.gmra.mrb[48].mxu1 %v1924_v59  ;;  %v9354_v57 = vld [vmem:[#allocation56_spill] sm:$0xff]  ;;  %v3450_v5 = vpack.c.bf16 %v8154_v6, %v8149_v8  ;;  %v9356_v6 = vld [vmem:[#allocation59_spill] sm:$0xff]  ;;  %v2078_v51 = vld [vmem:[%s8618_s3 + $0x360] sm:$0xff] }
 0x31f   :  { %v8192_v58 = vpop.permute.xlu0 %4215  ;;  %v8194_v18 = vpop.permute.xlu1 %4230  ;;  %v1933_v14 = vmax.f32 %v9353_v20, %v1845_v49  ;;  %v1939_v3 = vmax.f32 %v9354_v57, %v1866_v7  ;;  %v1932_v2 = vmax.f32 %v9355_v40, %v1855_v50  ;;  %3417 = vmatpush3.bf16.msra.mxu0 %v3416_v16  ;;  %v3424_v16 = vpack.c.bf16 %v2047_v31, %v2046_v22  ;;  %v2064_v59 = vld [vmem:[%s8618_s3 + $0x2f0] sm:$0xff]  ;;  %v2097_v31 = vld [vmem:[%s8618_s3 + $0x3f8] sm:$0xff] }
 0x320   :  { %v4218_v54 = vunpack.i.h.bf16 %v8192_v58  ;;  %v4217_v53 = vunpack.i.l.bf16 %v8192_v58  ;;  %v4232_v63 = vunpack.i.l.bf16 %v8194_v18  ;;  %3419 = vmatprep.subr.bf16.mxu0 %v3418_v44  ;;  %3447 = vmatprep.subr.bf16.mxu1 %v3446_v41  ;;  %v2094_v44 = vld [vmem:[%s8618_s3 + $0x3e0] sm:$0xff]  ;;  %v4233_v34 = vunpack.i.h.bf16 %v8194_v18  ;;  %v2048_v7 = vld [vmem:[%s8618_s3 + $0x270] sm:$0xff] }
 0x321   :  { %2188 = vmatmul.mubr.f32.gmra.mrb[50].mxu0 %v1930_v30  ;;  %2302 = vmatprep.mubr.f32.mxu1 %v1933_v14  ;;  %v3426_v49 = vpack.c.bf16 %v2065_v26, %v2064_v59  ;;  %v2096_v22 = vld [vmem:[%s8618_s3 + $0x3f0] sm:$0xff]  ;;  %v9359_v14 = vld [vmem:[#allocation17_spill] sm:$0xff] }
 0x322   :  { %2192 = vmatprep.mubr.f32.mxu0 %v1939_v3  ;;  %v1876_v56 = vsel %vm249_vm3, %v4217_v53, %v4202_v29  ;;  %v1846_v48 = vsel %vm249_vm3, %v4218_v54, %v4232_v63  ;;  %v1856_v42 = vsel %vm249_vm3, %v4203_v35, %v4218_v54  ;;  %v2095_v29 = vld [vmem:[%s8618_s3 + $0x3e8] sm:$0xff]  ;;  %2303 = vmatmul.mubr.f32.gmra.mrb[50].mxu1 %v1932_v2  ;;  %v9358_v35 = vld [vmem:[#allocation57_spill] sm:$0xff]  ;;  %v2080_v26 = vld [vmem:[%s8618_s3 + $0x370] sm:$0xff] }
 0x323   :  { %v8233_v8 = vpop.permute.xlu0 %4220  ;;  %v1938_v52 = vmax.f32 %v9356_v6, %v1876_v56  ;;  %v1941_v45 = vmax.f32 %v9357_v19, %v1846_v48  ;;  %v1940_v30 = vmax.f32 %v9358_v35, %v1856_v42  ;;  %3421 = vmatpush3.bf16.msra.mxu0 %v3420_v47  ;;  %3449 = vmatpush3.bf16.msra.mxu1 %v3448_v11  ;;  %v2049_v47 = vld [vmem:[%s8618_s3 + $0x278] sm:$0xff]  ;;  %v9360_v3 = vld [vmem:[#allocation19_spill] sm:$0xff] }
 0x324   :  { %v4223_v33 = vunpack.i.h.bf16 %v8233_v8  ;;  %v4222_v41 = vunpack.i.l.bf16 %v8233_v8  ;;  %3423 = vmatprep.subr.bf16.mxu0 %v3422_v39  ;;  %v3454_v50 = vpack.c.bf16 %v2095_v29, %v2094_v44  ;;  %3451 = vmatprep.subr.bf16.mxu1 %v3450_v5  ;;  %v3428_v2 = vpack.c.bf16 %v2049_v47, %v2048_v7  ;;  %v2081_v56 = vld [vmem:[%s8618_s3 + $0x378] sm:$0xff]  ;;  %v9361_v48 = vld [vmem:[#allocation7_spill] sm:$0xff] }
 0x325   :  { %2193 = vmatmul.mubr.f32.gmra.mrb[52].mxu0 %v1938_v52  ;;  %2307 = vmatprep.mubr.f32.mxu1 %v1941_v45  ;;  %v3456_v5 = vpack.c.bf16 %v2079_v55, %v2078_v51  ;;  %v3458_v59 = vpack.c.bf16 %v2097_v31, %v2096_v22  ;;  %v9403_v8 = vld [vmem:[#allocation35_spill] sm:$0xff] }
 0x326   :  { %v1867_v25 = vsel %vm249_vm3, %v4233_v34, %v4222_v41  ;;  %v1877_v11 = vsel %vm249_vm3, %v4223_v33, %v4233_v34  ;;  %2308 = vmatmul.mubr.f32.gmra.mrb[52].mxu1 %v1940_v30  ;;  %v9362_v30 = vld [vmem:[#allocation2_spill] sm:$0xff] }
 0x327   :  { %v4226_v20 = vpop.permute.xlu0 %4225  ;;  %v1947_v57 = vmax.f32 %v9359_v14, %v1867_v25  ;;  %v1946_v40 = vmax.f32 %v9360_v3, %v1877_v11  ;;  %3425 = vmatpush3.bf16.msra.mxu0 %v3424_v16  ;;  %3453 = vmatpush3.bf16.msra.mxu1 %v3452_v1  ;;  %v3460_v1 = vpack.c.bf16 %v2081_v56, %v2080_v26  ;;  %v9364_v14 = vld [vmem:[#allocation5_spill] sm:$0xff]  ;;  %v9365_v3 = vld [vmem:[#allocation4_spill] sm:$0xff] }
 0x328   :  { %v4228_v54 = vunpack.i.h.bf16 %v4226_v20  ;;  %v4227_v39 = vunpack.i.l.bf16 %v4226_v20  ;;  %3427 = vmatprep.subr.bf16.mxu0 %v3426_v49  ;;  %3455 = vmatprep.subr.bf16.mxu1 %v3454_v50  ;;  %v9363_v49 = vld [vmem:[#allocation18_spill] sm:$0xff] }
 0x329   :  { %2197 = vmatprep.mubr.f32.mxu0 %v1947_v57 }
 0x32a   :  { %2198 = vmatmul.mubr.f32.gmra.mrb[54].mxu0 %v1946_v40  ;;  %v1868_v16 = vsel %vm249_vm3, %v4227_v39, %v4228_v54 }
 0x32b   :  { %v1955_v42 = vmax.f32 %v9361_v48, %v1868_v16  ;;  %3429 = vmatpush3.bf16.msra.mxu0 %v3428_v2  ;;  %3457 = vmatpush3.bf16.msra.mxu1 %v3456_v5  ;;  %v8283_v52 = vpop.permute.xlu0 %4255 }
 0x32c   :  { %3459 = vmatprep.subr.bf16.mxu1 %v3458_v59  ;;  %v4257_v47 = vunpack.i.l.bf16 %v8283_v52  ;;  %v4258_v2 = vunpack.i.h.bf16 %v8283_v52  ;;  %v9366_v59 = vld [vmem:[#allocation6_spill] sm:$0xff] }
 0x32d   :  { %2202 = vmatprep.mubr.f32.mxu0 %v1955_v42 }
 0x32f   :  { %3461 = vmatpush3.bf16.msra.mxu1 %v3460_v1  ;;  %v8279_v44 = vpop.permute.xlu1 %4235 }
 0x330   :  { %v4238_v29 = vunpack.i.h.bf16 %v8279_v44  ;;  %v4237_v6 = vunpack.i.l.bf16 %v8279_v44 }
 0x332   :  { %v1847_v19 = vsel %vm249_vm3, %v4237_v6, %v4238_v29  ;;  %v1857_v45 = vsel %vm249_vm3, %v4222_v41, %v4237_v6 }
 0x333   :  { %v8291_v35 = vpop.permute.xlu1 %4240  ;;  %v1949_v34 = vmax.f32 %v9362_v30, %v1847_v19  ;;  %v1948_v7 = vmax.f32 %v9363_v49, %v1857_v45  ;;  %v9367_v45 = vld [vmem:[#allocation23_spill] sm:$0xff] }
 0x334   :  { %v4243_v50 = vunpack.i.h.bf16 %v8291_v35  ;;  %v4242_v51 = vunpack.i.l.bf16 %v8291_v35 }
 0x335   :  { %2312 = vmatprep.mubr.f32.mxu1 %v1949_v34 }
 0x336   :  { %2313 = vmatmul.mubr.f32.gmra.mrb[54].mxu1 %v1948_v7  ;;  %v1878_v41 = vsel %vm249_vm3, %v4242_v51, %v4227_v39  ;;  %v1848_v25 = vsel %vm249_vm3, %v4243_v50, %v4257_v47  ;;  %v1858_v11 = vsel %vm249_vm3, %v4228_v54, %v4243_v50 }
 0x337   :  { %v1954_v57 = vmax.f32 %v9364_v14, %v1878_v41  ;;  %v1957_v40 = vmax.f32 %v9365_v3, %v1848_v25  ;;  %v1956_v26 = vmax.f32 %v9366_v59, %v1858_v11  ;;  %v9368_v41 = vunpack.i.l.bf16 %v7832_v10  ;;  %v9370_v10 = vld [vmem:[#allocation51_spill] sm:$0xff] }
 0x338   :  { %v8298_v55 = vpop.permute.xlu0 %4260  ;;  %v8312_v20 = vpop.permute.xlu1 %4245 }
 0x339   :  { %v4263_v22 = vunpack.i.h.bf16 %v8298_v55  ;;  %v4262_v31 = vunpack.i.l.bf16 %v8298_v55  ;;  %v4248_v39 = vunpack.i.h.bf16 %v8312_v20  ;;  %v4247_v5 = vunpack.i.l.bf16 %v8312_v20  ;;  %2203 = vmatmul.mubr.f32.gmra.mrb[56].mxu0 %v1954_v57  ;;  %2317 = vmatprep.mubr.f32.mxu1 %v1957_v40  ;;  %v9411_v20 = vld [vmem:[#allocation38_spill] sm:$0xff] }
 0x33a   :  { %2318 = vmatmul.mubr.f32.gmra.mrb[56].mxu1 %v1956_v26  ;;  %v4346_v55 = vmov 0.0  }
 0x33b   :  { %v1849_v54 = vsel %vm249_vm3, %v4262_v31, %v4263_v22  ;;  %v1869_v16 = vsel %vm249_vm3, %v4258_v2, %v4247_v5  ;;  %v1879_v42 = vsel %vm249_vm3, %v4248_v39, %v4258_v2  ;;  %v1859_v1 = vsel %vm249_vm3, %v4247_v5, %v4262_v31 }
 0x33c   :  { %v4266_v56 = vpop.permute.xlu0 %4265  ;;  %v1965_v48 = vmax.f32 %v7471_v17, %v1849_v54  ;;  %v4251_v19 = vpop.permute.xlu1 %4250  ;;  %v1963_v30 = vmax.f32 %v9367_v45, %v1869_v16  ;;  %v1962_v34 = vmax.f32 %v7454_v32, %v1879_v42  ;;  %v1964_v50 = vmax.f32 %v7458_v28, %v1859_v1  ;;  %v9373_v45 = vld [vmem:[#allocation22_spill] sm:$0xff] }
 0x33d   :  { %v4267_v6 = vunpack.i.l.bf16 %v4266_v56  ;;  %v4253_v49 = vunpack.i.h.bf16 %v4251_v19  ;;  %v4252_v7 = vunpack.i.l.bf16 %v4251_v19  ;;  %v4268_v17 = vunpack.i.h.bf16 %v4266_v56 }
 0x33e   :  { %2322 = vmatprep.mubr.f32.mxu1 %v1965_v48  ;;  %2207 = vmatprep.mubr.f32.mxu0 %v1963_v30  ;;  %v9369_v31 = vunpack.i.l.bf16 %v7819_v37  ;;  %v9371_v56 = vunpack.i.h.bf16 %v7900_v13  ;;  %v9372_v1 = vunpack.i.h.bf16 %v7743_v9  ;;  %v9376_v9 = vld [vmem:[#allocation52_spill] sm:$0xff] }
 0x33f   :  { %v1880_v25 = vsel %vm249_vm3, %v4267_v6, %v9368_v41  ;;  %v1810_v11 = vsel %vm249_vm3, %v4253_v49, %v4267_v6  ;;  %2208 = vmatmul.mubr.f32.gmra.mrb[58].mxu0 %v1962_v34  ;;  %2323 = vmatmul.mubr.f32.gmra.mrb[58].mxu1 %v1964_v50  ;;  %v1820_v28 = vsel %vm249_vm3, %v4252_v7, %v4253_v49  ;;  %v9374_v34 = vld [vmem:[#allocation13_spill] sm:$0xff] }
 0x340   :  { %v1830_v32 = vsel %vm249_vm3, %v9369_v31, %v4252_v7  ;;  %v4276_v14 = vpop.permute.xlu0 %4275  ;;  %v1896_v57 = vmax.f32 %v7483_v12, %v1810_v11  ;;  %v1895_v37 = vmax.f32 %v7479_v4, %v1820_v28  ;;  %v1897_v54 = vmax.f32 %v7502_v36, %v1880_v25  ;;  %v9377_v11 = vld [vmem:[#allocation42_spill] sm:$0xff]  ;;  %v9379_v28 = vld [vmem:[#allocation9_spill] sm:$0xff] }
 0x341   :  { %v1894_v3 = vmax.f32 %v9370_v10, %v1830_v32  ;;  %v4278_v40 = vunpack.i.h.bf16 %v4276_v14  ;;  %v4277_v2 = vunpack.i.l.bf16 %v4276_v14  ;;  %v1831_v16 = vsel %vm249_vm3, %v9371_v56, %v4268_v17  ;;  %v9380_v10 = vld [vmem:[#allocation40_spill] sm:$0xff]  ;;  %v9383_v56 = vld [vmem:[#allocation30_spill] sm:$0xff] }
 0x342   :  { %v4271_v5 = vpop.permute.xlu1 %4270  ;;  %2392 = vmatprep.mubr.f32.mxu0 %v1895_v37  ;;  %2507 = vmatprep.mubr.f32.mxu1 %v1897_v54  ;;  %v1902_v25 = vmax.f32 %v9376_v9, %v1831_v16  ;;  %v9378_v31 = vunpack.i.l.bf16 %v9377_v11 }
 0x343   :  { %v4273_v59 = vunpack.i.h.bf16 %v4271_v5  ;;  %v4272_v26 = vunpack.i.l.bf16 %v4271_v5  ;;  %v1822_v48 = vsel %vm249_vm3, %v4277_v2, %v4278_v40  ;;  %2393 = vmatmul.mubr.f32.vlgmr.msra.gmra.mrb[60].mxu0 %v1894_v3  ;;  %2508 = vmatmul.mubr.f32.vlgmr.msra.gmra.mrb[60].mxu1 %v1896_v57  ;;  %v9381_v3 = vunpack.i.l.bf16 %v9380_v10 }
 0x344   :  { %v1832_v32 = vsel %vm249_vm3, %v9378_v31, %v4277_v2  ;;  %v1911_v57 = vmax.f32 %v9379_v28, %v1822_v48  ;;  %v9384_v48 = vld [vmem:[#allocation16_spill] sm:$0xff]  ;;  %v9389_v31 = vld [vmem:[#allocation25_spill] sm:$0xff] }
 0x345   :  { %v4286_v12 = vpop.permute.xlu0 %4285  ;;  %v1821_v42 = vsel %vm249_vm3, %v4268_v17, %v4272_v26  ;;  %v1881_v4 = vsel %vm249_vm3, %v4273_v59, %v9372_v1  ;;  %v1811_v36 = vsel %vm249_vm3, %v4272_v26, %v4273_v59  ;;  %v9375_v17 = vld [vmem:[#allocation3_spill] sm:$0xff]  ;;  %v9382_v26 = vunpack.i.h.bf16 %v7772_v21 }
 0x346   :  { %v4288_v13 = vunpack.i.h.bf16 %v4286_v12  ;;  %v4287_v6 = vunpack.i.l.bf16 %v4286_v12  ;;  %v4281_v19 = vpop.permute.xlu1 %4280  ;;  %v1903_v30 = vmax.f32 %v9373_v45, %v1821_v42  ;;  %v1905_v49 = vmax.f32 %v9374_v34, %v1881_v4 }
 0x347   :  { %v4283_v7 = vunpack.i.h.bf16 %v4281_v19  ;;  %v4282_v50 = vunpack.i.l.bf16 %v4281_v19  ;;  %v1904_v41 = vmax.f32 %v9375_v17, %v1811_v36  ;;  %v9386_v19 = vld [vmem:[#allocation26_spill] sm:$0xff] }
 0x348   :  { %2397 = vmatprep.mubr.f32.mxu0 %v1903_v30  ;;  %2512 = vmatprep.mubr.f32.mxu1 %v1905_v49  ;;  %v1883_v37 = vsel %vm249_vm3, %v4288_v13, %v9382_v26  ;;  %v9387_v30 = vld [vmem:[#allocation20_spill] sm:$0xff] }
 0x349   :  { %v1882_v5 = vsel %vm249_vm3, %v4282_v50, %v9381_v3  ;;  %v1812_v59 = vsel %vm249_vm3, %v4278_v40, %v4282_v50  ;;  %2398 = vmatmul.mubr.f32.gmra.mrb[62].mxu0 %v1902_v25  ;;  %2513 = vmatmul.mubr.f32.gmra.mrb[62].mxu1 %v1904_v41  ;;  %v1823_v42 = vsel %vm249_vm3, %v4283_v7, %v4287_v6  ;;  %v9385_v40 = vld [vmem:[#allocation53_spill] sm:$0xff] }
 0x34a   :  { %v4291_v2 = vpop.permute.xlu1 %4290  ;;  %v1913_v16 = vmax.f32 %v9383_v56, %v1882_v5  ;;  %v1912_v12 = vmax.f32 %v9384_v48, %v1812_v59  ;;  %2402 = vmatprep.mubr.f32.mxu0 %v1911_v57  ;;  %v1910_v21 = vmax.f32 %v9385_v40, %v1832_v32  ;;  %v1919_v45 = vmax.f32 %v9386_v19, %v1823_v42  ;;  %v9390_v32 = vld [vmem:[#allocation21_spill] sm:$0xff]  ;;  %v9391_v57 = vld [vmem:[#allocation8_spill] sm:$0xff]  ;;  %v9394_v48 = vld [vmem:[#allocation27_spill] sm:$0xff] }
 0x34b   :  { %v4296_v14 = vpop.permute.xlu0 %4295  ;;  %v4293_v1 = vunpack.i.h.bf16 %v4291_v2  ;;  %v4292_v4 = vunpack.i.l.bf16 %v4291_v2  ;;  %v1921_v34 = vmax.f32 %v9387_v30, %v1883_v37  ;;  %v1833_v49 = vsel %vm249_vm3, %v4193_v61, %v4283_v7  ;;  %v9388_v61 = vld [vmem:[#allocation55_spill] sm:$0xff]  ;;  %v9393_v2 = vld [vmem:[#allocation28_spill] sm:$0xff] }
 0x34c   :  { %v4297_v54 = vunpack.i.l.bf16 %v4296_v14  ;;  %2517 = vmatprep.mubr.f32.mxu1 %v1913_v16  ;;  %v1813_v50 = vsel %vm249_vm3, %v4287_v6, %v4288_v13  ;;  %v4298_v43 = vunpack.i.h.bf16 %v4296_v14  ;;  %v1918_v7 = vmax.f32 %v9388_v61, %v1833_v49  ;;  %v9395_v42 = vld [vmem:[#allocation31_spill] sm:$0xff]  ;;  %v9398_v49 = vld [vmem:[#allocation10_spill] sm:$0xff]  ;;  %v9401_v61 = vld [vmem:[#allocation32_spill] sm:$0xff] }
 0x34d   :  { %2403 = vmatmul.mubr.f32.gmra.mrb[64].mxu0 %v1910_v21  ;;  %2518 = vmatmul.mubr.f32.gmra.mrb[64].mxu1 %v1912_v12  ;;  %v1824_v41 = vsel %vm249_vm3, %v4292_v4, %v4293_v1  ;;  %v1920_v13 = vmax.f32 %v9389_v31, %v1813_v50  ;;  %v1834_v60 = vsel %vm249_vm3, %v4207_v38, %v4292_v4  ;;  %v9392_v38 = vld [vmem:[#allocation58_spill] sm:$0xff]  ;;  %v9402_v31 = vld [vmem:[#allocation33_spill] sm:$0xff] }
 0x34e   :  { %v4301_v17 = vpop.permute.xlu1 %4300  ;;  %v1884_v9 = vsel %vm249_vm3, %v4297_v54, %v4197_v62  ;;  %2407 = vmatprep.mubr.f32.mxu0 %v1919_v45  ;;  %2522 = vmatprep.mubr.f32.mxu1 %v1921_v34  ;;  %v1927_v28 = vmax.f32 %v9390_v32, %v1824_v41  ;;  %v1814_v62 = vsel %vm249_vm3, %v4293_v1, %v4297_v54  ;;  %v9397_v45 = vld [vmem:[#allocation34_spill] sm:$0xff] }
 0x34f   :  { %v4306_v36 = vpop.permute.xlu0 %4305  ;;  %v4303_v25 = vunpack.i.h.bf16 %v4301_v17  ;;  %v4302_v11 = vunpack.i.l.bf16 %v4301_v17  ;;  %v1929_v10 = vmax.f32 %v9391_v57, %v1884_v9  ;;  %v1926_v37 = vmax.f32 %v9392_v38, %v1834_v60  ;;  %v9399_v17 = vld [vmem:[#allocation37_spill] sm:$0xff] }
 0x350   :  { %v4308_v3 = vunpack.i.h.bf16 %v4306_v36  ;;  %v4307_v5 = vunpack.i.l.bf16 %v4306_v36  ;;  %v1928_v54 = vmax.f32 %v9393_v2, %v1814_v62  ;;  %v1835_v56 = vsel %vm249_vm3, %v4213_v24, %v4298_v43  ;;  %v9396_v36 = vld [vmem:[#allocation61_spill] sm:$0xff]  ;;  %v9404_v62 = vld [vmem:[#allocation64_spill] sm:$0xff]  ;;  %v9408_v2 = vld [vmem:[#allocation63_spill] sm:$0xff] }
 0x351   :  { %2408 = vmatmul.mubr.f32.gmra.mrb[66].mxu0 %v1918_v7  ;;  %2523 = vmatmul.mubr.f32.gmra.mrb[66].mxu1 %v1920_v13  ;;  %v1825_v59 = vsel %vm249_vm3, %v4298_v43, %v4302_v11  ;;  %v1885_v26 = vsel %vm249_vm3, %v4303_v25, %v4188_v27  ;;  %v1815_v27 = vsel %vm249_vm3, %v4302_v11, %v4303_v25 }
 0x352   :  { %2412 = vmatprep.mubr.f32.mxu0 %v1927_v28  ;;  %2527 = vmatprep.mubr.f32.mxu1 %v1929_v10  ;;  %v1935_v12 = vmax.f32 %v9394_v48, %v1825_v59  ;;  %v1937_v15 = vmax.f32 %v9395_v42, %v1885_v26  ;;  %v1826_v40 = vsel %vm249_vm3, %v4307_v5, %v4308_v3  ;;  %v9407_v26 = vld [vmem:[#allocation29_spill] sm:$0xff]  ;;  %v9412_v42 = vld [vmem:[#allocation39_spill] sm:$0xff] }
 0x353   :  { %v4316_v6 = vpop.permute.xlu0 %4315  ;;  %v1934_v19 = vmax.f32 %v9396_v36, %v1835_v56  ;;  %v1936_v30 = vmax.f32 %v9397_v45, %v1815_v27  ;;  %v1836_v34 = vsel %vm249_vm3, %v4232_v63, %v4307_v5  ;;  %v1943_v50 = vmax.f32 %v9398_v49, %v1826_v40  ;;  %v9400_v63 = vld [vmem:[#allocation62_spill] sm:$0xff]  ;;  %v9413_v27 = vld [vmem:[#allocation11_spill] sm:$0xff]  ;;  %v2655_v40 = vld [vmem:[%s8619_s6 + $0x10] sm:$0xff] }
 0x354   :  { %v4318_v16 = vunpack.i.h.bf16 %v4316_v6  ;;  %v4317_v1 = vunpack.i.l.bf16 %v4316_v6  ;;  %v1942_v43 = vmax.f32 %v9400_v63, %v1836_v34  ;;  %v2657_v36 = vld [vmem:[%s8619_s6 + $0x20] sm:$0xff]  ;;  %v2660_v34 = vld [vmem:[%s8619_s6 + $0x38] sm:$0xff] }
 0x355   :  { %v4311_v14 = vpop.permute.xlu1 %4310  ;;  %2413 = vmatmul.mubr.f32.gmra.mrb[68].mxu0 %v1926_v37  ;;  %2528 = vmatmul.mubr.f32.gmra.mrb[68].mxu1 %v1928_v54  ;;  %v9409_v54 = vld [vmem:[#allocation36_spill] sm:$0xff] }
 0x356   :  { %v4312_v23 = vunpack.i.l.bf16 %v4311_v14  ;;  %v4313_v4 = vunpack.i.h.bf16 %v4311_v14  ;;  %2417 = vmatprep.mubr.f32.mxu0 %v1935_v12  ;;  %2532 = vmatprep.mubr.f32.mxu1 %v1937_v15  ;;  %v1887_v41 = vsel %vm249_vm3, %v4318_v16, %v4223_v33  ;;  %v1817_v32 = vsel %vm249_vm3, %v4317_v1, %v4318_v16  ;;  %v9406_v14 = vld [vmem:[#allocation24_spill] sm:$0xff] }
 0x357   :  { %v4326_v24 = vpop.permute.xlu0 %4325  ;;  %v1953_v6 = vmax.f32 %v9403_v8, %v1887_v41  ;;  %v2664_v41 = vld [vmem:[%s8619_s6 + $0x58] sm:$0xff] }
 0x358   :  { %v1886_v0 = vsel %vm249_vm3, %v4312_v23, %v4217_v53  ;;  %v1816_v53 = vsel %vm249_vm3, %v4308_v3, %v4312_v23  ;;  %v4327_v9 = vunpack.i.l.bf16 %v4326_v24  ;;  %v1827_v18 = vsel %vm249_vm3, %v4313_v4, %v4317_v1  ;;  %v9405_v3 = vld [vmem:[#allocation12_spill] sm:$0xff] }
 0x359   :  { %v4321_v21 = vpop.permute.xlu1 %4320  ;;  %v1945_v58 = vmax.f32 %v9399_v17, %v1886_v0  ;;  %2418 = vmatmul.mubr.f32.gmra.mrb[70].mxu0 %v1934_v19  ;;  %2533 = vmatmul.mubr.f32.gmra.mrb[70].mxu1 %v1936_v30  ;;  %v1944_v7 = vmax.f32 %v9401_v61, %v1816_v53  ;;  %v1951_v13 = vmax.f32 %v9402_v31, %v1827_v18  ;;  %v4328_v44 = vunpack.i.h.bf16 %v4326_v24  ;;  %v2656_v24 = vld [vmem:[%s8619_s6 + $0x18] sm:$0xff]  ;;  %v2658_v19 = vld [vmem:[%s8619_s6 + $0x28] sm:$0xff]  ;;  %v2659_v30 = vld [vmem:[%s8619_s6 + $0x30] sm:$0xff] }
 0x35a   :  { %v4323_v25 = vunpack.i.h.bf16 %v4321_v21  ;;  %v4322_v11 = vunpack.i.l.bf16 %v4321_v21  ;;  %2422 = vmatprep.mubr.f32.mxu0 %v1943_v50  ;;  %v1837_v33 = vsel %vm249_vm3, %v4238_v29, %v4313_v4  ;;  %v1888_v57 = vsel %vm249_vm3, %v4327_v9, %v4242_v51  ;;  %v2661_v50 = vld [vmem:[%s8619_s6 + $0x40] sm:$0xff]  ;;  %v2662_v17 = vld [vmem:[%s8619_s6 + $0x48] sm:$0xff]  ;;  %v2663_v53 = vld [vmem:[%s8619_s6 + $0x50] sm:$0xff] }
 0x35b   :  { %2537 = vmatprep.mubr.f32.mxu1 %v1945_v58  ;;  %v1809_v10 = vpop.permute.xlu0 %1808  ;;  %v1950_v29 = vmax.f32 %v9404_v62, %v1837_v33  ;;  %v1952_v5 = vmax.f32 %v9405_v3, %v1817_v32  ;;  %v1961_v23 = vmax.f32 %v9407_v26, %v1888_v57  ;;  %v4344_v4 = vmov 0.0|0.0  }
 0x35c   :  { %v1828_v28 = vsel %vm249_vm3, %v4322_v11, %v4323_v25  ;;  %v1838_v35 = vsel %vm249_vm3, %v4257_v47, %v4322_v11  ;;  %v1818_v51 = vsel %vm249_vm3, %v4323_v25, %v4327_v9  ;;  %v1889_v38 = vsel %vm249_vm3, %v1809_v10, %v4248_v39  ;;  %v9410_v47 = vld [vmem:[#allocation14_spill] sm:$0xff]  ;;  %3462 = vmatprep.subr.bf16.mxu0 %v4344_v4 }
 0x35d   :  { %2423 = vmatmul.mubr.f32.gmra.mrb[72].mxu0 %v1942_v43  ;;  %2538 = vmatmul.mubr.f32.gmra.mrb[72].mxu1 %v1944_v7  ;;  %v1789_v60 = vpop.permute.xlu1 %1788  ;;  %v1959_v59 = vmax.f32 %v9406_v14, %v1828_v28  ;;  %v1958_v52 = vmax.f32 %v9408_v2, %v1838_v35  ;;  %v1960_v56 = vmax.f32 %v9409_v54, %v1818_v51  ;;  %v2665_v28 = vld [vmem:[%s8619_s6 + $0x60] sm:$0xf] }
 0x35e   :  { %2427 = vmatprep.mubr.f32.mxu0 %v1951_v13  ;;  %2542 = vmatprep.mubr.f32.mxu1 %v1953_v6  ;;  %v1829_v37 = vsel %vm249_vm3, %v4328_v44, %v1789_v60  ;;  %v1969_v16 = vmax.f32 %v9410_v47, %v1889_v38  ;;  %v1819_v48 = vsel %vm249_vm3, %v1789_v60, %v1809_v10 }
 0x35f   :  { %v1967_v12 = vmax.f32 %v9411_v20, %v1829_v37  ;;  %v1839_v39 = vsel %vm249_vm3, %v4263_v22, %v4328_v44  ;;  %v1968_v15 = vmax.f32 %v9412_v42, %v1819_v48  ;;  %3477 = vmatprep.subr.bf16.mxu1 %v4344_v4  ;;  %v2654_v22 = vld [vmem:[%s8619_s6 + $0x8] sm:$0xff]  ;;  %v3481_v21 = vpack.c.bf16 %v2656_v24, %v2655_v40 }
 0x360   :  { %v1966_v1 = vmax.f32 %v9413_v27, %v1839_v39  ;;  %v3478_v0 = vpack.c.bf16 %v2654_v22, %v2653_v46  ;;  %v3484_v45 = vpack.c.bf16 %v2658_v19, %v2657_v36  ;;  %v3487_v49 = vpack.c.bf16 %v2660_v34, %v2659_v30 }
 0x361   :  { %2428 = vmatmul.mubr.f32.gmra.mrb[74].mxu0 %v1950_v29  ;;  %2543 = vmatmul.mubr.f32.gmra.mrb[74].mxu1 %v1952_v5  ;;  %v3490_v58 = vpack.c.bf16 %v2662_v17, %v2661_v50  ;;  %v3493_v43 = vpack.c.bf16 %v2664_v41, %v2663_v53 }
 0x362   :  { %2432 = vmatprep.mubr.f32.mxu0 %v1959_v59  ;;  %2547 = vmatprep.mubr.f32.mxu1 %v1961_v23 }
 0x363   :  { %3479 = vmatpush3.bf16.msra.mxu1 %v3478_v0 }
 0x364   :  { %3480 = vmatprep.subr.bf16.mxu1 %v4344_v4 }
 0x365   :  { %2433 = vmatmul.mubr.f32.gmra.mrb[76].mxu0 %v1958_v52  ;;  %2548 = vmatmul.mubr.f32.gmra.mrb[76].mxu1 %v1960_v56 }
 0x366   :  { %2437 = vmatprep.mubr.f32.mxu0 %v1967_v12  ;;  %2552 = vmatprep.mubr.f32.mxu1 %v1969_v16 }
 0x367   :  { %3482 = vmatpush3.bf16.msra.mxu1 %v3481_v21 }
 0x368   :  { %3483 = vmatprep.subr.bf16.mxu1 %v4344_v4 }
 0x369   :  { %2438 = vmatmul.mubr.f32.gmra.mrb[78].mxu0 %v1966_v1  ;;  %2553 = vmatmul.mubr.f32.gmra.mrb[78].mxu1 %v1968_v15 }
 0x36a   :  { %3094 = vmatprep.mubr.msk.f32.mxu0 %vm4345_vm9, %v4346_v55  ;;  %3123 = vmatprep.mubr.msk.f32.mxu1 %vm4345_vm9, %v4346_v55 }
 0x36b   :  { %3485 = vmatpush3.bf16.msra.mxu1 %v3484_v45 }
 0x36c   :  { %3486 = vmatprep.subr.bf16.mxu1 %v4344_v4 }
 0x36f   :  { %3488 = vmatpush3.bf16.msra.mxu1 %v3487_v49 }
 0x370   :  { %3489 = vmatprep.subr.bf16.mxu1 %v4344_v4 }
 0x373   :  { %3491 = vmatpush3.bf16.msra.mxu1 %v3490_v58 }
 0x374   :  { %3492 = vmatprep.subr.bf16.mxu1 %v4344_v4 }
 0x377   :  { %3494 = vmatpush3.bf16.msra.mxu1 %v3493_v43 }
 0x378   :  { %3121 = vmatprep.subr.mxu1 %v4346_v55 }
 0x37b   :  { %3122 = vmatpush3.msk.msra.mxu1 %vm2677_vm10, %v2665_v28 }
 0x3db   :  { %v2833_v9 = vpop.f32.mrb[40].mxu0 }
 0x3dc   :  { %v2834_v25 = vpop.f32.mrb[41].mxu0  ;;  %v2895_v11 = vpop.f32.mrb[40].mxu1 }
 0x3dd   :  { %v2835_v18 = vadd.f32 %v2834_v25, %v2833_v9  ;;  %v2896_v63 = vpop.f32.mrb[41].mxu1 }
 0x3de   :  { %v2897_v61 = vadd.f32 %v2896_v63, %v2895_v11 }
 0x3df   :  { %v2836_v7 = vpop.f32.mrb[42].mxu0 }
 0x3e0   :  { %v8539_v31 = vadd.f32 %v2897_v61, %v2835_v18  ;;  %v2837_v13 = vpop.f32.mrb[43].mxu0  ;;  %v2898_v8 = vpop.f32.mrb[42].mxu1 }
 0x3e1   :  { %v2838_v6 = vadd.f32 %v2837_v13, %v2836_v7  ;;  %v2899_v33 = vpop.f32.mrb[43].mxu1 }
 0x3e2   :  { %v2900_v32 = vadd.f32 %v2899_v33, %v2898_v8 }
 0x3e4   :  { %v8544_v10 = vadd.f32 %v2900_v32, %v2838_v6 }
 0x3e5   :  { %v2839_v57 = vpop.f32.mrb[44].mxu0 }
 0x3e6   :  { %v2840_v60 = vpop.f32.mrb[45].mxu0 }
 0x3e7   :  { %v2901_v44 = vpop.f32.mrb[44].mxu1  ;;  %v2841_v62 = vadd.f32 %v2840_v60, %v2839_v57 }
 0x3e8   :  { %v2902_v29 = vpop.f32.mrb[45].mxu1 }
 0x3e9   :  { %v2903_v3 = vadd.f32 %v2902_v29, %v2901_v44  ;;  %v2842_v5 = vpop.f32.mrb[46].mxu0 }
 0x3ea   :  { %v2843_v59 = vpop.f32.mrb[47].mxu0 }
 0x3eb   :  { %v8546_v14 = vadd.f32 %v2903_v3, %v2841_v62  ;;  %v2844_v23 = vadd.f32 %v2843_v59, %v2842_v5 }
 0x3ed   :  { %v2904_v26 = vpop.f32.mrb[46].mxu1 }
 0x3ee   :  { %v2905_v35 = vpop.f32.mrb[47].mxu1 }
 0x3ef   :  { %v2906_v51 = vadd.f32 %v2905_v35, %v2904_v26 }
 0x3f0   :  { %v2845_v38 = vpop.f32.mrb[48].mxu0 }
 0x3f1   :  { %v8548_v37 = vadd.f32 %v2906_v51, %v2844_v23  ;;  %v2846_v2 = vpop.f32.mrb[49].mxu0  ;;  %v2907_v54 = vpop.f32.mrb[48].mxu1 }
 0x3f2   :  { %v2847_v52 = vadd.f32 %v2846_v2, %v2845_v38  ;;  %v2908_v56 = vpop.f32.mrb[49].mxu1  ;;  %v2558_v38 = vld [vmem:[%s8620_s4] sm:$0xff]  ;;  %v2559_v2 = vld [vmem:[%s8620_s4 + $0x8] sm:$0xff] }
 0x3f3   :  { %v2909_v47 = vadd.f32 %v2908_v56, %v2907_v54 }
 0x3f4   :  { %v2848_v16 = vpop.f32.mrb[50].mxu0 }
 0x3f5   :  { %v2849_v48 = vpop.f32.mrb[51].mxu0  ;;  %v8550_v20 = vadd.f32 %v2909_v47, %v2847_v52  ;;  %v2910_v39 = vpop.f32.mrb[50].mxu1 }
 0x3f6   :  { %v2850_v12 = vadd.f32 %v2849_v48, %v2848_v16  ;;  %v2911_v42 = vpop.f32.mrb[51].mxu1 }
 0x3f7   :  { %v2912_v15 = vadd.f32 %v2911_v42, %v2910_v39 }
 0x3f8   :  { %v2851_v27 = vpop.f32.mrb[52].mxu0 }
 0x3f9   :  { %v2852_v1 = vpop.f32.mrb[53].mxu0  ;;  %v8552_v55 = vadd.f32 %v2912_v15, %v2850_v12  ;;  %v2913_v22 = vpop.f32.mrb[52].mxu1 }
 0x3fa   :  { %v2853_v46 = vadd.f32 %v2852_v1, %v2851_v27  ;;  %v2914_v40 = vpop.f32.mrb[53].mxu1 }
 0x3fb   :  { %v2915_v0 = vadd.f32 %v2914_v40, %v2913_v22 }
 0x3fd   :  { %v2854_v24 = vpop.f32.mrb[54].mxu0  ;;  %v8554_v21 = vadd.f32 %v2915_v0, %v2853_v46 }
 0x3fe   :  { %v2855_v36 = vpop.f32.mrb[55].mxu0 }
 0x3ff   :  { %v2856_v19 = vadd.f32 %v2855_v36, %v2854_v24  ;;  %v2560_v36 = vld [vmem:[%s8620_s4 + $0x10] sm:$0xff] }
 0x409   :  { %v2916_v45 = vpop.f32.mrb[54].mxu1 }
 0x40a   :  { %v2917_v30 = vpop.f32.mrb[55].mxu1 }
 0x40b   :  { %v2918_v34 = vadd.f32 %v2917_v30, %v2916_v45 }
 0x40c   :  { %v2857_v49 = vpop.f32.mrb[56].mxu0 }
 0x40d   :  { %v8556_v50 = vadd.f32 %v2918_v34, %v2856_v19  ;;  %v2858_v17 = vpop.f32.mrb[57].mxu0  ;;  %v2919_v58 = vpop.f32.mrb[56].mxu1 }
 0x40e   :  { %v2859_v53 = vadd.f32 %v2858_v17, %v2857_v49  ;;  %v2920_v41 = vpop.f32.mrb[57].mxu1 }
 0x40f   :  { %v2921_v9 = vadd.f32 %v2920_v41, %v2919_v58 }
 0x411   :  { %v8558_v25 = vadd.f32 %v2921_v9, %v2859_v53 }
 0x412   :  { %v2860_v11 = vpop.f32.mrb[58].mxu0  ;;  %v2922_v18 = vpop.f32.mrb[58].mxu1 }
 0x413   :  { %v2861_v63 = vpop.f32.mrb[59].mxu0  ;;  %v2923_v43 = vpop.f32.mrb[59].mxu1 }
 0x414   :  { %v2862_v61 = vadd.f32 %v2861_v63, %v2860_v11  ;;  %v2924_v7 = vadd.f32 %v2923_v43, %v2922_v18 }
 0x416   :  { %v8560_v13 = vadd.f32 %v2924_v7, %v2862_v61  ;;  %v2957_v8 = vpop.f32.mrb[60].mxu0  ;;  %v3019_v6 = vpop.f32.mrb[60].mxu1 }
 0x417   :  { %v2958_v33 = vpop.f32.mrb[61].mxu0  ;;  %v3020_v32 = vpop.f32.mrb[61].mxu1 }
 0x418   :  { %v2959_v28 = vadd.f32 %v2958_v33, %v2957_v8  ;;  %v3021_v57 = vadd.f32 %v3020_v32, %v3019_v6  ;;  %v2562_v33 = vld [vmem:[%s8620_s4 + $0x20] sm:$0xff] }
 0x41a   :  { %v2395_v60 = vadd.f32 %v2959_v28, %v8539_v31 }
 0x41c   :  { %v2960_v44 = vpop.f32.mrb[62].mxu0  ;;  %v3022_v62 = vpop.f32.mrb[62].mxu1  ;;  %v2510_v5 = vadd.f32 %v3021_v57, %v2395_v60 }
 0x41d   :  { %v2961_v29 = vpop.f32.mrb[63].mxu0  ;;  %v3023_v3 = vpop.f32.mrb[63].mxu1 }
 0x41e   :  { %v2962_v59 = vadd.f32 %v2961_v29, %v2960_v44  ;;  %v3024_v26 = vadd.f32 %v3023_v3, %v3022_v62  ;;  %v2568_v16 = vmul.f32 %v2558_v38, %v2510_v5 }
 0x420   :  { %v2400_v23 = vadd.f32 %v2962_v59, %v8544_v10  ;;  %v2963_v35 = vpop.f32.mrb[64].mxu0  ;;  %v3025_v51 = vpop.f32.mrb[64].mxu1 }
 0x421   :  { %v2964_v31 = vpop.f32.mrb[65].mxu0  ;;  %v3026_v52 = vpop.f32.mrb[65].mxu1 }
 0x422   :  { %v2515_v54 = vadd.f32 %v3024_v26, %v2400_v23  ;;  %v2965_v56 = vadd.f32 %v2964_v31, %v2963_v35  ;;  %v3027_v47 = vadd.f32 %v3026_v52, %v3025_v51 }
 0x424   :  { %v2569_v48 = vmul.f32 %v2559_v2, %v2515_v54  ;;  %v2405_v12 = vadd.f32 %v2965_v56, %v8546_v14  ;;  %v2966_v10 = vpop.f32.mrb[66].mxu0  ;;  %v3028_v39 = vpop.f32.mrb[66].mxu1  ;;  %v2561_v14 = vld [vmem:[%s8620_s4 + $0x18] sm:$0xff]  ;;  %v2564_v54 = vld [vmem:[%s8620_s4 + $0x30] sm:$0xff] }
 0x425   :  { %v2967_v42 = vpop.f32.mrb[67].mxu0  ;;  %v3029_v15 = vpop.f32.mrb[67].mxu1 }
 0x426   :  { %v3463_v27 = vpack.c.bf16 %v2569_v48, %v2568_v16  ;;  %v2520_v1 = vadd.f32 %v3027_v47, %v2405_v12  ;;  %v2968_v46 = vadd.f32 %v2967_v42, %v2966_v10  ;;  %v3030_v22 = vadd.f32 %v3029_v15, %v3028_v39 }
 0x428   :  { %v2410_v40 = vadd.f32 %v2968_v46, %v8548_v37  ;;  %v2969_v0 = vpop.f32.mrb[68].mxu0  ;;  %v3031_v24 = vpop.f32.mrb[68].mxu1  ;;  %3464 = vmatpush3.bf16.msra.mxu0 %v3463_v27  ;;  %v2570_v17 = vmul.f32 %v2560_v36, %v2520_v1  ;;  %v2566_v36 = vld [vmem:[%s8620_s4 + $0x40] sm:$0xff] }
 0x429   :  { %v2970_v19 = vpop.f32.mrb[69].mxu0  ;;  %v3032_v45 = vpop.f32.mrb[69].mxu1  ;;  %3465 = vmatprep.subr.bf16.mxu0 %v4344_v4 }
 0x42a   :  { %v2525_v30 = vadd.f32 %v3030_v22, %v2410_v40  ;;  %v2971_v34 = vadd.f32 %v2970_v19, %v2969_v0  ;;  %v3033_v49 = vadd.f32 %v3032_v45, %v3031_v24 }
 0x42c   :  { %v2571_v37 = vmul.f32 %v2561_v14, %v2525_v30  ;;  %v2415_v58 = vadd.f32 %v2971_v34, %v8550_v20  ;;  %v2972_v53 = vpop.f32.mrb[70].mxu0  ;;  %v3034_v41 = vpop.f32.mrb[70].mxu1  ;;  %v2563_v20 = vld [vmem:[%s8620_s4 + $0x28] sm:$0xff] }
 0x42d   :  { %v2973_v9 = vpop.f32.mrb[71].mxu0  ;;  %v3035_v11 = vpop.f32.mrb[71].mxu1  ;;  %v2567_v14 = vld [vmem:[%s8620_s4 + $0x48] sm:$0xff] }
 0x42e   :  { %v3466_v18 = vpack.c.bf16 %v2571_v37, %v2570_v17  ;;  %v2530_v63 = vadd.f32 %v3033_v49, %v2415_v58  ;;  %v2974_v43 = vadd.f32 %v2973_v9, %v2972_v53  ;;  %v3036_v61 = vadd.f32 %v3035_v11, %v3034_v41  ;;  %v2798_v17 = vld [vmem:[%s8622_s7] ss:$0 sm:$0xff] }
 0x430   :  { %v2420_v7 = vadd.f32 %v2974_v43, %v8552_v55  ;;  %v2975_v8 = vpop.f32.mrb[72].mxu0  ;;  %v3037_v6 = vpop.f32.mrb[72].mxu1  ;;  %3467 = vmatpush3.bf16.msra.mxu0 %v3466_v18  ;;  %v2572_v62 = vmul.f32 %v2562_v33, %v2530_v63 }
 0x431   :  { %v2976_v32 = vpop.f32.mrb[73].mxu0  ;;  %v3038_v28 = vpop.f32.mrb[73].mxu1  ;;  %3468 = vmatprep.subr.bf16.mxu0 %v4344_v4 }
 0x432   :  { %v2535_v57 = vadd.f32 %v3036_v61, %v2420_v7  ;;  %v2977_v60 = vadd.f32 %v2976_v32, %v2975_v8  ;;  %v3039_v44 = vadd.f32 %v3038_v28, %v3037_v6 }
 0x434   :  { %v2573_v55 = vmul.f32 %v2563_v20, %v2535_v57  ;;  %v2425_v29 = vadd.f32 %v2977_v60, %v8554_v21  ;;  %v2978_v3 = vpop.f32.mrb[74].mxu0  ;;  %v3040_v5 = vpop.f32.mrb[74].mxu1  ;;  %v2565_v21 = vld [vmem:[%s8620_s4 + $0x38] sm:$0xff] }
 0x435   :  { %v2979_v59 = vpop.f32.mrb[75].mxu0  ;;  %v3041_v26 = vpop.f32.mrb[75].mxu1 }
 0x436   :  { %v3469_v23 = vpack.c.bf16 %v2573_v55, %v2572_v62  ;;  %v2540_v35 = vadd.f32 %v3039_v44, %v2425_v29  ;;  %v2980_v51 = vadd.f32 %v2979_v59, %v2978_v3  ;;  %v3042_v38 = vadd.f32 %v3041_v26, %v3040_v5 }
 0x438   :  { %v2430_v2 = vadd.f32 %v2980_v51, %v8556_v50  ;;  %v2981_v31 = vpop.f32.mrb[76].mxu0  ;;  %v3043_v52 = vpop.f32.mrb[76].mxu1  ;;  %3470 = vmatpush3.bf16.msra.mxu0 %v3469_v23  ;;  %v2574_v10 = vmul.f32 %v2564_v54, %v2540_v35 }
 0x439   :  { %v2982_v56 = vpop.f32.mrb[77].mxu0  ;;  %v3044_v47 = vpop.f32.mrb[77].mxu1  ;;  %3471 = vmatprep.subr.bf16.mxu0 %v4344_v4 }
 0x43a   :  { %v2545_v16 = vadd.f32 %v3042_v38, %v2430_v2  ;;  %v2983_v48 = vadd.f32 %v2982_v56, %v2981_v31  ;;  %v3045_v12 = vadd.f32 %v3044_v47, %v3043_v52 }
 0x43c   :  { %v2575_v50 = vmul.f32 %v2565_v21, %v2545_v16  ;;  %v2435_v39 = vadd.f32 %v2983_v48, %v8558_v25  ;;  %v2984_v42 = vpop.f32.mrb[78].mxu0  ;;  %v3046_v15 = vpop.f32.mrb[78].mxu1 }
 0x43d   :  { %v2985_v27 = vpop.f32.mrb[79].mxu0  ;;  %v3047_v1 = vpop.f32.mrb[79].mxu1 }
 0x43e   :  { %v3472_v46 = vpack.c.bf16 %v2575_v50, %v2574_v10  ;;  %v2550_v22 = vadd.f32 %v3045_v12, %v2435_v39  ;;  %v2986_v40 = vadd.f32 %v2985_v27, %v2984_v42  ;;  %v3048_v0 = vadd.f32 %v3047_v1, %v3046_v15 }
 0x440   :  { %v2440_v24 = vadd.f32 %v2986_v40, %v8560_v13  ;;  %3473 = vmatpush3.bf16.msra.mxu0 %v3472_v46  ;;  %v2576_v19 = vmul.f32 %v2566_v36, %v2550_v22  ;;  %v2578_v13 = vld [vmem:[%s8621_s5] sm:$0xff] }
 0x441   :  { %3474 = vmatprep.subr.bf16.mxu0 %v4344_v4 }
 0x442   :  { %v2555_v25 = vadd.f32 %v3048_v0, %v2440_v24 }
 0x444   :  { %v2577_v45 = vmul.f32 %v2567_v14, %v2555_v25 }
 0x446   :  { %v3475_v30 = vpack.c.bf16 %v2577_v45, %v2576_v19 }
 0x448   :  { %3476 = vmatpush3.bf16.msra.mxu0 %v3475_v30 }
 0x44b   :  { %3095 = vmatmul.mubr.msk.f32.vlgmr.msra.gmra.mrb[80].mxu0 %vm2579_vm11, %v2578_v13 }
 0x51e   :  { %v2649_v34 = vpop.f32.mrb[80].mxu0 }
 0x51f   :  { %v3096_v49 = vpop.f32.mrb[81].mxu0  ;;  %3124 = vmatmul.mubr.msk.f32.vlgmr.msra.gmra.mrb[80].mxu1 %vm2673_vm12, %v2649_v34 }
 0x5f2   :  { %v2747_v4 = vpop.f32.mrb[80].mxu1 }
 0x5f3   :  { %v2748_v37 = vadd.f32 %v2798_v17, %v2747_v4  ;;  %v3125_v58 = vpop.f32.mrb[81].mxu1 }
 0x5f5   :  { %2752 = vst.msk [vmem:[%s8623_s8] sm:$0xff] %vm2751_vm13, %v2748_v37 }

</bundles_post_ra>
